<compile_context>
chip_gen: v5e
topology: v5e:2x2
jax: 0.10.0
libtpu: 0.0.40
codegen_flags: <defaults>
</compile_context>

<pallas_src>
import functools

import jax
import jax.numpy as jnp
import numpy as np
from jax.experimental import pallas as pl
from jax.experimental.pallas import tpu as pltpu

# ---- static problem sizes implied by the module ----------------------------
CIN, H, W = 3, 32, 32          # CIFAR input
COUT = 16                      # conv out channels
KH = KW = 3
KDIM = CIN * KH * KW           # 27
STRIDE, PAD = 2, 1
OH = OW = 16                   # conv output spatial: floor((32+2-3)/2)+1
PK = 3                         # max-pool kernel == stride
PH = PW = 5                    # pooled spatial: floor((16-3)/3)+1
FLAT = PH * PW * COUT          # 400  (matches nn.Linear(400, 16))
NCLS = 16
NOUT = 128                     # logit columns padded to a full vreg lane width
POOL_COLS = PW * COUT          # 80 lanes: (w', cout) layout after the W-pool
BN_EPS = 1e-5


def _pick_tile_b(batch):
    """Images per grid step: as large as possible (cap 32) while keeping at
    least 4 grid steps so both v7x TensorCores get work and the software
    pipeline has steps to overlap.  8 <= TILE_B <= 32."""
    tile = 32
    while tile > 8 and pl.cdiv(batch, tile) < 4:
        tile //= 2
    return tile


# ---- fused kernel -----------------------------------------------------------
def fused_cnn_kernel(patch_ref, w1_ref, shift_ref, wl_ref, bl_ref, out_ref, *,
                     tile_b):
    """conv(+BN,ReLU) + 3x3/3 maxpool + cust_flatten + linear, TILE_B images.

    patch_ref: (tile_b*OH, OW*KDIM)   bf16 im2col patches, row=(b,oh), col=27*ow+k
    w1_ref:    (PK, OW*KDIM, PW*COUT) bf16 conv weight (BN scale folded), one
                                      block-structured slab per W-pool tap dw:
                                      [27*ow+k, 16*w'+c] = w[k,c] iff ow==3*w'+dw
    shift_ref: (1, PW*COUT)           f32  conv-bias + BN shift, tiled over w'
    wl_ref:    (PH, PW*COUT, NOUT)    bf16 linear weight per pooled row h,
                                      cols 16..127 are zero padding
    bl_ref:    (1, NOUT)              f32  linear bias (padded with zeros)
    out_ref:   (tile_b, NOUT)         f32  logits (cols 16..127 are zero)
    """
    patches = patch_ref[...]                               # (tile_b*16, 432)

    # Conv (with BN scale folded in) + W-direction max-pool as 3 independent
    # lane-dense MXU matmuls: y_dw[(b,oh), 16*w'+c] = conv at ow = 3*w' + dw.
    y0 = jnp.dot(patches, w1_ref[0], preferred_element_type=jnp.float32)
    y1 = jnp.dot(patches, w1_ref[1], preferred_element_type=jnp.float32)
    y2 = jnp.dot(patches, w1_ref[2], preferred_element_type=jnp.float32)
    # BN shift + ReLU applied after the max (both monotone => equivalent).
    mw = jnp.maximum(jnp.maximum(jnp.maximum(y0, y1), y2) + shift_ref[...],
                     0.0)                                  # (tile_b*16, 80) f32

    # H-direction max-pool + pooled-row gather, fused with the linear layer:
    # 5 independent (tile_b,80)x(80,128) matmuls (one per pooled row h),
    # summed as a tree -- no carried MXU accumulator chain.
    x3 = mw.reshape(tile_b, OH, POOL_COLS)                 # leading-dim split only
    parts = []
    for h in range(PH):
        r = jnp.maximum(jnp.maximum(x3[:, PK * h, :], x3[:, PK * h + 1, :]),
                        x3[:, PK * h + 2, :])              # (tile_b, 80) pooled row h
        parts.append(jnp.dot(r.astype(jnp.bfloat16), wl_ref[h],
                             preferred_element_type=jnp.float32))  # (tile_b, 128)
    logits = ((parts[0] + parts[1]) + (parts[2] + parts[3])) + parts[4] \
        + bl_ref[...]
    out_ref[...] = logits                                  # unmasked 128-lane store


# ---- glue -------------------------------------------------------------------
def im2col(x):
    """x: (B, CIN, H, W) -> (B*OH*OW, CIN*KH*KW), inner order (cin, kh, kw)."""
    B = x.shape[0]
    xp = jnp.pad(x, ((0, 0), (0, 0), (PAD, PAD), (PAD, PAD)))
    cols = []
    for kh in range(KH):
        for kw in range(KW):
            cols.append(xp[:, :, kh:kh + 2 * OH - 1:STRIDE,
                           kw:kw + 2 * OW - 1:STRIDE])     # (B, CIN, OH, OW)
    stk = jnp.stack(cols, axis=2)                          # (B, CIN, 9, OH, OW)
    return stk.transpose(0, 3, 4, 1, 2).reshape(B * OH * OW, CIN * KH * KW)


@jax.jit
def cifar_cnn_forward(x, params):
    B = x.shape[0]
    w1, b1 = params["conv_w"], params["conv_b"]
    gamma, beta = params["bn_gamma"], params["bn_beta"]
    mean, var = params["bn_mean"], params["bn_var"]
    wl, bl = params["lin_w"], params["lin_b"]

    # ---- parameter prep (glue) ----
    # Fold conv bias + BN (inference mode) into the weight / a per-channel shift.
    w1_mat = w1.reshape(COUT, KDIM).T                      # (27, 16), k = 9*cin+3*kh+kw
    inv_std = jax.lax.rsqrt(var + BN_EPS)
    scale = gamma * inv_std                                # (16,)
    w1_scaled = w1_mat * scale[None, :]                    # BN scale folded, f32
    shift_c = (b1 - mean) * scale + beta                   # (16,)
    shift = jnp.tile(shift_c, PW)[None, :]                 # (1, 80) f32, idx 16*w'+c

    # Three block-structured conv weights, one per W-pool tap dw in {0,1,2}:
    #   W_dw[27*ow + k, 16*w' + c] = w1_scaled[k, c]  iff  ow == 3*w' + dw.
    sel = np.stack([(np.arange(OW)[:, None] ==
                     (PK * np.arange(PW)[None, :] + dw)).astype(np.float32)
                    for dw in range(PK)])                  # (3, 16, 5) static
    w1_pool = jnp.stack([jnp.kron(sel[dw], w1_scaled) for dw in range(PK)])
    w1_pool = w1_pool.astype(jnp.bfloat16)                 # (3, 432, 80)

    # Linear weight per pooled row h, lane order 16*w'+c (== cust_flatten order),
    # output columns padded 16 -> 128 with zeros for unmasked lane-dense stores.
    wl_rows = wl.T.reshape(PH, PW * COUT, NCLS)            # (5, 80, 16)
    wl_stack = jnp.pad(wl_rows, ((0, 0), (0, 0), (0, NOUT - NCLS)))
    wl_stack = wl_stack.astype(jnp.bfloat16)               # (5, 80, 128)
    bl_pad = jnp.pad(bl, (0, NOUT - NCLS))[None, :]        # (1, 128) f32

    # im2col, folded to rows=(b,oh), cols=27*ow+k (lane-dense matmul operand).
    patches = im2col(x).reshape(B * OH, OW * KDIM).astype(jnp.bfloat16)

    TILE_B = _pick_tile_b(B)
    n_tiles = pl.cdiv(B, TILE_B)
    b_pad = n_tiles * TILE_B
    if b_pad != B:                                         # pad batch to TILE_B
        patches = jnp.pad(patches, ((0, (b_pad - B) * OH), (0, 0)))

    out = pl.pallas_call(
        functools.partial(fused_cnn_kernel, tile_b=TILE_B),
        out_shape=jax.ShapeDtypeStruct((b_pad, NOUT), jnp.float32),
        grid_spec=pltpu.PrefetchScalarGridSpec(
            num_scalar_prefetch=0,
            grid=(n_tiles,),
            in_specs=[
                pl.BlockSpec((TILE_B * OH, OW * KDIM), lambda i: (i, 0)),
                pl.BlockSpec((PK, OW * KDIM, PW * COUT), lambda i: (0, 0, 0)),
                pl.BlockSpec((1, PW * COUT), lambda i: (0, 0)),
                pl.BlockSpec((PH, PW * COUT, NOUT), lambda i: (0, 0, 0)),
                pl.BlockSpec((1, NOUT), lambda i: (0, 0)),
            ],
            out_specs=pl.BlockSpec((TILE_B, NOUT), lambda i: (i, 0)),
        ),
        compiler_params=pltpu.CompilerParams(
            dimension_semantics=("parallel",)),
    )(patches, w1_pool, shift, wl_stack, bl_pad)
    # Padded batch rows compute (discarded) garbage logits -> keep the [:B] slice.
    return out[:B, :NCLS]


# ---- pure-JAX reference (mirrors the PyTorch forward, eval-mode BN) ---------
def reference_forward(x, params):
    w1, b1 = params["conv_w"], params["conv_b"]
    gamma, beta = params["bn_gamma"], params["bn_beta"]
    mean, var = params["bn_mean"], params["bn_var"]
    wl, bl = params["lin_w"], params["lin_b"]

    conv = jax.lax.conv_general_dilated(
        x, w1, window_strides=(STRIDE, STRIDE), padding=((PAD, PAD), (PAD, PAD)),
        dimension_numbers=("NCHW", "OIHW", "NCHW"))
    conv = conv + b1[None, :, None, None]
    bn = (conv - mean[None, :, None, None]) * jax.lax.rsqrt(
        var[None, :, None, None] + BN_EPS) * gamma[None, :, None, None] \
        + beta[None, :, None, None]
    act = jnp.maximum(bn, 0.0)
    pooled = jax.lax.reduce_window(act, -jnp.inf, jax.lax.max,
                                   (1, 1, PK, PK), (1, 1, PK, PK), "VALID")
    flat = pooled.transpose(0, 2, 3, 1).reshape(x.shape[0], -1)   # (h, w, c) order
    return flat @ wl.T + bl


# ---- main -------------------------------------------------------------------
if __name__ == "__main__":
    key = jax.random.PRNGKey(0)
    ks = jax.random.split(key, 9)
    params = dict(
        conv_w=jax.random.normal(ks[0], (COUT, CIN, KH, KW), jnp.float32) * 0.1,
        conv_b=jax.random.normal(ks[1], (COUT,), jnp.float32) * 0.1,
        bn_gamma=jax.random.uniform(ks[2], (COUT,), jnp.float32, 0.8, 1.2),
        bn_beta=jax.random.normal(ks[3], (COUT,), jnp.float32) * 0.1,
        bn_mean=jax.random.normal(ks[4], (COUT,), jnp.float32) * 0.1,
        bn_var=jax.random.uniform(ks[5], (COUT,), jnp.float32, 0.5, 1.5),
        lin_w=jax.random.normal(ks[6], (NCLS, FLAT), jnp.float32) * 0.05,
        lin_b=jax.random.normal(ks[7], (NCLS,), jnp.float32) * 0.1,
    )
    B = 56                 # -> TILE_B=16, 4 grid steps, exercises batch padding
    x = jax.random.normal(ks[8], (B, CIN, H, W), jnp.float32)    # (B, 3, 32, 32)

    out = jax.block_until_ready(cifar_cnn_forward(x, params))    # (B, 16)
    ref = jax.block_until_ready(reference_forward(x, params))

    assert out.shape == (B, NCLS), out.shape
    # bf16 MXU operands (conv + linear) vs. f32 reference -> ~1e-2 relative error.
    np.testing.assert_allclose(np.asarray(out), np.asarray(ref),
                               rtol=2e-2, atol=3e-2)
    print("KERNEL_OK")
</pallas_src>

<mosaic_0001>
module attributes {stable_mosaic.version = 11 : i64} {
  func.func @fused_cnn_kernel(%arg0: i32, %arg1: memref<256x432xbf16, #tpu.memory_space<vmem>>, %arg2: memref<3x432x80xbf16, #tpu.memory_space<vmem>>, %arg3: memref<1x80xf32, #tpu.memory_space<vmem>>, %arg4: memref<5x80x128xbf16, #tpu.memory_space<vmem>>, %arg5: memref<1x128xf32, #tpu.memory_space<vmem>>, %arg6: memref<16x128xf32, #tpu.memory_space<vmem>>) attributes {dimension_semantics = [#tpu.dimension_semantics<parallel>], iteration_bounds = array<i64: 4>, scalar_prefetch = 0 : i64, scratch_operands = 0 : i64, tpu.core_type = #tpu.core_type<tc>, window_params = [{transform_indices = @transform_0, window_bounds = array<i64: 256, 432>}, {pipeline_mode = #tpu.pipeline_mode<synchronous>, transform_indices = @transform_1, window_bounds = array<i64: 3, 432, 80>}, {pipeline_mode = #tpu.pipeline_mode<synchronous>, transform_indices = @transform_2, window_bounds = array<i64: 1, 80>}, {pipeline_mode = #tpu.pipeline_mode<synchronous>, transform_indices = @transform_3, window_bounds = array<i64: 5, 80, 128>}, {pipeline_mode = #tpu.pipeline_mode<synchronous>, transform_indices = @transform_4, window_bounds = array<i64: 1, 128>}, {transform_indices = @transform_5, window_bounds = array<i64: 16, 128>}]} {
    %c0 = arith.constant 0 : index
    %c0_0 = arith.constant 0 : index
    %0 = vector.load %arg1[%c0, %c0_0] : memref<256x432xbf16, #tpu.memory_space<vmem>>, vector<256x432xbf16>
    %c0_1 = arith.constant 0 : index
    %c0_2 = arith.constant 0 : index
    %c0_3 = arith.constant 0 : index
    %1 = vector.load %arg2[%c0_1, %c0_2, %c0_3] : memref<3x432x80xbf16, #tpu.memory_space<vmem>>, vector<1x432x80xbf16>
    %2 = vector.shape_cast %1 : vector<1x432x80xbf16> to vector<432x80xbf16>
    %cst = arith.constant dense<0.000000e+00> : vector<256x80xf32>
    %3 = tpu.matmul %0, %2, %cst {dimension_numbers = #tpu.dot_dimension_numbers<[1], [0], [0], [1], [0, 0, 1, 1], [], []>} : vector<256x432xbf16>, vector<432x80xbf16>, vector<256x80xf32> -> vector<256x80xf32>
    %c1 = arith.constant 1 : index
    %c0_4 = arith.constant 0 : index
    %c0_5 = arith.constant 0 : index
    %4 = vector.load %arg2[%c1, %c0_4, %c0_5] : memref<3x432x80xbf16, #tpu.memory_space<vmem>>, vector<1x432x80xbf16>
    %5 = vector.shape_cast %4 : vector<1x432x80xbf16> to vector<432x80xbf16>
    %cst_6 = arith.constant dense<0.000000e+00> : vector<256x80xf32>
    %6 = tpu.matmul %0, %5, %cst_6 {dimension_numbers = #tpu.dot_dimension_numbers<[1], [0], [0], [1], [0, 0, 1, 1], [], []>} : vector<256x432xbf16>, vector<432x80xbf16>, vector<256x80xf32> -> vector<256x80xf32>
    %c2 = arith.constant 2 : index
    %c0_7 = arith.constant 0 : index
    %c0_8 = arith.constant 0 : index
    %7 = vector.load %arg2[%c2, %c0_7, %c0_8] : memref<3x432x80xbf16, #tpu.memory_space<vmem>>, vector<1x432x80xbf16>
    %8 = vector.shape_cast %7 : vector<1x432x80xbf16> to vector<432x80xbf16>
    %cst_9 = arith.constant dense<0.000000e+00> : vector<256x80xf32>
    %9 = tpu.matmul %0, %8, %cst_9 {dimension_numbers = #tpu.dot_dimension_numbers<[1], [0], [0], [1], [0, 0, 1, 1], [], []>} : vector<256x432xbf16>, vector<432x80xbf16>, vector<256x80xf32> -> vector<256x80xf32>
    %10 = arith.maximumf %3, %6 : vector<256x80xf32>
    %11 = arith.maximumf %10, %9 : vector<256x80xf32>
    %c0_10 = arith.constant 0 : index
    %c0_11 = arith.constant 0 : index
    %12 = vector.load %arg3[%c0_10, %c0_11] : memref<1x80xf32, #tpu.memory_space<vmem>>, vector<1x80xf32>
    %13 = vector.broadcast %12 : vector<1x80xf32> to vector<256x80xf32>
    %14 = arith.addf %11, %13 : vector<256x80xf32>
    %cst_12 = arith.constant 0.000000e+00 : f32
    %15 = vector.broadcast %cst_12 : f32 to vector<256x80xf32>
    %16 = arith.maximumf %14, %15 : vector<256x80xf32>
    %17 = vector.shape_cast %16 : vector<256x80xf32> to vector<16x16x80xf32>
    %18 = vector.extract_strided_slice %17 {offsets = [0, 0, 0], sizes = [16, 1, 80], strides = [1, 1, 1]} : vector<16x16x80xf32> to vector<16x1x80xf32>
    %19 = vector.shape_cast %18 : vector<16x1x80xf32> to vector<16x80xf32>
    %20 = vector.extract_strided_slice %17 {offsets = [0, 1, 0], sizes = [16, 1, 80], strides = [1, 1, 1]} : vector<16x16x80xf32> to vector<16x1x80xf32>
    %21 = vector.shape_cast %20 : vector<16x1x80xf32> to vector<16x80xf32>
    %22 = arith.maximumf %19, %21 : vector<16x80xf32>
    %23 = vector.extract_strided_slice %17 {offsets = [0, 2, 0], sizes = [16, 1, 80], strides = [1, 1, 1]} : vector<16x16x80xf32> to vector<16x1x80xf32>
    %24 = vector.shape_cast %23 : vector<16x1x80xf32> to vector<16x80xf32>
    %25 = arith.maximumf %22, %24 : vector<16x80xf32>
    %26 = arith.truncf %25 : vector<16x80xf32> to vector<16x80xbf16>
    %c0_13 = arith.constant 0 : index
    %c0_14 = arith.constant 0 : index
    %c0_15 = arith.constant 0 : index
    %27 = vector.load %arg4[%c0_13, %c0_14, %c0_15] : memref<5x80x128xbf16, #tpu.memory_space<vmem>>, vector<1x80x128xbf16>
    %28 = vector.shape_cast %27 : vector<1x80x128xbf16> to vector<80x128xbf16>
    %cst_16 = arith.constant dense<0.000000e+00> : vector<16x128xf32>
    %29 = tpu.matmul %26, %28, %cst_16 {dimension_numbers = #tpu.dot_dimension_numbers<[1], [0], [0], [1], [0, 0, 1, 1], [], []>} : vector<16x80xbf16>, vector<80x128xbf16>, vector<16x128xf32> -> vector<16x128xf32>
    %30 = vector.extract_strided_slice %17 {offsets = [0, 3, 0], sizes = [16, 1, 80], strides = [1, 1, 1]} : vector<16x16x80xf32> to vector<16x1x80xf32>
    %31 = vector.shape_cast %30 : vector<16x1x80xf32> to vector<16x80xf32>
    %32 = vector.extract_strided_slice %17 {offsets = [0, 4, 0], sizes = [16, 1, 80], strides = [1, 1, 1]} : vector<16x16x80xf32> to vector<16x1x80xf32>
    %33 = vector.shape_cast %32 : vector<16x1x80xf32> to vector<16x80xf32>
    %34 = arith.maximumf %31, %33 : vector<16x80xf32>
    %35 = vector.extract_strided_slice %17 {offsets = [0, 5, 0], sizes = [16, 1, 80], strides = [1, 1, 1]} : vector<16x16x80xf32> to vector<16x1x80xf32>
    %36 = vector.shape_cast %35 : vector<16x1x80xf32> to vector<16x80xf32>
    %37 = arith.maximumf %34, %36 : vector<16x80xf32>
    %38 = arith.truncf %37 : vector<16x80xf32> to vector<16x80xbf16>
    %c1_17 = arith.constant 1 : index
    %c0_18 = arith.constant 0 : index
    %c0_19 = arith.constant 0 : index
    %39 = vector.load %arg4[%c1_17, %c0_18, %c0_19] : memref<5x80x128xbf16, #tpu.memory_space<vmem>>, vector<1x80x128xbf16>
    %40 = vector.shape_cast %39 : vector<1x80x128xbf16> to vector<80x128xbf16>
    %cst_20 = arith.constant dense<0.000000e+00> : vector<16x128xf32>
    %41 = tpu.matmul %38, %40, %cst_20 {dimension_numbers = #tpu.dot_dimension_numbers<[1], [0], [0], [1], [0, 0, 1, 1], [], []>} : vector<16x80xbf16>, vector<80x128xbf16>, vector<16x128xf32> -> vector<16x128xf32>
    %42 = vector.extract_strided_slice %17 {offsets = [0, 6, 0], sizes = [16, 1, 80], strides = [1, 1, 1]} : vector<16x16x80xf32> to vector<16x1x80xf32>
    %43 = vector.shape_cast %42 : vector<16x1x80xf32> to vector<16x80xf32>
    %44 = vector.extract_strided_slice %17 {offsets = [0, 7, 0], sizes = [16, 1, 80], strides = [1, 1, 1]} : vector<16x16x80xf32> to vector<16x1x80xf32>
    %45 = vector.shape_cast %44 : vector<16x1x80xf32> to vector<16x80xf32>
    %46 = arith.maximumf %43, %45 : vector<16x80xf32>
    %47 = vector.extract_strided_slice %17 {offsets = [0, 8, 0], sizes = [16, 1, 80], strides = [1, 1, 1]} : vector<16x16x80xf32> to vector<16x1x80xf32>
    %48 = vector.shape_cast %47 : vector<16x1x80xf32> to vector<16x80xf32>
    %49 = arith.maximumf %46, %48 : vector<16x80xf32>
    %50 = arith.truncf %49 : vector<16x80xf32> to vector<16x80xbf16>
    %c2_21 = arith.constant 2 : index
    %c0_22 = arith.constant 0 : index
    %c0_23 = arith.constant 0 : index
    %51 = vector.load %arg4[%c2_21, %c0_22, %c0_23] : memref<5x80x128xbf16, #tpu.memory_space<vmem>>, vector<1x80x128xbf16>
    %52 = vector.shape_cast %51 : vector<1x80x128xbf16> to vector<80x128xbf16>
    %cst_24 = arith.constant dense<0.000000e+00> : vector<16x128xf32>
    %53 = tpu.matmul %50, %52, %cst_24 {dimension_numbers = #tpu.dot_dimension_numbers<[1], [0], [0], [1], [0, 0, 1, 1], [], []>} : vector<16x80xbf16>, vector<80x128xbf16>, vector<16x128xf32> -> vector<16x128xf32>
    %54 = vector.extract_strided_slice %17 {offsets = [0, 9, 0], sizes = [16, 1, 80], strides = [1, 1, 1]} : vector<16x16x80xf32> to vector<16x1x80xf32>
    %55 = vector.shape_cast %54 : vector<16x1x80xf32> to vector<16x80xf32>
    %56 = vector.extract_strided_slice %17 {offsets = [0, 10, 0], sizes = [16, 1, 80], strides = [1, 1, 1]} : vector<16x16x80xf32> to vector<16x1x80xf32>
    %57 = vector.shape_cast %56 : vector<16x1x80xf32> to vector<16x80xf32>
    %58 = arith.maximumf %55, %57 : vector<16x80xf32>
    %59 = vector.extract_strided_slice %17 {offsets = [0, 11, 0], sizes = [16, 1, 80], strides = [1, 1, 1]} : vector<16x16x80xf32> to vector<16x1x80xf32>
    %60 = vector.shape_cast %59 : vector<16x1x80xf32> to vector<16x80xf32>
    %61 = arith.maximumf %58, %60 : vector<16x80xf32>
    %62 = arith.truncf %61 : vector<16x80xf32> to vector<16x80xbf16>
    %c3 = arith.constant 3 : index
    %c0_25 = arith.constant 0 : index
    %c0_26 = arith.constant 0 : index
    %63 = vector.load %arg4[%c3, %c0_25, %c0_26] : memref<5x80x128xbf16, #tpu.memory_space<vmem>>, vector<1x80x128xbf16>
    %64 = vector.shape_cast %63 : vector<1x80x128xbf16> to vector<80x128xbf16>
    %cst_27 = arith.constant dense<0.000000e+00> : vector<16x128xf32>
    %65 = tpu.matmul %62, %64, %cst_27 {dimension_numbers = #tpu.dot_dimension_numbers<[1], [0], [0], [1], [0, 0, 1, 1], [], []>} : vector<16x80xbf16>, vector<80x128xbf16>, vector<16x128xf32> -> vector<16x128xf32>
    %66 = vector.extract_strided_slice %17 {offsets = [0, 12, 0], sizes = [16, 1, 80], strides = [1, 1, 1]} : vector<16x16x80xf32> to vector<16x1x80xf32>
    %67 = vector.shape_cast %66 : vector<16x1x80xf32> to vector<16x80xf32>
    %68 = vector.extract_strided_slice %17 {offsets = [0, 13, 0], sizes = [16, 1, 80], strides = [1, 1, 1]} : vector<16x16x80xf32> to vector<16x1x80xf32>
    %69 = vector.shape_cast %68 : vector<16x1x80xf32> to vector<16x80xf32>
    %70 = arith.maximumf %67, %69 : vector<16x80xf32>
    %71 = vector.extract_strided_slice %17 {offsets = [0, 14, 0], sizes = [16, 1, 80], strides = [1, 1, 1]} : vector<16x16x80xf32> to vector<16x1x80xf32>
    %72 = vector.shape_cast %71 : vector<16x1x80xf32> to vector<16x80xf32>
    %73 = arith.maximumf %70, %72 : vector<16x80xf32>
    %74 = arith.truncf %73 : vector<16x80xf32> to vector<16x80xbf16>
    %c4 = arith.constant 4 : index
    %c0_28 = arith.constant 0 : index
    %c0_29 = arith.constant 0 : index
    %75 = vector.load %arg4[%c4, %c0_28, %c0_29] : memref<5x80x128xbf16, #tpu.memory_space<vmem>>, vector<1x80x128xbf16>
    %76 = vector.shape_cast %75 : vector<1x80x128xbf16> to vector<80x128xbf16>
    %cst_30 = arith.constant dense<0.000000e+00> : vector<16x128xf32>
    %77 = tpu.matmul %74, %76, %cst_30 {dimension_numbers = #tpu.dot_dimension_numbers<[1], [0], [0], [1], [0, 0, 1, 1], [], []>} : vector<16x80xbf16>, vector<80x128xbf16>, vector<16x128xf32> -> vector<16x128xf32>
    %78 = arith.addf %29, %41 : vector<16x128xf32>
    %79 = arith.addf %53, %65 : vector<16x128xf32>
    %80 = arith.addf %78, %79 : vector<16x128xf32>
    %81 = arith.addf %80, %77 : vector<16x128xf32>
    %c0_31 = arith.constant 0 : index
    %c0_32 = arith.constant 0 : index
    %82 = vector.load %arg5[%c0_31, %c0_32] : memref<1x128xf32, #tpu.memory_space<vmem>>, vector<1x128xf32>
    %83 = vector.broadcast %82 : vector<1x128xf32> to vector<16x128xf32>
    %84 = arith.addf %81, %83 : vector<16x128xf32>
    %c0_33 = arith.constant 0 : index
    %c0_34 = arith.constant 0 : index
    %85 = vector.load %arg6[%c0_33, %c0_34] : memref<16x128xf32, #tpu.memory_space<vmem>>, vector<16x128xf32>
    tpu.vector_store %arg6[%c0_33, %c0_34], %84 {strides = array<i32>} : memref<16x128xf32, #tpu.memory_space<vmem>>, vector<16x128xf32>,
    return
  }
  func.func @transform_0(%arg0: i32) -> (i32, i32) {
    %c0_i32 = arith.constant 0 : i32
    %c0_i32_0 = arith.constant 0 : i32
    return %arg0, %c0_i32 : i32, i32
  }
  func.func @transform_1(%arg0: i32) -> (i32, i32, i32) {
    %c0_i32 = arith.constant 0 : i32
    %c0_i32_0 = arith.constant 0 : i32
    %c0_i32_1 = arith.constant 0 : i32
    %c0_i32_2 = arith.constant 0 : i32
    return %c0_i32, %c0_i32_0, %c0_i32_1 : i32, i32, i32
  }
  func.func @transform_2(%arg0: i32) -> (i32, i32) {
    %c0_i32 = arith.constant 0 : i32
    %c0_i32_0 = arith.constant 0 : i32
    %c0_i32_1 = arith.constant 0 : i32
    return %c0_i32, %c0_i32_0 : i32, i32
  }
  func.func @transform_3(%arg0: i32) -> (i32, i32, i32) {
    %c0_i32 = arith.constant 0 : i32
    %c0_i32_0 = arith.constant 0 : i32
    %c0_i32_1 = arith.constant 0 : i32
    %c0_i32_2 = arith.constant 0 : i32
    return %c0_i32, %c0_i32_0, %c0_i32_1 : i32, i32, i32
  }
  func.func @transform_4(%arg0: i32) -> (i32, i32) {
    %c0_i32 = arith.constant 0 : i32
    %c0_i32_0 = arith.constant 0 : i32
    %c0_i32_1 = arith.constant 0 : i32
    return %c0_i32, %c0_i32_0 : i32, i32
  }
  func.func @transform_5(%arg0: i32) -> (i32, i32) {
    %c0_i32 = arith.constant 0 : i32
    %c0_i32_0 = arith.constant 0 : i32
    return %arg0, %c0_i32 : i32, i32
  }
}

</mosaic_0001>

<bundles_post_ra>
// kernel: tile.8
= control target key start
LH: loop header
LB: loop body
LE: loop exit
PB: predicated region body
PF: predicated region fallthrough
CT: control target
= control target key end

     0   :  { %s22_s0 = inlined_call_operand.vmem [shape: f32[16], index: 0, kind: input, shape index: {}]   ;;  %s23_s1 = inlined_call_operand.vmem [shape: f32[5,16], index: 1, kind: output, shape index: {}]  }
   0x1   :  { %v4_v0 = vld [vmem:[%s22_s0] ss:$0 sm:$0xff] }
   0x2   :  { %5 = vst [vmem:[%s23_s1] sm:$0xff] %v4_v0 }

// kernel: tile.9
= control target key start
LH: loop header
LB: loop body
LE: loop exit
PB: predicated region body
PF: predicated region fallthrough
CT: control target
= control target key end

     0   :  { %s43_s10 = smov 64   ;;  %s44_s11 = smov 32   ;;  %vm3_vm0 = vcmask 130048   ;;  %vm9_vm1 = vcmask 654848   ;;  %vm15_vm2 = vcmask 523648   ;;  %vm21_vm3 = vcmask 392448   ;;  %s75_s0 = inlined_call_operand.vmem [shape: f32[5,16], index: 0, kind: input, shape index: {}]   ;;  %s76_s1 = inlined_call_operand.vmem [shape: f32[1,80], index: 1, kind: output, shape index: {}]  }
   0x1   :  { %v35_v0 = vld [vmem:[%s75_s0 + $0x4] sm:$0x1]   ;;  %v37_v1 = vld [vmem:[%s75_s0 + $0x2] sm:$0x1]   ;;  %v36_v2 = vld [vmem:[%s75_s0 + $0x3] sm:$0x1]  }
   0x2   :  { %7 = vrot.lane.b32.xlu0 %v35_v0, %s43_s10  ;;  %19 = vrot.lane.b32.xlu1 %v37_v1, %s44_s11  ;;  %v38_v3 = vld [vmem:[%s75_s0 + $0x1] sm:$0x1]   ;;  %s45_s16 = smov 48   ;;  %s46_s17 = smov 16   ;;  %v2_v4 = vld [vmem:[%s75_s0] sm:$0x1]  }
   0x3   :  { %4 = vst.msk [vmem:[#allocation0] sm:$0x1] %vm3_vm0, %v2_v4   ;;  %vm27_vm4 = vcmask 261248  }
   0xa   :  { %13 = vrot.lane.b32.xlu0 %v36_v2, %s45_s16  ;;  %25 = vrot.lane.b32.xlu1 %v38_v3, %s46_s17 }
  0x74   :  { %v8_v5 = vpop.permute.xlu0 %7   ;;  %v20_v6 = vpop.permute.xlu1 %19  }
  0x75   :  { %10 = vst.msk [vmem:[#allocation0] sm:$0x1] %vm9_vm1, %v8_v5  }
  0x7c   :  { %v14_v7 = vpop.permute.xlu0 %13   ;;  %v26_v8 = vpop.permute.xlu1 %25  }
  0x7d   :  { %16 = vst.msk [vmem:[#allocation0] sm:$0x1] %vm15_vm2, %v14_v7  }
  0x7e   :  { %22 = vst.msk [vmem:[#allocation0] sm:$0x1] %vm21_vm3, %v20_v6  }
  0x7f   :  { %28 = vst.msk [vmem:[#allocation0] sm:$0x1] %vm27_vm4, %v26_v8  }
  0x86   :  { %v31_v9 = vld [vmem:[#allocation0] sm:$0x1] }
  0x87   :  { %34 = vst [vmem:[%s76_s1] sm:$0x1] %v31_v9 }

// kernel: cifar_cnn_forward.1
= control target key start
LH: loop header
LB: loop body
LE: loop exit
PB: predicated region body
PF: predicated region fallthrough
CT: control target
= control target key end

     0   :  { %s4506_s18 = smov 0   ;;  %s5766_s0 = inlined_call_operand.vmem [shape: bf16[1024,432], index: 0, kind: input, shape index: {}]   ;;  %s5767_s1 = inlined_call_operand.vmem [shape: bf16[3,432,80], index: 1, kind: input, shape index: {}]   ;;  %s5768_s2 = inlined_call_operand.vmem [shape: f32[1,80], index: 2, kind: input, shape index: {}]   ;;  %s5769_s3 = inlined_call_operand.vmem [shape: bf16[5,80,128], index: 3, kind: input, shape index: {}]   ;;  %s5770_s4 = inlined_call_operand.vmem [shape: f32[1,128], index: 4, kind: input, shape index: {}]   ;;  %s5771_s5 = inlined_call_operand.vmem [shape: f32[64,128], index: 5, kind: output, shape index: {}]  }
   0x1 LB: > { %s3393_s19 = sadd.s32 4294967295, %s4474_s18   ;;  %p3397_p0 = scmp.ge.s32.totalorder %s4474_s18, 1  ;;  %s4474_s18 = sphi %s4506_s18, %s15_s18  }
   0x2   : > { %p189_p1 = scmp.lt.s32.totalorder %s4474_s18, 5 }
   0x4   : > { %p190_p2 = pnand %p3397_p0, %p189_p1 }
   0x6   : > { %193 = sbr.rel (%p190_p2) target bundleno = 1117 (0x45d), region = 40 }
   0xb   : > { %v4358_v0 = vld [vmem:[%s5767_s1 + $0x38] sm:$0xff]  ;;  %s3398_s26 = sshll.u32 %s3393_s19, 5  ;;  %v4357_v3 = vld [vmem:[%s5767_s1 + $0x30] sm:$0xff]  ;;  %v4376_v7 = vld [vmem:[%s5767_s1 + $0xc8] sm:$0xff]  ;;  %vm816_vm0 = vcmask 392192   ;;  %vm2682_vm1 = vcmask 1041409  }
   0xc   : > { %v4366_v1 = vld [vmem:[%s5767_s1 + $0x78] sm:$0xff]  ;;  %p219_p3 = scmp.lt.s32.totalorder %s3398_s26, 127  ;;  %865 = vmatpush.bf16.msra.mxu0 %v4358_v0  ;;  %v4365_v4 = vld [vmem:[%s5767_s1 + $0x70] sm:$0xff]  ;;  %v4356_v8 = vld [vmem:[%s5767_s1 + $0x28] sm:$0xff]  ;;  %vm2685_vm2 = vcmask 1042434   ;;  %vm2687_vm3 = vcmask 1043459  }
   0xd   : > { %v4374_v2 = vld [vmem:[%s5767_s1 + $0xb8] sm:$0xff]  ;;  %954 = vmatpush.bf16.msra.mxu1 %v4366_v1  ;;  %v4373_v5 = vld [vmem:[%s5767_s1 + $0xb0] sm:$0xff]  ;;  %v4364_v9 = vld [vmem:[%s5767_s1 + $0x68] sm:$0xff]  ;;  %vm2690_vm4 = vcmask 1044484   ;;  %vm2693_vm5 = vcmask 1045509   ;;  %vm2696_vm6 = vcmask 1046534  }
   0xe   : > { %1043 = vmatpush.bf16.msra.mxu2 %v4374_v2  ;;  %v4377_v6 = vld [vmem:[%s5767_s1 + $0xd0] sm:$0xff]  ;;  %s6096_s26 = smov (!%p219_p3, %s3398_s26), 127  ;;  %v4372_v10 = vld [vmem:[%s5767_s1 + $0xa8] sm:$0xff]  ;;  %v4375_v11 = vld [vmem:[%s5767_s1 + $0xc0] sm:$0xff]  ;;  %vm2699_vm7 = vcmask 1047559   ;;  %vm2746_vm8 = vcmask 654336  }
   0xf   : > { %1137 = vmatpush.bf16.msra.mxu3 %v4377_v6  ;;  %s4286_s12 = sshll.u32 %s6096_s26, 4  ;;  %v4355_v14 = vld [vmem:[%s5767_s1 + $0x20] sm:$0xff]  ;;  %v4385_v17 = vld [vmem:[%s5767_s1 + $0x110] sm:$0xff]  ;;  %v4354_v19 = vld [vmem:[%s5767_s1 + $0x18] sm:$0xff] }
  0x10   : > { %866 = vmatpush.bf16.msra.mxu0 %v4357_v3  ;;  %s4549_s21 = scalar_lea.vmem %s5766_s0, %s4286_s12  ;;  %v4363_v15 = vld [vmem:[%s5767_s1 + $0x60] sm:$0xff]  ;;  %v4362_v20 = vld [vmem:[%s5767_s1 + $0x58] sm:$0xff]  ;;  %v4353_v22 = vld [vmem:[%s5767_s1 + $0x10] sm:$0xff]  ;;  %s3401_s12 = sshll.u32 %s3393_s19, 1 }
  0x11   : > { %955 = vmatpush.bf16.msra.mxu1 %v4365_v4  ;;  %v4288_v12 = vld [vmem:[%s4549_s21 + $0xc] sm:$0xf]  ;;  %v3415_v13 = vld [vmem:[%s4549_s21 + $0x18] sm:$0xf0]  ;;  %v4371_v16 = vld [vmem:[%s5767_s1 + $0xa0] sm:$0xff]  ;;  %p226_p4 = scmp.lt.s32.totalorder %s3401_s12, 7 }
  0x12   : > { %1044 = vmatpush.bf16.msra.mxu2 %v4373_v5  ;;  %v4571_v18 = vor.u32 %v4288_v12, %v3415_v13  ;;  %v4370_v21 = vld [vmem:[%s5767_s1 + $0x98] sm:$0xff]  ;;  %v4361_v23 = vld [vmem:[%s5767_s1 + $0x50] sm:$0xff]  ;;  %v4384_v24 = vld [vmem:[%s5767_s1 + $0x108] sm:$0xff] }
  0x13   : > { %1138 = vmatpush.bf16.msra.mxu3 %v4376_v7  ;;  %v4369_v25 = vld [vmem:[%s5767_s1 + $0x90] sm:$0xff]  ;;  %v4352_v26 = vld [vmem:[%s5767_s1 + $0x8] sm:$0xff]  ;;  %v4351_v29 = vld [vmem:[%s5767_s1] sm:$0xff]  ;;  %s6098_s12 = smov (!%p226_p4, %s3401_s12), 7 }
  0x14   : > { %867 = vmatpush.bf16.msra.mxu0 %v4356_v8  ;;  %5874 = vst [vmem:[#allocation2_spill] sm:$0xff] %v4571_v18  ;;  %v4360_v27 = vld [vmem:[%s5767_s1 + $0x48] sm:$0xff]  ;;  %v4359_v30 = vld [vmem:[%s5767_s1 + $0x40] sm:$0xff]  ;;  %v3431_v34 = vld [vmem:[%s4549_s21 + $0x38] sm:$0xf0]  ;;  %s3402_s13 = sshll.u32 %s6098_s12, 3 }
  0x15   : > { %956 = vmatpush.bf16.msra.mxu1 %v4364_v9  ;;  %v4368_v28 = vld [vmem:[%s5767_s1 + $0x88] sm:$0xff]  ;;  %v4367_v31 = vld [vmem:[%s5767_s1 + $0x80] sm:$0xff]  ;;  %v4289_v35 = vld [vmem:[%s4549_s21 + $0xc] sm:$0xf0]  ;;  %s229_s19 = scalar_lea.vmem %s5771_s5, %s3402_s13 }
  0x16   : > { %1045 = vmatpush.bf16.msra.mxu2 %v4372_v10  ;;  %v3405_v32 = vld [vmem:[%s4549_s21] sm:$0xf]  ;;  %v4292_v33 = vld [vmem:[%s4549_s21 + $0x2c] sm:$0xf]  ;;  %v4287_v36 = vld [vmem:[%s4549_s21 + $0x4] sm:$0xf] }
  0x17   : > { %1139 = vmatpush.bf16.msra.mxu3 %v4375_v11  ;;  %v3407_v37 = vld [vmem:[%s4549_s21 + $0x10] sm:$0xf0]  ;;  %v3413_v38 = vld [vmem:[%s4549_s21 + $0x8] sm:$0xf]  ;;  %v4290_v39 = vld [vmem:[%s4549_s21 + $0x14] sm:$0xf0]  ;;  %v4628_v42 = vor.u32 %v4292_v33, %v3431_v34  ;;  %v4630_v43 = vor.u32 %v4289_v35, %v3405_v32 }
  0x18   : > { %868 = vmatpush.bf16.msra.mxu0 %v4355_v14  ;;  %v4393_v40 = vld [vmem:[%s5767_s1 + $0x150] sm:$0xff]  ;;  %v4404_v41 = vld [vmem:[%s5767_s1 + $0x1a8] sm:$0xff]  ;;  %v4632_v44 = vor.u32 %v4287_v36, %v3407_v37  ;;  %v4634_v45 = vor.u32 %v4290_v39, %v3413_v38  ;;  %v3421_v49 = vld [vmem:[%s4549_s21 + $0x20] sm:$0xf] }
  0x19   : > { %957 = vmatpush.bf16.msra.mxu1 %v4363_v15  ;;  %5875 = vst [vmem:[#allocation3_spill] sm:$0xff] %v4628_v42  ;;  %v4401_v46 = vld [vmem:[%s5767_s1 + $0x190] sm:$0xff]  ;;  %v4392_v47 = vld [vmem:[%s5767_s1 + $0x148] sm:$0xff]  ;;  %v3447_v51 = vld [vmem:[%s4549_s21 + $0x58] sm:$0xf0] }
  0x1a   : > { %1046 = vmatpush.bf16.msra.mxu2 %v4371_v16  ;;  %3767 = vmatmul.msk.bf16.vlgmr.msra.gmra.mxu3 %vm816_vm0, %v4571_v18  ;;  %5876 = vst [vmem:[#allocation4_spill] sm:$0xff] %v4630_v43  ;;  %v4400_v48 = vld [vmem:[%s5767_s1 + $0x188] sm:$0xff]  ;;  %v4293_v52 = vld [vmem:[%s4549_s21 + $0x2c] sm:$0xf0]  ;;  %v4291_v53 = vld [vmem:[%s4549_s21 + $0x24] sm:$0xf] }
  0x1b   : > { %1438 = vmatpush.bf16.msrb.mxu3 %v4385_v17  ;;  %5877 = vst [vmem:[#allocation5_spill] sm:$0xff] %v4632_v44  ;;  %v4296_v50 = vld [vmem:[%s4549_s21 + $0x4c] sm:$0xf]  ;;  %v3423_v54 = vld [vmem:[%s4549_s21 + $0x30] sm:$0xf0]  ;;  %v4660_v58 = vor.u32 %v4293_v52, %v3421_v49  ;;  %v4383_v61 = vld [vmem:[%s5767_s1 + $0x100] sm:$0xff] }
  0x1c   : > { %869 = vmatpush.bf16.msra.mxu0 %v4354_v19  ;;  %5878 = vst [vmem:[#allocation6_spill] sm:$0xff] %v4634_v45  ;;  %v3429_v55 = vld [vmem:[%s4549_s21 + $0x28] sm:$0xf]  ;;  %v4294_v56 = vld [vmem:[%s4549_s21 + $0x34] sm:$0xf0]  ;;  %v4658_v57 = vor.u32 %v4296_v50, %v3447_v51  ;;  %v4662_v59 = vor.u32 %v4291_v53, %v3423_v54  ;;  %v4391_v10 = vld [vmem:[%s5767_s1 + $0x140] sm:$0xff] }
  0x1d   : > { %958 = vmatpush.bf16.msra.mxu1 %v4362_v20  ;;  %v4664_v60 = vor.u32 %v4294_v56, %v3429_v55  ;;  %v3437_v62 = vld [vmem:[%s4549_s21 + $0x40] sm:$0xf]  ;;  %v4300_v63 = vld [vmem:[%s4549_s21 + $0x6c] sm:$0xf]  ;;  %v3463_v0 = vld [vmem:[%s4549_s21 + $0x78] sm:$0xf0] }
  0x1e   : > { %1047 = vmatpush.bf16.msra.mxu2 %v4370_v21  ;;  %5879 = vst [vmem:[#allocation7_spill] sm:$0xff] %v4658_v57  ;;  %v4297_v1 = vld [vmem:[%s4549_s21 + $0x4c] sm:$0xf0]  ;;  %v4295_v2 = vld [vmem:[%s4549_s21 + $0x44] sm:$0xf]  ;;  %v4682_v6 = vor.u32 %v4300_v63, %v3463_v0  ;;  %v4390_v39 = vld [vmem:[%s5767_s1 + $0x138] sm:$0xff] }
  0x1f   : > { %1439 = vmatpush.bf16.msrb.mxu3 %v4384_v24  ;;  %v3439_v3 = vld [vmem:[%s4549_s21 + $0x50] sm:$0xf0]  ;;  %v3445_v4 = vld [vmem:[%s4549_s21 + $0x48] sm:$0xf]  ;;  %v4298_v5 = vld [vmem:[%s4549_s21 + $0x54] sm:$0xf0]  ;;  %v4684_v7 = vor.u32 %v4297_v1, %v3437_v62 }
  0x20   : > { %870 = vmatpush.bf16.msra.mxu0 %v4353_v22  ;;  %5880 = vst [vmem:[#allocation8_spill] sm:$0xff] %v4682_v6  ;;  %v4686_v8 = vor.u32 %v4295_v2, %v3439_v3  ;;  %v4688_v9 = vor.u32 %v4298_v5, %v3445_v4  ;;  %v4399_v11 = vld [vmem:[%s5767_s1 + $0x180] sm:$0xff]  ;;  %v4304_v13 = vld [vmem:[%s4549_s21 + $0x8c] sm:$0xf]  ;;  %v3479_v14 = vld [vmem:[%s4549_s21 + $0x98] sm:$0xf0] }
  0x21   : > { %959 = vmatpush.bf16.msra.mxu1 %v4361_v23  ;;  %v3453_v12 = vld [vmem:[%s4549_s21 + $0x60] sm:$0xf]  ;;  %v4301_v15 = vld [vmem:[%s4549_s21 + $0x6c] sm:$0xf0]  ;;  %v4299_v16 = vld [vmem:[%s4549_s21 + $0x64] sm:$0xf]  ;;  %v4709_v21 = vor.u32 %v4304_v13, %v3479_v14 }
  0x22   : > { %1048 = vmatpush.bf16.msra.mxu2 %v4369_v25  ;;  %5881 = vst [vmem:[#allocation9_spill] sm:$0xff] %v4686_v8  ;;  %v3455_v17 = vld [vmem:[%s4549_s21 + $0x70] sm:$0xf0]  ;;  %v3461_v19 = vld [vmem:[%s4549_s21 + $0x68] sm:$0xf]  ;;  %v4711_v22 = vor.u32 %v4301_v15, %v3453_v12  ;;  %v4403_v25 = vld [vmem:[%s5767_s1 + $0x1a0] sm:$0xff] }
  0x23   : > { %1440 = vmatpush.bf16.msrb.mxu3 %v4383_v61  ;;  %5882 = vst [vmem:[#allocation10_spill] sm:$0xff] %v4688_v9  ;;  %v4302_v20 = vld [vmem:[%s4549_s21 + $0x74] sm:$0xf0]  ;;  %v4713_v23 = vor.u32 %v4299_v16, %v3455_v17  ;;  %v3471_v32 = vld [vmem:[%s4549_s21 + $0x90] sm:$0xf0] }
  0x24   : > { %871 = vmatpush.bf16.msra.mxu0 %v4352_v26  ;;  %5883 = vst [vmem:[#allocation11_spill] sm:$0xff] %v4709_v21  ;;  %v4715_v24 = vor.u32 %v4302_v20, %v3461_v19  ;;  %v4382_v26 = vld [vmem:[%s5767_s1 + $0xf8] sm:$0xff]  ;;  %v3477_v33 = vld [vmem:[%s4549_s21 + $0x88] sm:$0xf]  ;;  %v4307_v49 = vld [vmem:[%s4549_s21 + $0xa4] sm:$0xf] }
  0x25   : > { %960 = vmatpush.bf16.msra.mxu1 %v4360_v27  ;;  %v3469_v27 = vld [vmem:[%s4549_s21 + $0x80] sm:$0xf]  ;;  %v4306_v34 = vld [vmem:[%s4549_s21 + $0x94] sm:$0xf0]  ;;  %v3487_v50 = vld [vmem:[%s4549_s21 + $0xb0] sm:$0xf0] }
  0x26   : > { %1049 = vmatpush.bf16.msra.mxu2 %v4368_v28  ;;  %v4308_v28 = vld [vmem:[%s4549_s21 + $0xac] sm:$0xf]  ;;  %v4742_v38 = vor.u32 %v4306_v34, %v3477_v33  ;;  %v3493_v51 = vld [vmem:[%s4549_s21 + $0xa8] sm:$0xf]  ;;  %v4310_v52 = vld [vmem:[%s4549_s21 + $0xb4] sm:$0xf0]  ;;  %v4767_v55 = vor.u32 %v4307_v49, %v3487_v50 }
  0x27   : > { %1441 = vmatpush.bf16.msrb.mxu3 %v4382_v26  ;;  %v4769_v56 = vor.u32 %v4310_v52, %v3493_v51  ;;  %v4381_v61 = vld [vmem:[%s5767_s1 + $0xf0] sm:$0xff]  ;;  %v3501_v62 = vld [vmem:[%s4549_s21 + $0xc0] sm:$0xf]  ;;  %v4316_v63 = vld [vmem:[%s4549_s21 + $0xec] sm:$0xf] }
  0x28   : > { %872 = vmatpush.bf16.msra.mxu0 %v4351_v29  ;;  %v3495_v29 = vld [vmem:[%s4549_s21 + $0xb8] sm:$0xf0]  ;;  %5886 = vst [vmem:[#allocation14_spill] sm:$0xff] %v4742_v38  ;;  %v4313_v1 = vld [vmem:[%s4549_s21 + $0xcc] sm:$0xf0] }
  0x29   : > { %961 = vmatpush.bf16.msra.mxu1 %v4359_v30  ;;  %v4305_v30 = vld [vmem:[%s4549_s21 + $0x8c] sm:$0xf0]  ;;  %v4736_v35 = vor.u32 %v4308_v28, %v3495_v29  ;;  %v3527_v0 = vld [vmem:[%s4549_s21 + $0xf8] sm:$0xf0]  ;;  %v4311_v2 = vld [vmem:[%s4549_s21 + $0xc4] sm:$0xf] }
  0x2a   : > { %1050 = vmatpush.bf16.msra.mxu2 %v4367_v31  ;;  %3768 = vmatmul.msk.bf16.gmra.mxu3 %vm816_vm0, %v4628_v42  ;;  %v4303_v31 = vld [vmem:[%s4549_s21 + $0x84] sm:$0xf]  ;;  %v4738_v36 = vor.u32 %v4305_v30, %v3469_v27  ;;  %v3503_v3 = vld [vmem:[%s4549_s21 + $0xd0] sm:$0xf0]  ;;  %v3509_v4 = vld [vmem:[%s4549_s21 + $0xc8] sm:$0xf] }
  0x2b   : > { %873 = vmatmul.bf16.vlgmr.msra.gmra.mxu0 %v4630_v43  ;;  %5884 = vst [vmem:[#allocation12_spill] sm:$0xff] %v4736_v35  ;;  %v4740_v37 = vor.u32 %v4303_v31, %v3471_v32  ;;  %1442 = vmatpush.bf16.msrb.mxu3 %v4381_v61  ;;  %v4314_v5 = vld [vmem:[%s4549_s21 + $0xd4] sm:$0xf0]  ;;  %v4791_v12 = vor.u32 %v4311_v2, %v3503_v3  ;;  %v4389_v14 = vld [vmem:[%s5767_s1 + $0x130] sm:$0xff]  ;;  %v3517_v16 = vld [vmem:[%s4549_s21 + $0xe0] sm:$0xf] }
  0x2c   : > { %1527 = vmatpush.bf16.msrb.mxu0 %v4393_v40  ;;  %962 = vmatmul.bf16.vlgmr.msra.gmra.mxu1 %v4632_v44  ;;  %v4398_v40 = vld [vmem:[%s5767_s1 + $0x178] sm:$0xff]  ;;  %v4793_v13 = vor.u32 %v4314_v5, %v3509_v4  ;;  %v4397_v15 = vld [vmem:[%s5767_s1 + $0x170] sm:$0xff]  ;;  %v4320_v17 = vld [vmem:[%s4549_s21 + $0x10c] sm:$0xf] }
  0x2d   : > { %1051 = vmatmul.bf16.vlgmr.msra.gmra.mxu2 %v4634_v45  ;;  %1616 = vmatpush.bf16.msrb.mxu1 %v4401_v46  ;;  %5885 = vst [vmem:[#allocation13_spill] sm:$0xff] %v4740_v37  ;;  %v4312_v46 = vld [vmem:[%s4549_s21 + $0xcc] sm:$0xf]  ;;  %v3543_v19 = vld [vmem:[%s4549_s21 + $0x118] sm:$0xf0] }
  0x2e   : > { %1710 = vmatpush.bf16.msrb.mxu2 %v4404_v41  ;;  %v3485_v41 = vld [vmem:[%s4549_s21 + $0xa0] sm:$0xf]  ;;  %5889 = vst [vmem:[#allocation17_spill] sm:$0xff] %v4791_v12  ;;  %v4317_v20 = vld [vmem:[%s4549_s21 + $0xec] sm:$0xf0]  ;;  %v4814_v29 = vor.u32 %v4320_v17, %v3543_v19  ;;  %v4380_v2 = vld [vmem:[%s5767_s1 + $0xe8] sm:$0xff] }
  0x2f   : > { %5890 = vst [vmem:[#allocation18_spill] sm:$0xff] %v4793_v13  ;;  %v3519_v26 = vld [vmem:[%s4549_s21 + $0xf0] sm:$0xf0]  ;;  %v3525_v27 = vld [vmem:[%s4549_s21 + $0xe8] sm:$0xf]  ;;  %v4816_v30 = vor.u32 %v4317_v20, %v3517_v16  ;;  %1443 = vmatpush.bf16.msrb.mxu3 %v4380_v2 }
  0x30   : > { %1528 = vmatpush.bf16.msrb.mxu0 %v4392_v47  ;;  %v3511_v47 = vld [vmem:[%s4549_s21 + $0xd8] sm:$0xf0]  ;;  %v4318_v28 = vld [vmem:[%s4549_s21 + $0xf4] sm:$0xf0]  ;;  %v3533_v34 = vld [vmem:[%s4549_s21 + $0x100] sm:$0xf] }
  0x31   : > { %1617 = vmatpush.bf16.msrb.mxu1 %v4400_v48  ;;  %v4309_v48 = vld [vmem:[%s4549_s21 + $0xac] sm:$0xf0]  ;;  %v4763_v53 = vor.u32 %v4312_v46, %v3511_v47  ;;  %v4820_v32 = vor.u32 %v4318_v28, %v3525_v27  ;;  %v4319_v46 = vld [vmem:[%s4549_s21 + $0x104] sm:$0xf]  ;;  %v3535_v47 = vld [vmem:[%s4549_s21 + $0x110] sm:$0xf0] }
  0x32   : > { %1711 = vmatpush.bf16.msrb.mxu2 %v4403_v25  ;;  %v4765_v54 = vor.u32 %v4309_v48, %v3485_v41  ;;  %v4315_v25 = vld [vmem:[%s4549_s21 + $0xe4] sm:$0xf]  ;;  %v4321_v41 = vld [vmem:[%s4549_s21 + $0x10c] sm:$0xf0]  ;;  %v3541_v49 = vld [vmem:[%s4549_s21 + $0x108] sm:$0xf]  ;;  %v4839_v61 = vor.u32 %v4319_v46, %v3535_v47 }
  0x33   : > { %5887 = vst [vmem:[#allocation15_spill] sm:$0xff] %v4763_v53  ;;  %v4818_v31 = vor.u32 %v4315_v25, %v3519_v26  ;;  %v4322_v50 = vld [vmem:[%s4549_s21 + $0x114] sm:$0xf0]  ;;  %v4837_v52 = vor.u32 %v4321_v41, %v3533_v34  ;;  %v4388_v3 = vld [vmem:[%s5767_s1 + $0x128] sm:$0xff]  ;;  %v3549_v25 = vld [vmem:[%s4549_s21 + $0x120] sm:$0xf] }
  0x34   : > { %1529 = vmatpush.bf16.msrb.mxu0 %v4391_v10  ;;  %v4787_v10 = vor.u32 %v4316_v63, %v3527_v0  ;;  %v4841_v0 = vor.u32 %v4322_v50, %v3541_v49  ;;  %v4396_v20 = vld [vmem:[%s5767_s1 + $0x168] sm:$0xff]  ;;  %v3575_v27 = vld [vmem:[%s4549_s21 + $0x158] sm:$0xf0]  ;;  %v4325_v28 = vld [vmem:[%s4549_s21 + $0x12c] sm:$0xf0] }
  0x35   : > { %1618 = vmatpush.bf16.msrb.mxu1 %v4399_v11  ;;  %v4789_v11 = vor.u32 %v4313_v1, %v3501_v62  ;;  %v4328_v26 = vld [vmem:[%s4549_s21 + $0x14c] sm:$0xf]  ;;  %v4323_v34 = vld [vmem:[%s4549_s21 + $0x124] sm:$0xf]  ;;  %v3557_v41 = vld [vmem:[%s4549_s21 + $0x128] sm:$0xf]  ;;  %v4869_v50 = vor.u32 %v4325_v28, %v3549_v25 }
  0x36   : > { %5888 = vst [vmem:[#allocation16_spill] sm:$0xff] %v4787_v10  ;;  %v4326_v46 = vld [vmem:[%s4549_s21 + $0x134] sm:$0xf0]  ;;  %v4867_v47 = vor.u32 %v4328_v26, %v3575_v27  ;;  %v3565_v27 = vld [vmem:[%s4549_s21 + $0x140] sm:$0xf] }
  0x37   : > { %v4873_v2 = vor.u32 %v4326_v46, %v3557_v41  ;;  %v4332_v28 = vld [vmem:[%s4549_s21 + $0x16c] sm:$0xf]  ;;  %v4327_v41 = vld [vmem:[%s4549_s21 + $0x144] sm:$0xf]  ;;  %v3567_v46 = vld [vmem:[%s4549_s21 + $0x150] sm:$0xf0] }
  0x38   : > { %1530 = vmatpush.bf16.msrb.mxu0 %v4390_v39  ;;  %v4324_v39 = vld [vmem:[%s4549_s21 + $0x12c] sm:$0xf]  ;;  %5892 = vst [vmem:[#allocation20_spill] sm:$0xff] %v4867_v47 }
  0x39   : > { %1619 = vmatpush.bf16.msrb.mxu1 %v4398_v40  ;;  %v3559_v40 = vld [vmem:[%s4549_s21 + $0x138] sm:$0xf0]  ;;  %5894 = vst [vmem:[#allocation22_spill] sm:$0xff] %v4873_v2 }
  0x3a   : > { %3769 = vmatmul.msk.bf16.gmra.mxu3 %vm816_vm0, %v4658_v57  ;;  %v4835_v51 = vor.u32 %v4324_v39, %v3559_v40  ;;  %v3551_v39 = vld [vmem:[%s4549_s21 + $0x130] sm:$0xf0] }
  0x3b   : > { %878 = vmatmul.bf16.gmra.mxu0 %v4660_v58 }
  0x3c   : > { %967 = vmatmul.bf16.gmra.mxu1 %v4662_v59  ;;  %1531 = vmatpush.bf16.msrb.mxu0 %v4389_v14  ;;  %5891 = vst [vmem:[#allocation19_spill] sm:$0xff] %v4835_v51 }
  0x3d   : > { %1056 = vmatmul.bf16.gmra.mxu2 %v4664_v60  ;;  %1620 = vmatpush.bf16.msrb.mxu1 %v4397_v15 }
  0x40   : > { %1532 = vmatpush.bf16.msrb.mxu0 %v4388_v3 }
  0x41   : > { %1621 = vmatpush.bf16.msrb.mxu1 %v4396_v20 }
  0x4a   : > { %3770 = vmatmul.msk.bf16.gmra.mxu3 %vm816_vm0, %v4682_v6 }
  0x4b   : > { %883 = vmatmul.bf16.gmra.mxu0 %v4684_v7 }
  0x4c   : > { %972 = vmatmul.bf16.gmra.mxu1 %v4686_v8 }
  0x4d   : > { %1061 = vmatmul.bf16.gmra.mxu2 %v4688_v9 }
  0x5a   : > { %3771 = vmatmul.msk.bf16.gmra.mxu3 %vm816_vm0, %v4709_v21 }
  0x5b   : > { %888 = vmatmul.bf16.gmra.mxu0 %v4711_v22 }
  0x5c   : > { %977 = vmatmul.bf16.gmra.mxu1 %v4713_v23 }
  0x5d   : > { %1066 = vmatmul.bf16.gmra.mxu2 %v4715_v24 }
  0x6a   : > { %3772 = vmatmul.msk.bf16.gmra.mxu3 %vm816_vm0, %v4736_v35 }
  0x6b   : > { %893 = vmatmul.bf16.gmra.mxu0 %v4738_v36 }
  0x6c   : > { %982 = vmatmul.bf16.gmra.mxu1 %v4740_v37 }
  0x6d   : > { %1071 = vmatmul.bf16.gmra.mxu2 %v4742_v38 }
  0x7a   : > { %3773 = vmatmul.msk.bf16.gmra.mxu3 %vm816_vm0, %v4763_v53 }
  0x7b   : > { %898 = vmatmul.bf16.gmra.mxu0 %v4765_v54 }
  0x7c   : > { %987 = vmatmul.bf16.gmra.mxu1 %v4767_v55 }
  0x7d   : > { %1076 = vmatmul.bf16.gmra.mxu2 %v4769_v56 }
  0x8a   : > { %3774 = vmatmul.msk.bf16.gmra.mxu3 %vm816_vm0, %v4787_v10 }
  0x8b   : > { %903 = vmatmul.bf16.gmra.mxu0 %v4789_v11 }
  0x8c   : > { %992 = vmatmul.bf16.gmra.mxu1 %v4791_v12 }
  0x8d   : > { %1081 = vmatmul.bf16.gmra.mxu2 %v4793_v13 }
  0x9a   : > { %3775 = vmatmul.msk.bf16.gmra.mxu3 %vm816_vm0, %v4814_v29 }
  0x9b   : > { %908 = vmatmul.bf16.gmra.mxu0 %v4816_v30 }
  0x9c   : > { %997 = vmatmul.bf16.gmra.mxu1 %v4818_v31 }
  0x9d   : > { %1086 = vmatmul.bf16.gmra.mxu2 %v4820_v32  ;;  %v1141_v33 = vpop.f32.mrf.mxu3 }
  0xa5   : > { %v1143_v48 = vpop.f32.mrf.mxu3 }
  0xa8   : > { %v874_v62 = vpop.f32.mrf.mxu0 }
  0xa9   : > { %v963_v63 = vpop.f32.mrf.mxu1 }
  0xaa   : > { %v964_v1 = vadd.f32 %v963_v63, %v874_v62  ;;  %3776 = vmatmul.msk.bf16.gmra.mxu3 %vm816_vm0, %v4835_v51 }
  0xab   : > { %913 = vmatmul.bf16.gmra.mxu0 %v4837_v52 }
  0xac   : > { %1002 = vmatmul.bf16.gmra.mxu1 %v4839_v61 }
  0xad   : > { %1091 = vmatmul.bf16.gmra.mxu2 %v4841_v0  ;;  %v1146_v4 = vpop.f32.mrf.mxu3 }
  0xb0   : > { %v1052_v5 = vpop.f32.mrf.mxu2  ;;  %v876_v15 = vpop.f32.mrf.mxu0 }
  0xb1   : > { %v1053_v14 = vadd.f32 %v1052_v5, %v964_v1  ;;  %v965_v16 = vpop.f32.mrf.mxu1 }
  0xb2   : > { %v966_v17 = vadd.f32 %v965_v16, %v876_v15 }
  0xb3   : > { %v4854_v19 = vadd.f32 %v1141_v33, %v1053_v14  ;;  %v4871_v33 = vor.u32 %v4323_v34, %v3551_v39  ;;  %v4402_v14 = vld [vmem:[%s5767_s1 + $0x198] sm:$0xff]  ;;  %v4329_v39 = vld [vmem:[%s4549_s21 + $0x14c] sm:$0xf0] }
  0xb4   : > { %1712 = vmatpush.bf16.msrb.mxu2 %v4402_v14  ;;  %v3591_v34 = vld [vmem:[%s4549_s21 + $0x178] sm:$0xf0]  ;;  %v4897_v14 = vor.u32 %v4329_v39, %v3565_v27 }
  0xb5   : > { %v1148_v40 = vpop.f32.mrf.mxu3  ;;  %5893 = vst [vmem:[#allocation21_spill] sm:$0xff] %v4871_v33 }
  0xb6   : > { %5898 = vst [vmem:[#allocation26_spill] sm:$0xff] %v4897_v14 }
  0xb8   : > { %v1054_v49 = vpop.f32.mrf.mxu2  ;;  %v879_v63 = vpop.f32.mrf.mxu0 }
  0xb9   : > { %v1055_v62 = vadd.f32 %v1054_v49, %v966_v17  ;;  %v968_v1 = vpop.f32.mrf.mxu1 }
  0xba   : > { %v969_v3 = vadd.f32 %v968_v1, %v879_v63  ;;  %3777 = vmatmul.msk.bf16.gmra.mxu3 %vm816_vm0, %v4867_v47  ;;  %v4330_v63 = vld [vmem:[%s4549_s21 + $0x154] sm:$0xf0]  ;;  %v4895_v1 = vor.u32 %v4332_v28, %v3591_v34  ;;  %v4379_v28 = vld [vmem:[%s5767_s1 + $0xe0] sm:$0xff] }
  0xbb   : > { %v4875_v5 = vadd.f32 %v1143_v48, %v1055_v62  ;;  %918 = vmatmul.bf16.gmra.mxu0 %v4869_v50  ;;  %v3573_v62 = vld [vmem:[%s4549_s21 + $0x148] sm:$0xf]  ;;  %1444 = vmatpush.bf16.msrb.mxu3 %v4379_v28  ;;  %v4331_v28 = vld [vmem:[%s4549_s21 + $0x164] sm:$0xf] }
  0xbc   : > { %1007 = vmatmul.bf16.gmra.mxu1 %v4871_v33  ;;  %5897 = vst [vmem:[#allocation25_spill] sm:$0xff] %v4895_v1 }
  0xbd   : > { %5895 = vst [vmem:[#allocation23_spill] sm:$0xff] %v4875_v5  ;;  %1096 = vmatmul.bf16.gmra.mxu2 %v4873_v2  ;;  %v1151_v48 = vpop.f32.mrf.mxu3 }
  0xc0   : > { %v1057_v15 = vpop.f32.mrf.mxu2  ;;  %v881_v17 = vpop.f32.mrf.mxu0 }
  0xc1   : > { %v1058_v16 = vadd.f32 %v1057_v15, %v969_v3  ;;  %v970_v20 = vpop.f32.mrf.mxu1  ;;  %v4899_v3 = vor.u32 %v4327_v41, %v3567_v46 }
  0xc2   : > { %v971_v25 = vadd.f32 %v970_v20, %v881_v17 }
  0xc3   : > { %v4885_v26 = vadd.f32 %v1146_v4, %v1058_v16  ;;  %5899 = vst [vmem:[#allocation27_spill] sm:$0xff] %v4899_v3  ;;  %v4901_v16 = vor.u32 %v4330_v63, %v3573_v62  ;;  %v4395_v62 = vld [vmem:[%s5767_s1 + $0x160] sm:$0xff] }
  0xc4   : > { %v3581_v63 = vld [vmem:[%s4549_s21 + $0x160] sm:$0xf]  ;;  %1622 = vmatpush.bf16.msrb.mxu1 %v4395_v62 }
  0xc5   : > { %5896 = vst [vmem:[#allocation24_spill] sm:$0xff] %v4885_v26  ;;  %v1153_v49 = vpop.f32.mrf.mxu3 }
  0xc6   : > { %5900 = vst [vmem:[#allocation28_spill] sm:$0xff] %v4901_v16 }
  0xc8   : > { %v1059_v47 = vpop.f32.mrf.mxu2  ;;  %v884_v17 = vpop.f32.mrf.mxu0 }
  0xc9   : > { %v1060_v15 = vadd.f32 %v1059_v47, %v971_v25  ;;  %v973_v4 = vpop.f32.mrf.mxu1 }
  0xca   : > { %v974_v20 = vadd.f32 %v973_v4, %v884_v17  ;;  %3778 = vmatmul.msk.bf16.gmra.mxu3 %vm816_vm0, %v4895_v1  ;;  %v3607_v17 = vld [vmem:[%s4549_s21 + $0x198] sm:$0xf0]  ;;  %v4333_v4 = vld [vmem:[%s4549_s21 + $0x16c] sm:$0xf0]  ;;  %v3583_v1 = vld [vmem:[%s4549_s21 + $0x170] sm:$0xf0] }
  0xcb   : > { %v4903_v26 = vadd.f32 %v1148_v40, %v1060_v15  ;;  %923 = vmatmul.bf16.gmra.mxu0 %v4897_v14  ;;  %v4387_v40 = vld [vmem:[%s5767_s1 + $0x120] sm:$0xff]  ;;  %v4336_v15 = vld [vmem:[%s4549_s21 + $0x18c] sm:$0xf] }
  0xcc   : > { %1012 = vmatmul.bf16.gmra.mxu1 %v4899_v3  ;;  %1533 = vmatpush.bf16.msrb.mxu0 %v4387_v40  ;;  %v4334_v3 = vld [vmem:[%s4549_s21 + $0x174] sm:$0xf0] }
  0xcd   : > { %5901 = vst [vmem:[#allocation29_spill] sm:$0xff] %v4903_v26  ;;  %1101 = vmatmul.bf16.gmra.mxu2 %v4901_v16  ;;  %v1156_v47 = vpop.f32.mrf.mxu3  ;;  %v3589_v16 = vld [vmem:[%s4549_s21 + $0x168] sm:$0xf] }
  0xce   : > { %v4935_v26 = vor.u32 %v4334_v3, %v3589_v16 }
  0xd0   : > { %v1062_v25 = vpop.f32.mrf.mxu2  ;;  %v886_v34 = vpop.f32.mrf.mxu0  ;;  %5906 = vst [vmem:[#allocation34_spill] sm:$0xff] %v4935_v26 }
  0xd1   : > { %v1063_v27 = vadd.f32 %v1062_v25, %v974_v20  ;;  %v975_v39 = vpop.f32.mrf.mxu1  ;;  %v4929_v20 = vor.u32 %v4336_v15, %v3607_v17  ;;  %v3597_v15 = vld [vmem:[%s4549_s21 + $0x180] sm:$0xf]  ;;  %v4340_v17 = vld [vmem:[%s4549_s21 + $0x1ac] sm:$0xf] }
  0xd2   : > { %v976_v41 = vadd.f32 %v975_v39, %v886_v34  ;;  %v4931_v34 = vor.u32 %v4333_v4, %v3581_v63  ;;  %v3623_v4 = vld [vmem:[%s4549_s21 + $0x1b8] sm:$0xf0] }
  0xd3   : > { %v4916_v46 = vadd.f32 %v1151_v48, %v1063_v27  ;;  %5903 = vst [vmem:[#allocation31_spill] sm:$0xff] %v4929_v20  ;;  %v4933_v48 = vor.u32 %v4331_v28, %v3583_v1  ;;  %v4337_v28 = vld [vmem:[%s4549_s21 + $0x18c] sm:$0xf0] }
  0xd4   : > { %5904 = vst [vmem:[#allocation32_spill] sm:$0xff] %v4931_v34 }
  0xd5   : > { %5902 = vst [vmem:[#allocation30_spill] sm:$0xff] %v4916_v46  ;;  %v1158_v40 = vpop.f32.mrf.mxu3 }
  0xd6   : > { %5905 = vst [vmem:[#allocation33_spill] sm:$0xff] %v4933_v48 }
  0xd8   : > { %v1064_v25 = vpop.f32.mrf.mxu2  ;;  %v889_v39 = vpop.f32.mrf.mxu0 }
  0xd9   : > { %v1065_v27 = vadd.f32 %v1064_v25, %v976_v41  ;;  %v978_v46 = vpop.f32.mrf.mxu1  ;;  %v4335_v25 = vld [vmem:[%s4549_s21 + $0x184] sm:$0xf] }
  0xda   : > { %v979_v51 = vadd.f32 %v978_v46, %v889_v39  ;;  %3779 = vmatmul.msk.bf16.gmra.mxu3 %vm816_vm0, %v4929_v20  ;;  %v3605_v20 = vld [vmem:[%s4549_s21 + $0x188] sm:$0xf] }
  0xdb   : > { %v4937_v62 = vadd.f32 %v1153_v49, %v1065_v27  ;;  %928 = vmatmul.bf16.gmra.mxu0 %v4931_v34  ;;  %v3599_v27 = vld [vmem:[%s4549_s21 + $0x190] sm:$0xf0]  ;;  %v4956_v34 = vor.u32 %v4337_v28, %v3597_v15 }
  0xdc   : > { %1017 = vmatmul.bf16.gmra.mxu1 %v4933_v48  ;;  %v4338_v48 = vld [vmem:[%s4549_s21 + $0x194] sm:$0xf0] }
  0xdd   : > { %5907 = vst [vmem:[#allocation35_spill] sm:$0xff] %v4937_v62  ;;  %1106 = vmatmul.bf16.gmra.mxu2 %v4935_v26  ;;  %v1161_v1 = vpop.f32.mrf.mxu3  ;;  %v4954_v62 = vor.u32 %v4340_v17, %v3623_v4  ;;  %v4378_v17 = vld [vmem:[%s5767_s1 + $0xd8] sm:$0xff] }
  0xde   : > { %5910 = vst [vmem:[#allocation38_spill] sm:$0xff] %v4956_v34  ;;  %1445 = vmatpush.bf16.msrb.mxu3 %v4378_v17  ;;  %v4339_v17 = vld [vmem:[%s4549_s21 + $0x1a4] sm:$0xf] }
  0xdf   : > { %5909 = vst [vmem:[#allocation37_spill] sm:$0xff] %v4954_v62 }
  0xe0   : > { %v1067_v3 = vpop.f32.mrf.mxu2  ;;  %v891_v41 = vpop.f32.mrf.mxu0 }
  0xe1   : > { %v1068_v16 = vadd.f32 %v1067_v3, %v979_v51  ;;  %v980_v46 = vpop.f32.mrf.mxu1  ;;  %v4958_v51 = vor.u32 %v4335_v25, %v3599_v27  ;;  %v4394_v25 = vld [vmem:[%s5767_s1 + $0x158] sm:$0xff]  ;;  %v3613_v27 = vld [vmem:[%s4549_s21 + $0x1a0] sm:$0xf] }
  0xe2   : > { %v981_v49 = vadd.f32 %v980_v46, %v891_v41  ;;  %1623 = vmatpush.bf16.msrb.mxu1 %v4394_v25 }
  0xe3   : > { %v4944_v63 = vadd.f32 %v1156_v47, %v1068_v16  ;;  %5911 = vst [vmem:[#allocation39_spill] sm:$0xff] %v4958_v51  ;;  %v4960_v16 = vor.u32 %v4338_v48, %v3605_v20 }
  0xe5   : > { %5908 = vst [vmem:[#allocation36_spill] sm:$0xff] %v4944_v63  ;;  %v1163_v39 = vpop.f32.mrf.mxu3 }
  0xe6   : > { %5912 = vst [vmem:[#allocation40_spill] sm:$0xff] %v4960_v16 }
  0xe8   : > { %v1069_v26 = vpop.f32.mrf.mxu2  ;;  %v894_v41 = vpop.f32.mrf.mxu0 }
  0xe9   : > { %v1070_v3 = vadd.f32 %v1069_v26, %v981_v49  ;;  %v983_v47 = vpop.f32.mrf.mxu1  ;;  %v4386_v26 = vld [vmem:[%s5767_s1 + $0x118] sm:$0xff] }
  0xea   : > { %v984_v46 = vadd.f32 %v983_v47, %v894_v41  ;;  %3780 = vmatmul.msk.bf16.gmra.mxu3 %vm816_vm0, %v4954_v62  ;;  %1534 = vmatpush.bf16.msrb.mxu0 %v4386_v26  ;;  %v3639_v41 = vld [vmem:[%s4549_s21 + $0x1d8] sm:$0xf0]  ;;  %v4341_v47 = vld [vmem:[%s4549_s21 + $0x1ac] sm:$0xf0]  ;;  %v3615_v62 = vld [vmem:[%s4549_s21 + $0x1b0] sm:$0xf0] }
  0xeb   : > { %v4962_v63 = vadd.f32 %v1158_v40, %v1070_v3  ;;  %933 = vmatmul.bf16.gmra.mxu0 %v4956_v34  ;;  %v4344_v3 = vld [vmem:[%s4549_s21 + $0x1cc] sm:$0xf] }
  0xec   : > { %1022 = vmatmul.bf16.gmra.mxu1 %v4958_v51  ;;  %v4342_v51 = vld [vmem:[%s4549_s21 + $0x1b4] sm:$0xf0] }
  0xed   : > { %5913 = vst [vmem:[#allocation41_spill] sm:$0xff] %v4962_v63  ;;  %1111 = vmatmul.bf16.gmra.mxu2 %v4960_v16  ;;  %v1166_v40 = vpop.f32.mrf.mxu3  ;;  %v3621_v16 = vld [vmem:[%s4549_s21 + $0x1a8] sm:$0xf] }
  0xee   : > { %v4994_v63 = vor.u32 %v4342_v51, %v3621_v16 }
  0xf0   : > { %v1072_v20 = vpop.f32.mrf.mxu2  ;;  %v896_v49 = vpop.f32.mrf.mxu0  ;;  %5918 = vst [vmem:[#allocation46_spill] sm:$0xff] %v4994_v63 }
  0xf1   : > { %v1073_v48 = vadd.f32 %v1072_v20, %v984_v46  ;;  %v985_v15 = vpop.f32.mrf.mxu1  ;;  %v4988_v46 = vor.u32 %v4344_v3, %v3639_v41  ;;  %v3629_v3 = vld [vmem:[%s4549_s21 + $0x1c0] sm:$0xf]  ;;  %v4348_v41 = vld [vmem:[%s4549_s21 + $0x1ec] sm:$0xf] }
  0xf2   : > { %v986_v4 = vadd.f32 %v985_v15, %v896_v49  ;;  %v4990_v49 = vor.u32 %v4341_v47, %v3613_v27  ;;  %v3655_v47 = vld [vmem:[%s4549_s21 + $0x1f8] sm:$0xf0] }
  0xf3   : > { %v4975_v28 = vadd.f32 %v1161_v1, %v1073_v48  ;;  %5915 = vst [vmem:[#allocation43_spill] sm:$0xff] %v4988_v46  ;;  %v4992_v1 = vor.u32 %v4339_v17, %v3615_v62  ;;  %v4345_v17 = vld [vmem:[%s4549_s21 + $0x1cc] sm:$0xf0] }
  0xf4   : > { %5916 = vst [vmem:[#allocation44_spill] sm:$0xff] %v4990_v49 }
  0xf5   : > { %5914 = vst [vmem:[#allocation42_spill] sm:$0xff] %v4975_v28  ;;  %v1168_v26 = vpop.f32.mrf.mxu3 }
  0xf6   : > { %5917 = vst [vmem:[#allocation45_spill] sm:$0xff] %v4992_v1 }
  0xf8   : > { %v1074_v20 = vpop.f32.mrf.mxu2  ;;  %v899_v15 = vpop.f32.mrf.mxu0 }
  0xf9   : > { %v1075_v48 = vadd.f32 %v1074_v20, %v986_v4  ;;  %v988_v28 = vpop.f32.mrf.mxu1  ;;  %v4343_v20 = vld [vmem:[%s4549_s21 + $0x1c4] sm:$0xf] }
  0xfa   : > { %v989_v34 = vadd.f32 %v988_v28, %v899_v15  ;;  %3781 = vmatmul.msk.bf16.gmra.mxu3 %vm816_vm0, %v4988_v46  ;;  %v3637_v46 = vld [vmem:[%s4549_s21 + $0x1c8] sm:$0xf] }
  0xfb   : > { %v4996_v25 = vadd.f32 %v1163_v39, %v1075_v48  ;;  %938 = vmatmul.bf16.gmra.mxu0 %v4990_v49  ;;  %v3631_v48 = vld [vmem:[%s4549_s21 + $0x1d0] sm:$0xf0]  ;;  %v5015_v49 = vor.u32 %v4345_v17, %v3629_v3 }
  0xfc   : > { %1027 = vmatmul.bf16.gmra.mxu1 %v4992_v1  ;;  %v4346_v1 = vld [vmem:[%s4549_s21 + $0x1d4] sm:$0xf0] }
  0xfd   : > { %5919 = vst [vmem:[#allocation47_spill] sm:$0xff] %v4996_v25  ;;  %1116 = vmatmul.bf16.gmra.mxu2 %v4994_v63  ;;  %v1171_v62 = vpop.f32.mrf.mxu3  ;;  %v5013_v25 = vor.u32 %v4348_v41, %v3655_v47  ;;  %v4412_v41 = vld [vmem:[%s5767_s1 + $0x1e8] sm:$0xff] }
  0xfe   : > { %5922 = vst [vmem:[#allocation50_spill] sm:$0xff] %v5015_v49  ;;  %2011 = vmatpush.bf16.msra.mxu3 %v4412_v41  ;;  %v3647_v41 = vld [vmem:[%s4549_s21 + $0x1f0] sm:$0xf0] }
  0xff   : > { %5921 = vst [vmem:[#allocation49_spill] sm:$0xff] %v5013_v25 }
 0x100   : > { %v1077_v51 = vpop.f32.mrf.mxu2  ;;  %v901_v4 = vpop.f32.mrf.mxu0 }
 0x101   : > { %v1078_v16 = vadd.f32 %v1077_v51, %v989_v34  ;;  %v990_v28 = vpop.f32.mrf.mxu1  ;;  %v5017_v34 = vor.u32 %v4343_v20, %v3631_v48  ;;  %v4428_v48 = vld [vmem:[%s5767_s1 + $0x268] sm:$0xff] }
 0x102   : > { %v991_v39 = vadd.f32 %v990_v28, %v901_v4  ;;  %2189 = vmatpush.bf16.msra.mxu1 %v4428_v48 }
 0x103   : > { %v5003_v27 = vadd.f32 %v1166_v40, %v1078_v16  ;;  %5923 = vst [vmem:[#allocation51_spill] sm:$0xff] %v5017_v34  ;;  %v5019_v16 = vor.u32 %v4346_v1, %v3637_v46 }
 0x105   : > { %5920 = vst [vmem:[#allocation48_spill] sm:$0xff] %v5003_v27  ;;  %v1173_v15 = vpop.f32.mrf.mxu3 }
 0x106   : > { %5924 = vst [vmem:[#allocation52_spill] sm:$0xff] %v5019_v16 }
 0x108   : > { %v1079_v63 = vpop.f32.mrf.mxu2  ;;  %v904_v4 = vpop.f32.mrf.mxu0 }
 0x109   : > { %v1080_v51 = vadd.f32 %v1079_v63, %v991_v39  ;;  %v993_v40 = vpop.f32.mrf.mxu1  ;;  %v4431_v63 = vld [vmem:[%s5767_s1 + $0x280] sm:$0xff] }
 0x10a   : > { %v994_v28 = vadd.f32 %v993_v40, %v904_v4  ;;  %3782 = vmatmul.msk.bf16.gmra.mxu3 %vm816_vm0, %v5013_v25  ;;  %2283 = vmatpush.bf16.msra.mxu2 %v4431_v63  ;;  %v4349_v4 = vld [vmem:[%s4549_s21 + $0x1ec] sm:$0xf0]  ;;  %v4347_v40 = vld [vmem:[%s4549_s21 + $0x1e4] sm:$0xf]  ;;  %v3653_v63 = vld [vmem:[%s4549_s21 + $0x1e8] sm:$0xf] }
 0x10b   : > { %v5021_v27 = vadd.f32 %v1168_v26, %v1080_v51  ;;  %943 = vmatmul.bf16.gmra.mxu0 %v5015_v49  ;;  %v4420_v26 = vld [vmem:[%s5767_s1 + $0x228] sm:$0xff]  ;;  %v3645_v51 = vld [vmem:[%s4549_s21 + $0x1e0] sm:$0xf] }
 0x10c   : > { %1032 = vmatmul.bf16.gmra.mxu1 %v5017_v34  ;;  %2100 = vmatpush.bf16.msra.mxu0 %v4420_v26  ;;  %v5048_v34 = vor.u32 %v4349_v4, %v3645_v51 }
 0x10d   : > { %5925 = vst [vmem:[#allocation53_spill] sm:$0xff] %v5021_v27  ;;  %1121 = vmatmul.bf16.gmra.mxu2 %v5019_v16  ;;  %v1176_v46 = vpop.f32.mrf.mxu3  ;;  %v4350_v16 = vld [vmem:[%s4549_s21 + $0x1f4] sm:$0xf0] }
 0x10e   : > { %5927 = vst [vmem:[#allocation55_spill] sm:$0xff] %v5048_v34 }
 0x110   : > { %v1082_v1 = vpop.f32.mrf.mxu2  ;;  %v906_v3 = vpop.f32.mrf.mxu0 }
 0x111   : > { %v1083_v39 = vadd.f32 %v1082_v1, %v994_v28  ;;  %v995_v47 = vpop.f32.mrf.mxu1  ;;  %v5050_v28 = vor.u32 %v4347_v40, %v3647_v41 }
 0x112   : > { %v996_v17 = vadd.f32 %v995_v47, %v906_v3  ;;  %v5052_v3 = vor.u32 %v4350_v16, %v3653_v63 }
 0x113   : > { %v5037_v20 = vadd.f32 %v1171_v62, %v1083_v39  ;;  %5928 = vst [vmem:[#allocation56_spill] sm:$0xff] %v5050_v28 }
 0x114   : > { %5929 = vst [vmem:[#allocation57_spill] sm:$0xff] %v5052_v3 }
 0x115   : > { %5926 = vst [vmem:[#allocation54_spill] sm:$0xff] %v5037_v20  ;;  %v1178_v25 = vpop.f32.mrf.mxu3 }
 0x118   : > { %v1084_v26 = vpop.f32.mrf.mxu2  ;;  %v909_v62 = vpop.f32.mrf.mxu0 }
 0x119   : > { %v1085_v1 = vadd.f32 %v1084_v26, %v996_v17  ;;  %v998_v39 = vpop.f32.mrf.mxu1 }
 0x11a   : > { %v999_v47 = vadd.f32 %v998_v39, %v909_v62  ;;  %1446 = vmatmul.bf16.vlgmr.msrb.gmra.mxu3 %v4630_v43 }
 0x11b   : > { %v5054_v20 = vadd.f32 %v1173_v15, %v1085_v1  ;;  %948 = vmatmul.bf16.gmra.mxu0 %v5048_v34 }
 0x11c   : > { %1037 = vmatmul.bf16.gmra.mxu1 %v5050_v28 }
 0x11d   : > { %1126 = vmatmul.bf16.gmra.mxu2 %v5052_v3  ;;  %v1181_v48 = vpop.f32.mrf.mxu3  ;;  %v4411_v3 = vld [vmem:[%s5767_s1 + $0x1e0] sm:$0xff] }
 0x11e   : > { %2012 = vmatpush.bf16.msra.mxu3 %v4411_v3 }
 0x120   : > { %v1087_v51 = vpop.f32.mrf.mxu2  ;;  %v911_v40 = vpop.f32.mrf.mxu0 }
 0x121   : > { %v1088_v4 = vadd.f32 %v1087_v51, %v999_v47  ;;  %v1000_v17 = vpop.f32.mrf.mxu1 }
 0x122   : > { %v1001_v41 = vadd.f32 %v1000_v17, %v911_v40 }
 0x123   : > { %v5060_v26 = vadd.f32 %v1176_v46, %v1088_v4  ;;  %v4419_v46 = vld [vmem:[%s5767_s1 + $0x220] sm:$0xff] }
 0x124   : > { %2101 = vmatpush.bf16.msra.mxu0 %v4419_v46 }
 0x125   : > { %v1183_v16 = vpop.f32.mrf.mxu3 }
 0x128   : > { %v1089_v63 = vpop.f32.mrf.mxu2  ;;  %v914_v1 = vpop.f32.mrf.mxu0 }
 0x129   : > { %v1090_v15 = vadd.f32 %v1089_v63, %v1001_v41  ;;  %v1003_v62 = vpop.f32.mrf.mxu1  ;;  %v4427_v63 = vld [vmem:[%s5767_s1 + $0x260] sm:$0xff] }
 0x12a   : > { %v1004_v39 = vadd.f32 %v1003_v62, %v914_v1  ;;  %1451 = vmatmul.bf16.gmra.mxu3 %v4660_v58  ;;  %2190 = vmatpush.bf16.msra.mxu1 %v4427_v63 }
 0x12b   : > { %v5062_v43 = vadd.f32 %v1178_v25, %v1090_v15  ;;  %1535 = vmatmul.bf16.vlgmr.msrb.gmra.mxu0 %v4632_v44 }
 0x12c   : > { %1624 = vmatmul.bf16.vlgmr.msrb.gmra.mxu1 %v4634_v45 }
 0x12d   : > { %3945 = vmatmul.msk.bf16.vlgmr.msrb.gmra.mxu2 %vm816_vm0, %v4571_v18  ;;  %v1186_v25 = vpop.f32.mrf.mxu3 }
 0x130   : > { %v1092_v47 = vpop.f32.mrf.mxu2  ;;  %v916_v4 = vpop.f32.mrf.mxu0 }
 0x131   : > { %v1093_v51 = vadd.f32 %v1092_v47, %v1004_v39  ;;  %v1005_v40 = vpop.f32.mrf.mxu1 }
 0x132   : > { %v1006_v17 = vadd.f32 %v1005_v40, %v916_v4 }
 0x133   : > { %v5075_v41 = vadd.f32 %v1181_v48, %v1093_v51 }
 0x135   : > { %v1188_v15 = vpop.f32.mrf.mxu3 }
 0x138   : > { %v1094_v3 = vpop.f32.mrf.mxu2  ;;  %v919_v62 = vpop.f32.mrf.mxu0 }
 0x139   : > { %v1095_v1 = vadd.f32 %v1094_v3, %v1006_v17  ;;  %v1008_v18 = vpop.f32.mrf.mxu1 }
 0x13a   : > { %v1009_v45 = vadd.f32 %v1008_v18, %v919_v62  ;;  %1456 = vmatmul.bf16.gmra.mxu3 %v4684_v7 }
 0x13b   : > { %v5080_v44 = vadd.f32 %v1183_v16, %v1095_v1  ;;  %1540 = vmatmul.bf16.gmra.mxu0 %v4662_v59 }
 0x13c   : > { %1629 = vmatmul.bf16.gmra.mxu1 %v4664_v60 }
 0x13d   : > { %3946 = vmatmul.msk.bf16.gmra.mxu2 %vm816_vm0, %v4628_v42  ;;  %v1191_v48 = vpop.f32.mrf.mxu3  ;;  %v4410_v42 = vld [vmem:[%s5767_s1 + $0x1d8] sm:$0xff] }
 0x13e   : > { %2013 = vmatpush.bf16.msra.mxu3 %v4410_v42 }
 0x140   : > { %v1097_v39 = vpop.f32.mrf.mxu2  ;;  %v921_v47 = vpop.f32.mrf.mxu0 }
 0x141   : > { %v1098_v46 = vadd.f32 %v1097_v39, %v1009_v45  ;;  %v1010_v51 = vpop.f32.mrf.mxu1  ;;  %v4418_v45 = vld [vmem:[%s5767_s1 + $0x218] sm:$0xff] }
 0x142   : > { %v1011_v4 = vadd.f32 %v1010_v51, %v921_v47  ;;  %2102 = vmatpush.bf16.msra.mxu0 %v4418_v45 }
 0x143   : > { %v5087_v40 = vadd.f32 %v1186_v25, %v1098_v46 }
 0x145   : > { %v1193_v18 = vpop.f32.mrf.mxu3 }
 0x148   : > { %v1099_v16 = vpop.f32.mrf.mxu2  ;;  %v924_v63 = vpop.f32.mrf.mxu0 }
 0x149   : > { %v1100_v17 = vadd.f32 %v1099_v16, %v1011_v4  ;;  %v1013_v3 = vpop.f32.mrf.mxu1  ;;  %v4426_v16 = vld [vmem:[%s5767_s1 + $0x258] sm:$0xff] }
 0x14a   : > { %v1014_v1 = vadd.f32 %v1013_v3, %v924_v63  ;;  %1461 = vmatmul.bf16.gmra.mxu3 %v4711_v22  ;;  %2191 = vmatpush.bf16.msra.mxu1 %v4426_v16 }
 0x14b   : > { %v5089_v62 = vadd.f32 %v1188_v15, %v1100_v17  ;;  %1545 = vmatmul.bf16.gmra.mxu0 %v4686_v8 }
 0x14c   : > { %1634 = vmatmul.bf16.gmra.mxu1 %v4688_v9 }
 0x14d   : > { %3947 = vmatmul.msk.bf16.gmra.mxu2 %vm816_vm0, %v4658_v57  ;;  %v1196_v25 = vpop.f32.mrf.mxu3 }
 0x150   : > { %v1102_v15 = vpop.f32.mrf.mxu2  ;;  %v926_v46 = vpop.f32.mrf.mxu0 }
 0x151   : > { %v1103_v39 = vadd.f32 %v1102_v15, %v1014_v1  ;;  %v1015_v47 = vpop.f32.mrf.mxu1 }
 0x152   : > { %v1016_v51 = vadd.f32 %v1015_v47, %v926_v46 }
 0x153   : > { %v5102_v4 = vadd.f32 %v1191_v48, %v1103_v39 }
 0x155   : > { %v1198_v17 = vpop.f32.mrf.mxu3 }
 0x158   : > { %v1104_v42 = vpop.f32.mrf.mxu2  ;;  %v929_v3 = vpop.f32.mrf.mxu0 }
 0x159   : > { %v1105_v63 = vadd.f32 %v1104_v42, %v1016_v51  ;;  %v1018_v57 = vpop.f32.mrf.mxu1 }
 0x15a   : > { %v1019_v9 = vadd.f32 %v1018_v57, %v929_v3  ;;  %1466 = vmatmul.bf16.gmra.mxu3 %v4738_v36  ;;  %v4430_v57 = vld [vmem:[%s5767_s1 + $0x278] sm:$0xff] }
 0x15b   : > { %v5107_v8 = vadd.f32 %v1193_v18, %v1105_v63  ;;  %1550 = vmatmul.bf16.gmra.mxu0 %v4713_v23  ;;  %2284 = vmatpush.bf16.msra.mxu2 %v4430_v57 }
 0x15c   : > { %1639 = vmatmul.bf16.gmra.mxu1 %v4715_v24 }
 0x15d   : > { %3948 = vmatmul.msk.bf16.gmra.mxu2 %vm816_vm0, %v4682_v6  ;;  %v1201_v48 = vpop.f32.mrf.mxu3 }
 0x160   : > { %v1107_v1 = vpop.f32.mrf.mxu2  ;;  %v931_v15 = vpop.f32.mrf.mxu0 }
 0x161   : > { %v1108_v45 = vadd.f32 %v1107_v1, %v1019_v9  ;;  %v1020_v39 = vpop.f32.mrf.mxu1  ;;  %v4409_v9 = vld [vmem:[%s5767_s1 + $0x1d0] sm:$0xff] }
 0x162   : > { %v1021_v46 = vadd.f32 %v1020_v39, %v931_v15  ;;  %2014 = vmatpush.bf16.msra.mxu3 %v4409_v9 }
 0x163   : > { %v5114_v47 = vadd.f32 %v1196_v25, %v1108_v45  ;;  %v4417_v25 = vld [vmem:[%s5767_s1 + $0x210] sm:$0xff] }
 0x164   : > { %2103 = vmatpush.bf16.msra.mxu0 %v4417_v25 }
 0x165   : > { %v1203_v18 = vpop.f32.mrf.mxu3 }
 0x168   : > { %v1109_v51 = vpop.f32.mrf.mxu2  ;;  %v934_v42 = vpop.f32.mrf.mxu0 }
 0x169   : > { %v1110_v16 = vadd.f32 %v1109_v51, %v1021_v46  ;;  %v1023_v63 = vpop.f32.mrf.mxu1  ;;  %v4425_v51 = vld [vmem:[%s5767_s1 + $0x250] sm:$0xff] }
 0x16a   : > { %v1024_v3 = vadd.f32 %v1023_v63, %v934_v42  ;;  %1471 = vmatmul.bf16.gmra.mxu3 %v4765_v54  ;;  %2192 = vmatpush.bf16.msra.mxu1 %v4425_v51 }
 0x16b   : > { %v5119_v6 = vadd.f32 %v1198_v17, %v1110_v16  ;;  %1555 = vmatmul.bf16.gmra.mxu0 %v4740_v37 }
 0x16c   : > { %1644 = vmatmul.bf16.gmra.mxu1 %v4742_v38 }
 0x16d   : > { %3949 = vmatmul.msk.bf16.gmra.mxu2 %vm816_vm0, %v4709_v21  ;;  %v1206_v17 = vpop.f32.mrf.mxu3 }
 0x170   : > { %v1112_v1 = vpop.f32.mrf.mxu2  ;;  %v936_v15 = vpop.f32.mrf.mxu0 }
 0x171   : > { %v1113_v45 = vadd.f32 %v1112_v1, %v1024_v3  ;;  %v1025_v39 = vpop.f32.mrf.mxu1 }
 0x172   : > { %v1026_v46 = vadd.f32 %v1025_v39, %v936_v15 }
 0x173   : > { %v5132_v57 = vadd.f32 %v1201_v48, %v1113_v45 }
 0x175   : > { %v1208_v16 = vpop.f32.mrf.mxu3 }
 0x178   : > { %v1114_v42 = vpop.f32.mrf.mxu2  ;;  %v939_v9 = vpop.f32.mrf.mxu0 }
 0x179   : > { %v1115_v63 = vadd.f32 %v1114_v42, %v1026_v46  ;;  %v1028_v21 = vpop.f32.mrf.mxu1 }
 0x17a   : > { %v1029_v38 = vadd.f32 %v1028_v21, %v939_v9  ;;  %1476 = vmatmul.bf16.gmra.mxu3 %v4789_v11 }
 0x17b   : > { %v5137_v37 = vadd.f32 %v1203_v18, %v1115_v63  ;;  %1560 = vmatmul.bf16.gmra.mxu0 %v4767_v55 }
 0x17c   : > { %1649 = vmatmul.bf16.gmra.mxu1 %v4769_v56 }
 0x17d   : > { %3950 = vmatmul.msk.bf16.gmra.mxu2 %vm816_vm0, %v4736_v35  ;;  %v1211_v48 = vpop.f32.mrf.mxu3  ;;  %v4408_v35 = vld [vmem:[%s5767_s1 + $0x1c8] sm:$0xff] }
 0x17e   : > { %2015 = vmatpush.bf16.msra.mxu3 %v4408_v35 }
 0x180   : > { %v1117_v3 = vpop.f32.mrf.mxu2  ;;  %v941_v1 = vpop.f32.mrf.mxu0 }
 0x181   : > { %v1118_v25 = vadd.f32 %v1117_v3, %v1029_v38  ;;  %v1030_v45 = vpop.f32.mrf.mxu1  ;;  %v4416_v38 = vld [vmem:[%s5767_s1 + $0x208] sm:$0xff] }
 0x182   : > { %v1031_v15 = vadd.f32 %v1030_v45, %v941_v1  ;;  %2104 = vmatpush.bf16.msra.mxu0 %v4416_v38 }
 0x183   : > { %v5144_v39 = vadd.f32 %v1206_v17, %v1118_v25 }
 0x185   : > { %5930 = vst [vmem:[#allocation58_spill] sm:$0xff] %v5144_v39  ;;  %v1213_v21 = vpop.f32.mrf.mxu3 }
 0x188   : > { %v1119_v18 = vpop.f32.mrf.mxu2  ;;  %v944_v51 = vpop.f32.mrf.mxu0 }
 0x189   : > { %v1120_v46 = vadd.f32 %v1119_v18, %v1031_v15  ;;  %v1033_v42 = vpop.f32.mrf.mxu1  ;;  %v4424_v18 = vld [vmem:[%s5767_s1 + $0x248] sm:$0xff] }
 0x18a   : > { %v1034_v63 = vadd.f32 %v1033_v42, %v944_v51  ;;  %1481 = vmatmul.bf16.gmra.mxu3 %v4816_v30  ;;  %2193 = vmatpush.bf16.msra.mxu1 %v4424_v18 }
 0x18b   : > { %v5146_v9 = vadd.f32 %v1208_v16, %v1120_v46  ;;  %1565 = vmatmul.bf16.gmra.mxu0 %v4791_v12 }
 0x18c   : > { %1654 = vmatmul.bf16.gmra.mxu1 %v4793_v13 }
 0x18d   : > { %5931 = vst [vmem:[#allocation59_spill] sm:$0xff] %v5146_v9  ;;  %3951 = vmatmul.msk.bf16.gmra.mxu2 %vm816_vm0, %v4763_v53  ;;  %v1216_v17 = vpop.f32.mrf.mxu3 }
 0x190   : > { %v1122_v16 = vpop.f32.mrf.mxu2  ;;  %v946_v25 = vpop.f32.mrf.mxu0 }
 0x191   : > { %v1123_v3 = vadd.f32 %v1122_v16, %v1034_v63  ;;  %v1035_v1 = vpop.f32.mrf.mxu1 }
 0x192   : > { %v1036_v45 = vadd.f32 %v1035_v1, %v946_v25 }
 0x193   : > { %v5159_v15 = vadd.f32 %v1211_v48, %v1123_v3 }
 0x195   : > { %5932 = vst [vmem:[#allocation60_spill] sm:$0xff] %v5159_v15  ;;  %v1218_v46 = vpop.f32.mrf.mxu3 }
 0x198   : > { %v1124_v35 = vpop.f32.mrf.mxu2  ;;  %v949_v42 = vpop.f32.mrf.mxu0 }
 0x199   : > { %v1125_v51 = vadd.f32 %v1124_v35, %v1036_v45  ;;  %v1038_v53 = vpop.f32.mrf.mxu1 }
 0x19a   : > { %v1039_v13 = vadd.f32 %v1038_v53, %v949_v42  ;;  %1486 = vmatmul.bf16.gmra.mxu3 %v4837_v52 }
 0x19b   : > { %v5164_v12 = vadd.f32 %v1213_v21, %v1125_v51  ;;  %1570 = vmatmul.bf16.gmra.mxu0 %v4818_v31 }
 0x19c   : > { %1659 = vmatmul.bf16.gmra.mxu1 %v4820_v32 }
 0x19d   : > { %5933 = vst [vmem:[#allocation61_spill] sm:$0xff] %v5164_v12  ;;  %3952 = vmatmul.msk.bf16.gmra.mxu2 %vm816_vm0, %v4787_v10  ;;  %v1447_v48 = vpop.f32.mrf.mxu3  ;;  %v4407_v10 = vld [vmem:[%s5767_s1 + $0x1c0] sm:$0xff] }
 0x19e   : > { %2016 = vmatpush.bf16.msra.mxu3 %v4407_v10 }
 0x1a0   : > { %v1127_v63 = vpop.f32.mrf.mxu2  ;;  %v951_v16 = vpop.f32.mrf.mxu0 }
 0x1a1   : > { %v1128_v38 = vadd.f32 %v1127_v63, %v1039_v13  ;;  %v1040_v3 = vpop.f32.mrf.mxu1 }
 0x1a2   : > { %v1041_v25 = vadd.f32 %v1040_v3, %v951_v16 }
 0x1a3   : > { %v5171_v1 = vadd.f32 %v1216_v17, %v1128_v38  ;;  %v4415_v17 = vld [vmem:[%s5767_s1 + $0x200] sm:$0xff] }
 0x1a4   : > { %2105 = vmatpush.bf16.msra.mxu0 %v4415_v17 }
 0x1a5   : > { %5934 = vst [vmem:[#allocation62_spill] sm:$0xff] %v5171_v1  ;;  %v1449_v53 = vpop.f32.mrf.mxu3  ;;  %v6008_v1 = vld [vmem:[#allocation26_spill] sm:$0xff] }
 0x1a8   : > { %v1129_v21 = vpop.f32.mrf.mxu2  ;;  %v1536_v18 = vpop.f32.mrf.mxu0 }
 0x1a9   : > { %v1130_v45 = vadd.f32 %v1129_v21, %v1041_v25  ;;  %v1625_v35 = vpop.f32.mrf.mxu1  ;;  %v1537_v51 = vadd.f32 %v1536_v18, %v1447_v48  ;;  %v4423_v21 = vld [vmem:[%s5767_s1 + $0x240] sm:$0xff]  ;;  %v5952_v25 = vld [vmem:[#allocation33_spill] sm:$0xff] }
 0x1aa   : > { %1491 = vmatmul.bf16.gmra.mxu3 %v4869_v50  ;;  %2194 = vmatpush.bf16.msra.mxu1 %v4423_v21 }
 0x1ab   : > { %v5173_v42 = vadd.f32 %v1218_v46, %v1130_v45  ;;  %v1626_v13 = vadd.f32 %v1625_v35, %v1537_v51  ;;  %1575 = vmatmul.bf16.gmra.mxu0 %v4839_v61 }
 0x1ac   : > { %1664 = vmatmul.bf16.gmra.mxu1 %v4841_v0 }
 0x1ad   : > { %5935 = vst [vmem:[#allocation63_spill] sm:$0xff] %v5173_v42  ;;  %3953 = vmatmul.msk.bf16.gmra.mxu2 %vm816_vm0, %v4814_v29  ;;  %v1452_v46 = vpop.f32.mrf.mxu3 }
 0x1b0   : > { %v1714_v48 = vpop.f32.mrf.mxu2  ;;  %v1538_v38 = vpop.f32.mrf.mxu0 }
 0x1b1   : > { %v5186_v63 = vadd.f32 %v1714_v48, %v1626_v13  ;;  %v1627_v16 = vpop.f32.mrf.mxu1  ;;  %v1539_v3 = vadd.f32 %v1538_v38, %v1449_v53  ;;  %v4429_v53 = vld [vmem:[%s5767_s1 + $0x270] sm:$0xff] }
 0x1b2   : > { %2285 = vmatpush.bf16.msra.mxu2 %v4429_v53  ;;  %v5958_v48 = vld [vmem:[#allocation44_spill] sm:$0xff] }
 0x1b3   : > { %5936 = vst [vmem:[#allocation64_spill] sm:$0xff] %v5186_v63  ;;  %v1628_v10 = vadd.f32 %v1627_v16, %v1539_v3  ;;  %v5938_v16 = vld [vmem:[#allocation19_spill] sm:$0xff]  ;;  %v5943_v63 = vld [vmem:[#allocation32_spill] sm:$0xff] }
 0x1b5   : > { %v1454_v45 = vpop.f32.mrf.mxu3 }
 0x1b8   : > { %v1716_v18 = vpop.f32.mrf.mxu2  ;;  %v1541_v51 = vpop.f32.mrf.mxu0 }
 0x1b9   : > { %v5193_v35 = vadd.f32 %v1716_v18, %v1628_v10  ;;  %v1630_v17 = vpop.f32.mrf.mxu1  ;;  %v1542_v13 = vadd.f32 %v1541_v51, %v1452_v46 }
 0x1ba   : > { %1496 = vmatmul.bf16.gmra.mxu3 %v4897_v14 }
 0x1bb   : > { %5937 = vst [vmem:[#allocation65_spill] sm:$0xff] %v5193_v35  ;;  %v1631_v38 = vadd.f32 %v1630_v17, %v1542_v13  ;;  %1580 = vmatmul.bf16.gmra.mxu0 %v4871_v33 }
 0x1bc   : > { %1669 = vmatmul.bf16.gmra.mxu1 %v4873_v2 }
 0x1bd   : > { %3954 = vmatmul.msk.bf16.gmra.mxu2 %vm816_vm0, %v5938_v16  ;;  %v1457_v3 = vpop.f32.mrf.mxu3 }
 0x1c0   : > { %v1719_v46 = vpop.f32.mrf.mxu2  ;;  %v1543_v10 = vpop.f32.mrf.mxu0 }
 0x1c1   : > { %v5205_v21 = vadd.f32 %v1719_v46, %v1631_v38  ;;  %v1632_v18 = vpop.f32.mrf.mxu1  ;;  %v1544_v51 = vadd.f32 %v1543_v10, %v1454_v45  ;;  %v4406_v45 = vld [vmem:[%s5767_s1 + $0x1b8] sm:$0xff]  ;;  %v5944_v46 = vld [vmem:[#allocation27_spill] sm:$0xff]  ;;  %v5945_v10 = vld [vmem:[#allocation28_spill] sm:$0xff] }
 0x1c2   : > { %2017 = vmatpush.bf16.msra.mxu3 %v4406_v45 }
 0x1c3   : > { %5939 = vst [vmem:[#allocation66_spill] sm:$0xff] %v5205_v21  ;;  %v1633_v14 = vadd.f32 %v1632_v18, %v1544_v51  ;;  %v5946_v18 = vld [vmem:[#allocation20_spill] sm:$0xff] }
 0x1c5   : > { %v1459_v17 = vpop.f32.mrf.mxu3 }
 0x1c8   : > { %v1721_v13 = vpop.f32.mrf.mxu2  ;;  %v1546_v2 = vpop.f32.mrf.mxu0 }
 0x1c9   : > { %v5209_v33 = vadd.f32 %v1721_v13, %v1633_v14  ;;  %v1635_v35 = vpop.f32.mrf.mxu1  ;;  %v1547_v5 = vadd.f32 %v1546_v2, %v1457_v3  ;;  %v4414_v2 = vld [vmem:[%s5767_s1 + $0x1f8] sm:$0xff] }
 0x1ca   : > { %1501 = vmatmul.bf16.gmra.mxu3 %v5943_v63  ;;  %2106 = vmatpush.bf16.msra.mxu0 %v4414_v2  ;;  %v5967_v63 = vld [vmem:[#allocation46_spill] sm:$0xff] }
 0x1cb   : > { %5941 = vst [vmem:[#allocation67_spill] sm:$0xff] %v5209_v33  ;;  %v1636_v38 = vadd.f32 %v1635_v35, %v1547_v5  ;;  %1585 = vmatmul.bf16.gmra.mxu0 %v5944_v46  ;;  %v5954_v35 = vld [vmem:[#allocation25_spill] sm:$0xff] }
 0x1cc   : > { %1674 = vmatmul.bf16.gmra.mxu1 %v5945_v10 }
 0x1cd   : > { %3955 = vmatmul.msk.bf16.gmra.mxu2 %vm816_vm0, %v5946_v18  ;;  %v1462_v14 = vpop.f32.mrf.mxu3  ;;  %v4422_v18 = vld [vmem:[%s5767_s1 + $0x238] sm:$0xff] }
 0x1ce   : > { %2195 = vmatpush.bf16.msra.mxu1 %v4422_v18 }
 0x1d0   : > { %v1724_v3 = vpop.f32.mrf.mxu2  ;;  %v1548_v13 = vpop.f32.mrf.mxu0 }
 0x1d1   : > { %v5224_v51 = vadd.f32 %v1724_v3, %v1636_v38  ;;  %v1637_v53 = vpop.f32.mrf.mxu1  ;;  %v1549_v5 = vadd.f32 %v1548_v13, %v1459_v17  ;;  %v5951_v17 = vld [vmem:[#allocation38_spill] sm:$0xff] }
 0x1d3   : > { %5947 = vst [vmem:[#allocation68_spill] sm:$0xff] %v5224_v51  ;;  %v1638_v45 = vadd.f32 %v1637_v53, %v1549_v5  ;;  %v5953_v51 = vld [vmem:[#allocation34_spill] sm:$0xff] }
 0x1d5   : > { %v1464_v10 = vpop.f32.mrf.mxu3 }
 0x1d8   : > { %v1726_v46 = vpop.f32.mrf.mxu2  ;;  %v1551_v2 = vpop.f32.mrf.mxu0 }
 0x1d9   : > { %v5231_v33 = vadd.f32 %v1726_v46, %v1638_v45  ;;  %v1640_v16 = vpop.f32.mrf.mxu1  ;;  %v1552_v38 = vadd.f32 %v1551_v2, %v1462_v14  ;;  %v5955_v2 = vld [vmem:[#allocation36_spill] sm:$0xff] }
 0x1da   : > { %1506 = vmatmul.bf16.gmra.mxu3 %v5951_v17 }
 0x1db   : > { %5949 = vst [vmem:[#allocation69_spill] sm:$0xff] %v5231_v33  ;;  %v1641_v13 = vadd.f32 %v1640_v16, %v1552_v38  ;;  %1590 = vmatmul.bf16.gmra.mxu0 %v5952_v25 }
 0x1dc   : > { %1679 = vmatmul.bf16.gmra.mxu1 %v5953_v51 }
 0x1dd   : > { %3956 = vmatmul.msk.bf16.gmra.mxu2 %vm816_vm0, %v5954_v35  ;;  %v1467_v53 = vpop.f32.mrf.mxu3 }
 0x1e0   : > { %v1729_v18 = vpop.f32.mrf.mxu2  ;;  %v1553_v5 = vpop.f32.mrf.mxu0 }
 0x1e1   : > { %v5240_v46 = vadd.f32 %v1729_v18, %v1641_v13  ;;  %v1642_v45 = vpop.f32.mrf.mxu1  ;;  %v1554_v14 = vadd.f32 %v1553_v5, %v1464_v10  ;;  %v4405_v10 = vld [vmem:[%s5767_s1 + $0x1b0] sm:$0xff]  ;;  %v5959_v18 = vld [vmem:[#allocation39_spill] sm:$0xff] }
 0x1e2   : > { %v5960_v5 = vld [vmem:[#allocation40_spill] sm:$0xff]  ;;  %2018 = vmatpush.bf16.msra.mxu3 %v4405_v10 }
 0x1e3   : > { %v1643_v33 = vadd.f32 %v1642_v45, %v1554_v14  ;;  %v5961_v45 = vld [vmem:[#allocation31_spill] sm:$0xff] }
 0x1e5   : > { %v1469_v17 = vpop.f32.mrf.mxu3 }
 0x1e8   : > { %v1731_v16 = vpop.f32.mrf.mxu2  ;;  %v1556_v25 = vpop.f32.mrf.mxu0 }
 0x1e9   : > { %v5244_v38 = vadd.f32 %v1731_v16, %v1643_v33  ;;  %v1645_v51 = vpop.f32.mrf.mxu1  ;;  %v1557_v3 = vadd.f32 %v1556_v25, %v1467_v53  ;;  %v4413_v33 = vld [vmem:[%s5767_s1 + $0x1f0] sm:$0xff] }
 0x1ea   : > { %1511 = vmatmul.bf16.gmra.mxu3 %v5958_v48  ;;  %2107 = vmatpush.bf16.msra.mxu0 %v4413_v33 }
 0x1eb   : > { %5956 = vst [vmem:[#allocation36_spill] sm:$0xff] %v5244_v38  ;;  %v1646_v13 = vadd.f32 %v1645_v51, %v1557_v3  ;;  %1595 = vmatmul.bf16.gmra.mxu0 %v5959_v18  ;;  %v5963_v3 = vld [vmem:[#allocation42_spill] sm:$0xff] }
 0x1ec   : > { %1684 = vmatmul.bf16.gmra.mxu1 %v5960_v5 }
 0x1ed   : > { %3957 = vmatmul.msk.bf16.gmra.mxu2 %vm816_vm0, %v5961_v45  ;;  %v1472_v25 = vpop.f32.mrf.mxu3  ;;  %v4421_v45 = vld [vmem:[%s5767_s1 + $0x230] sm:$0xff] }
 0x1ee   : > { %2196 = vmatpush.bf16.msra.mxu1 %v4421_v45 }
 0x1f0   : > { %v1734_v53 = vpop.f32.mrf.mxu2  ;;  %v1558_v16 = vpop.f32.mrf.mxu0 }
 0x1f1   : > { %v5259_v14 = vadd.f32 %v1734_v53, %v1646_v13  ;;  %v1647_v21 = vpop.f32.mrf.mxu1  ;;  %v1559_v51 = vadd.f32 %v1558_v16, %v1469_v17  ;;  %v5966_v16 = vld [vmem:[#allocation45_spill] sm:$0xff] }
 0x1f3   : > { %5962 = vst [vmem:[#allocation70_spill] sm:$0xff] %v5259_v14  ;;  %v1648_v10 = vadd.f32 %v1647_v21, %v1559_v51  ;;  %v5968_v14 = vld [vmem:[#allocation37_spill] sm:$0xff] }
 0x1f5   : > { %v1474_v5 = vpop.f32.mrf.mxu3 }
 0x1f8   : > { %v1736_v18 = vpop.f32.mrf.mxu2  ;;  %v1561_v33 = vpop.f32.mrf.mxu0 }
 0x1f9   : > { %v5266_v48 = vadd.f32 %v1736_v18, %v1648_v10  ;;  %v1650_v38 = vpop.f32.mrf.mxu1  ;;  %v1562_v13 = vadd.f32 %v1561_v33, %v1472_v25  ;;  %v5970_v33 = vld [vmem:[#allocation48_spill] sm:$0xff] }
 0x1fa   : > { %1516 = vmatmul.bf16.gmra.mxu3 %v5015_v49 }
 0x1fb   : > { %5964 = vst [vmem:[#allocation42_spill] sm:$0xff] %v5266_v48  ;;  %v1651_v17 = vadd.f32 %v1650_v38, %v1562_v13  ;;  %1600 = vmatmul.bf16.gmra.mxu0 %v5966_v16 }
 0x1fc   : > { %1689 = vmatmul.bf16.gmra.mxu1 %v5967_v63 }
 0x1fd   : > { %3958 = vmatmul.msk.bf16.gmra.mxu2 %vm816_vm0, %v5968_v14  ;;  %v1477_v21 = vpop.f32.mrf.mxu3 }
 0x200   : > { %v1739_v45 = vpop.f32.mrf.mxu2  ;;  %v1563_v51 = vpop.f32.mrf.mxu0 }
 0x201   : > { %v5275_v18 = vadd.f32 %v1739_v45, %v1651_v17  ;;  %v1652_v10 = vpop.f32.mrf.mxu1  ;;  %v1564_v25 = vadd.f32 %v1563_v51, %v1474_v5  ;;  %v5972_v45 = vld [vmem:[#allocation51_spill] sm:$0xff]  ;;  %v5973_v5 = vld [vmem:[#allocation52_spill] sm:$0xff] }
 0x202   : > { %v5974_v51 = vld [vmem:[#allocation43_spill] sm:$0xff] }
 0x203   : > { %5969 = vst [vmem:[#allocation71_spill] sm:$0xff] %v5275_v18  ;;  %v1653_v48 = vadd.f32 %v1652_v10, %v1564_v25  ;;  %v5976_v18 = vld [vmem:[#allocation4_spill] sm:$0xff] }
 0x205   : > { %v1479_v53 = vpop.f32.mrf.mxu3 }
 0x208   : > { %v1741_v38 = vpop.f32.mrf.mxu2  ;;  %v1566_v16 = vpop.f32.mrf.mxu0 }
 0x209   : > { %v5279_v13 = vadd.f32 %v1741_v38, %v1653_v48  ;;  %v1655_v63 = vpop.f32.mrf.mxu1  ;;  %v1567_v49 = vadd.f32 %v1566_v16, %v1477_v21  ;;  %v5975_v21 = vld [vmem:[#allocation54_spill] sm:$0xff] }
 0x20a   : > { %1521 = vmatmul.bf16.gmra.mxu3 %v5048_v34 }
 0x20b   : > { %5971 = vst [vmem:[#allocation48_spill] sm:$0xff] %v5279_v13  ;;  %v1656_v17 = vadd.f32 %v1655_v63, %v1567_v49  ;;  %1605 = vmatmul.bf16.gmra.mxu0 %v5972_v45 }
 0x20c   : > { %1694 = vmatmul.bf16.gmra.mxu1 %v5973_v5 }
 0x20d   : > { %3959 = vmatmul.msk.bf16.gmra.mxu2 %vm816_vm0, %v5974_v51  ;;  %v1482_v10 = vpop.f32.mrf.mxu3 }
 0x210   : > { %v1744_v25 = vpop.f32.mrf.mxu2  ;;  %v1568_v38 = vpop.f32.mrf.mxu0 }
 0x211   : > { %v5288_v48 = vadd.f32 %v1744_v25, %v1656_v17  ;;  %v1657_v35 = vpop.f32.mrf.mxu1  ;;  %v1569_v16 = vadd.f32 %v1568_v38, %v1479_v53  ;;  %v5977_v53 = vld [vmem:[#allocation57_spill] sm:$0xff] }
 0x212   : > { %v5978_v25 = vld [vmem:[#allocation49_spill] sm:$0xff] }
 0x213   : > { %v1658_v13 = vadd.f32 %v1657_v35, %v1569_v16 }
 0x215   : > { %v1484_v34 = vpop.f32.mrf.mxu3 }
 0x218   : > { %v1746_v49 = vpop.f32.mrf.mxu2  ;;  %v1571_v45 = vpop.f32.mrf.mxu0 }
 0x219   : > { %v5292_v63 = vadd.f32 %v1746_v49, %v1658_v13  ;;  %v1660_v5 = vpop.f32.mrf.mxu1  ;;  %v1572_v27 = vadd.f32 %v1571_v45, %v1482_v10 }
 0x21a   : > { %2019 = vmatmul.bf16.vlgmr.msra.gmra.mxu3 %v5976_v18 }
 0x21b   : > { %v1661_v17 = vadd.f32 %v1660_v5, %v1572_v27  ;;  %1610 = vmatmul.bf16.gmra.mxu0 %v5050_v28 }
 0x21c   : > { %1699 = vmatmul.bf16.gmra.mxu1 %v5977_v53 }
 0x21d   : > { %3960 = vmatmul.msk.bf16.gmra.mxu2 %vm816_vm0, %v5978_v25  ;;  %v1487_v35 = vpop.f32.mrf.mxu3 }
 0x220   : > { %v1749_v38 = vpop.f32.mrf.mxu2  ;;  %v1573_v16 = vpop.f32.mrf.mxu0 }
 0x221   : > { %v5301_v13 = vadd.f32 %v1749_v38, %v1661_v17  ;;  %v1662_v49 = vpop.f32.mrf.mxu1  ;;  %v1574_v45 = vadd.f32 %v1573_v16, %v1484_v34  ;;  %v5980_v38 = vld [vmem:[#allocation5_spill] sm:$0xff]  ;;  %v5981_v34 = vld [vmem:[#allocation6_spill] sm:$0xff] }
 0x222   : > { %v5982_v16 = vld [vmem:[#allocation2_spill] sm:$0xff] }
 0x223   : > { %v1663_v51 = vadd.f32 %v1662_v49, %v1574_v45 }
 0x225   : > { %v1489_v18 = vpop.f32.mrf.mxu3 }
 0x228   : > { %v1751_v27 = vpop.f32.mrf.mxu2  ;;  %v1576_v14 = vpop.f32.mrf.mxu0 }
 0x229   : > { %v5305_v5 = vadd.f32 %v1751_v27, %v1663_v51  ;;  %v1665_v53 = vpop.f32.mrf.mxu1  ;;  %v1577_v28 = vadd.f32 %v1576_v14, %v1487_v35 }
 0x22a   : > { %2024 = vmatmul.bf16.gmra.mxu3 %v4660_v58 }
 0x22b   : > { %5979 = vst [vmem:[#allocation54_spill] sm:$0xff] %v5305_v5  ;;  %v1666_v17 = vadd.f32 %v1665_v53, %v1577_v28  ;;  %2108 = vmatmul.bf16.vlgmr.msra.gmra.mxu0 %v5980_v38 }
 0x22c   : > { %2197 = vmatmul.bf16.vlgmr.msra.gmra.mxu1 %v5981_v34 }
 0x22d   : > { %4123 = vmatmul.msk.bf16.vlgmr.msra.gmra.mxu2 %vm816_vm0, %v5982_v16  ;;  %v1492_v49 = vpop.f32.mrf.mxu3 }
 0x230   : > { %v1754_v45 = vpop.f32.mrf.mxu2  ;;  %v1578_v27 = vpop.f32.mrf.mxu0 }
 0x231   : > { %v5314_v51 = vadd.f32 %v1754_v45, %v1666_v17  ;;  %v1667_v10 = vpop.f32.mrf.mxu1  ;;  %v1579_v14 = vadd.f32 %v1578_v27, %v1489_v18  ;;  %v5983_v18 = vld [vmem:[#allocation3_spill] sm:$0xff] }
 0x233   : > { %v1668_v25 = vadd.f32 %v1667_v10, %v1579_v14 }
 0x235   : > { %v1494_v58 = vpop.f32.mrf.mxu3 }
 0x238   : > { %v1756_v28 = vpop.f32.mrf.mxu2  ;;  %v1581_v38 = vpop.f32.mrf.mxu0 }
 0x239   : > { %v5318_v53 = vadd.f32 %v1756_v28, %v1668_v25  ;;  %v1670_v34 = vpop.f32.mrf.mxu1  ;;  %v1582_v5 = vadd.f32 %v1581_v38, %v1492_v49 }
 0x23a   : > { %2029 = vmatmul.bf16.gmra.mxu3 %v4684_v7 }
 0x23b   : > { %v1671_v17 = vadd.f32 %v1670_v34, %v1582_v5  ;;  %2113 = vmatmul.bf16.gmra.mxu0 %v4662_v59 }
 0x23c   : > { %2202 = vmatmul.bf16.gmra.mxu1 %v4664_v60 }
 0x23d   : > { %4124 = vmatmul.msk.bf16.gmra.mxu2 %vm816_vm0, %v5983_v18  ;;  %v1497_v10 = vpop.f32.mrf.mxu3 }
 0x240   : > { %v1759_v45 = vpop.f32.mrf.mxu2  ;;  %v1583_v27 = vpop.f32.mrf.mxu0 }
 0x241   : > { %v5327_v25 = vadd.f32 %v1759_v45, %v1671_v17  ;;  %v1672_v14 = vpop.f32.mrf.mxu1  ;;  %v1584_v49 = vadd.f32 %v1583_v27, %v1494_v58  ;;  %v5984_v45 = vld [vmem:[#allocation9_spill] sm:$0xff]  ;;  %v5985_v58 = vld [vmem:[#allocation10_spill] sm:$0xff]  ;;  %v5986_v27 = vld [vmem:[#allocation7_spill] sm:$0xff] }
 0x243   : > { %v1673_v38 = vadd.f32 %v1672_v14, %v1584_v49 }
 0x245   : > { %v1499_v7 = vpop.f32.mrf.mxu3 }
 0x248   : > { %v1761_v5 = vpop.f32.mrf.mxu2  ;;  %v1586_v59 = vpop.f32.mrf.mxu0 }
 0x249   : > { %v5331_v34 = vadd.f32 %v1761_v5, %v1673_v38  ;;  %v1675_v60 = vpop.f32.mrf.mxu1  ;;  %v1587_v16 = vadd.f32 %v1586_v59, %v1497_v10 }
 0x24a   : > { %2034 = vmatmul.bf16.gmra.mxu3 %v4711_v22 }
 0x24b   : > { %v1676_v17 = vadd.f32 %v1675_v60, %v1587_v16  ;;  %2118 = vmatmul.bf16.gmra.mxu0 %v5984_v45 }
 0x24c   : > { %2207 = vmatmul.bf16.gmra.mxu1 %v5985_v58 }
 0x24d   : > { %4125 = vmatmul.msk.bf16.gmra.mxu2 %vm816_vm0, %v5986_v27  ;;  %v1502_v14 = vpop.f32.mrf.mxu3 }
 0x250   : > { %v1764_v49 = vpop.f32.mrf.mxu2  ;;  %v1588_v5 = vpop.f32.mrf.mxu0 }
 0x251   : > { %v5340_v38 = vadd.f32 %v1764_v49, %v1676_v17  ;;  %v1677_v28 = vpop.f32.mrf.mxu1  ;;  %v1589_v10 = vadd.f32 %v1588_v5, %v1499_v7  ;;  %v5987_v7 = vld [vmem:[#allocation8_spill] sm:$0xff] }
 0x253   : > { %v1678_v18 = vadd.f32 %v1677_v28, %v1589_v10 }
 0x255   : > { %v1504_v22 = vpop.f32.mrf.mxu3 }
 0x258   : > { %v1766_v16 = vpop.f32.mrf.mxu2  ;;  %v1591_v45 = vpop.f32.mrf.mxu0 }
 0x259   : > { %v5344_v60 = vadd.f32 %v1766_v16, %v1678_v18  ;;  %v1680_v58 = vpop.f32.mrf.mxu1  ;;  %v1592_v35 = vadd.f32 %v1591_v45, %v1502_v14 }
 0x25a   : > { %2039 = vmatmul.bf16.gmra.mxu3 %v4738_v36 }
 0x25b   : > { %v1681_v17 = vadd.f32 %v1680_v58, %v1592_v35  ;;  %2123 = vmatmul.bf16.gmra.mxu0 %v4713_v23 }
 0x25c   : > { %2212 = vmatmul.bf16.gmra.mxu1 %v4715_v24 }
 0x25d   : > { %4126 = vmatmul.msk.bf16.gmra.mxu2 %vm816_vm0, %v5987_v7  ;;  %v1507_v28 = vpop.f32.mrf.mxu3 }
 0x260   : > { %v1769_v49 = vpop.f32.mrf.mxu2  ;;  %v1593_v5 = vpop.f32.mrf.mxu0 }
 0x261   : > { %v5353_v18 = vadd.f32 %v1769_v49, %v1681_v17  ;;  %v1682_v10 = vpop.f32.mrf.mxu1  ;;  %v1594_v14 = vadd.f32 %v1593_v5, %v1504_v22  ;;  %v5988_v49 = vld [vmem:[#allocation13_spill] sm:$0xff]  ;;  %v5989_v22 = vld [vmem:[#allocation14_spill] sm:$0xff]  ;;  %v5990_v5 = vld [vmem:[#allocation11_spill] sm:$0xff] }
 0x263   : > { %v1683_v45 = vadd.f32 %v1682_v10, %v1594_v14 }
 0x265   : > { %v1509_v36 = vpop.f32.mrf.mxu3 }
 0x268   : > { %v1771_v35 = vpop.f32.mrf.mxu2  ;;  %v1596_v23 = vpop.f32.mrf.mxu0 }
 0x269   : > { %v5357_v58 = vadd.f32 %v1771_v35, %v1683_v45  ;;  %v1685_v24 = vpop.f32.mrf.mxu1  ;;  %v1597_v27 = vadd.f32 %v1596_v23, %v1507_v28 }
 0x26a   : > { %2044 = vmatmul.bf16.gmra.mxu3 %v4765_v54 }
 0x26b   : > { %v1686_v17 = vadd.f32 %v1685_v24, %v1597_v27  ;;  %2128 = vmatmul.bf16.gmra.mxu0 %v5988_v49 }
 0x26c   : > { %2217 = vmatmul.bf16.gmra.mxu1 %v5989_v22 }
 0x26d   : > { %4127 = vmatmul.msk.bf16.gmra.mxu2 %vm816_vm0, %v5990_v5  ;;  %v1512_v10 = vpop.f32.mrf.mxu3 }
 0x270   : > { %v1774_v14 = vpop.f32.mrf.mxu2  ;;  %v1598_v35 = vpop.f32.mrf.mxu0 }
 0x271   : > { %v5366_v45 = vadd.f32 %v1774_v14, %v1686_v17  ;;  %v1687_v16 = vpop.f32.mrf.mxu1  ;;  %v1599_v28 = vadd.f32 %v1598_v35, %v1509_v36  ;;  %v5992_v36 = vld [vmem:[#allocation12_spill] sm:$0xff] }
 0x273   : > { %v1688_v7 = vadd.f32 %v1687_v16, %v1599_v28 }
 0x275   : > { %v1514_v54 = vpop.f32.mrf.mxu3 }
 0x278   : > { %v1776_v27 = vpop.f32.mrf.mxu2  ;;  %v1601_v49 = vpop.f32.mrf.mxu0 }
 0x279   : > { %v5370_v24 = vadd.f32 %v1776_v27, %v1688_v7  ;;  %v1690_v22 = vpop.f32.mrf.mxu1  ;;  %v1602_v59 = vadd.f32 %v1601_v49, %v1512_v10 }
 0x27a   : > { %2049 = vmatmul.bf16.gmra.mxu3 %v4789_v11 }
 0x27b   : > { %5991 = vst [vmem:[#allocation4_spill] sm:$0xff] %v5370_v24  ;;  %v1691_v17 = vadd.f32 %v1690_v22, %v1602_v59  ;;  %2133 = vmatmul.bf16.gmra.mxu0 %v4767_v55 }
 0x27c   : > { %2222 = vmatmul.bf16.gmra.mxu1 %v4769_v56 }
 0x27d   : > { %4128 = vmatmul.msk.bf16.gmra.mxu2 %vm816_vm0, %v5992_v36  ;;  %v1517_v16 = vpop.f32.mrf.mxu3 }
 0x280   : > { %v1779_v14 = vpop.f32.mrf.mxu2  ;;  %v1603_v35 = vpop.f32.mrf.mxu0 }
 0x281   : > { %v5379_v7 = vadd.f32 %v1779_v14, %v1691_v17  ;;  %v1692_v28 = vpop.f32.mrf.mxu1  ;;  %v1604_v10 = vadd.f32 %v1603_v35, %v1514_v54  ;;  %v5995_v14 = vld [vmem:[#allocation17_spill] sm:$0xff]  ;;  %v5996_v54 = vld [vmem:[#allocation18_spill] sm:$0xff]  ;;  %v5997_v35 = vld [vmem:[#allocation15_spill] sm:$0xff] }
 0x283   : > { %5993 = vst [vmem:[#allocation5_spill] sm:$0xff] %v5379_v7  ;;  %v1693_v49 = vadd.f32 %v1692_v28, %v1604_v10 }
 0x285   : > { %v1519_v11 = vpop.f32.mrf.mxu3 }
 0x288   : > { %v1781_v59 = vpop.f32.mrf.mxu2  ;;  %v1606_v55 = vpop.f32.mrf.mxu0 }
 0x289   : > { %v5383_v22 = vadd.f32 %v1781_v59, %v1693_v49  ;;  %v1695_v56 = vpop.f32.mrf.mxu1  ;;  %v1607_v5 = vadd.f32 %v1606_v55, %v1517_v16  ;;  %v6005_v55 = vld [vmem:[#allocation23_spill] sm:$0xff] }
 0x28a   : > { %2054 = vmatmul.bf16.gmra.mxu3 %v4816_v30 }
 0x28b   : > { %5994 = vst [vmem:[#allocation6_spill] sm:$0xff] %v5383_v22  ;;  %v1696_v17 = vadd.f32 %v1695_v56, %v1607_v5  ;;  %2138 = vmatmul.bf16.gmra.mxu0 %v5995_v14 }
 0x28c   : > { %2227 = vmatmul.bf16.gmra.mxu1 %v5996_v54 }
 0x28d   : > { %4129 = vmatmul.msk.bf16.gmra.mxu2 %vm816_vm0, %v5997_v35  ;;  %v1522_v28 = vpop.f32.mrf.mxu3 }
 0x290   : > { %v1784_v10 = vpop.f32.mrf.mxu2  ;;  %v1608_v59 = vpop.f32.mrf.mxu0 }
 0x291   : > { %v5392_v49 = vadd.f32 %v1784_v10, %v1696_v17  ;;  %v1697_v27 = vpop.f32.mrf.mxu1  ;;  %v1609_v16 = vadd.f32 %v1608_v59, %v1519_v11  ;;  %v6000_v11 = vld [vmem:[#allocation16_spill] sm:$0xff] }
 0x293   : > { %5998 = vst [vmem:[#allocation2_spill] sm:$0xff] %v5392_v49  ;;  %v1698_v36 = vadd.f32 %v1697_v27, %v1609_v16 }
 0x295   : > { %v1524_v30 = vpop.f32.mrf.mxu3 }
 0x298   : > { %v1786_v5 = vpop.f32.mrf.mxu2  ;;  %v1611_v14 = vpop.f32.mrf.mxu0 }
 0x299   : > { %v5396_v56 = vadd.f32 %v1786_v5, %v1698_v36  ;;  %v1700_v54 = vpop.f32.mrf.mxu1  ;;  %v1612_v23 = vadd.f32 %v1611_v14, %v1522_v28 }
 0x29a   : > { %2059 = vmatmul.bf16.gmra.mxu3 %v4837_v52 }
 0x29b   : > { %5999 = vst [vmem:[#allocation3_spill] sm:$0xff] %v5396_v56  ;;  %v1701_v17 = vadd.f32 %v1700_v54, %v1612_v23  ;;  %2143 = vmatmul.bf16.gmra.mxu0 %v4818_v31 }
 0x29c   : > { %2232 = vmatmul.bf16.gmra.mxu1 %v4820_v32 }
 0x29d   : > { %4130 = vmatmul.msk.bf16.gmra.mxu2 %vm816_vm0, %v6000_v11  ;;  %v2020_v27 = vpop.f32.mrf.mxu3 }
 0x2a0   : > { %v1789_v10 = vpop.f32.mrf.mxu2  ;;  %v1613_v59 = vpop.f32.mrf.mxu0 }
 0x2a1   : > { %v5405_v36 = vadd.f32 %v1789_v10, %v1701_v17  ;;  %v1702_v16 = vpop.f32.mrf.mxu1  ;;  %v1614_v28 = vadd.f32 %v1613_v59, %v1524_v30  ;;  %v4441_v30 = vld [vmem:[%s5769_s3 + $0x48] sm:$0xff] }
 0x2a2   : > { %2753 = vmatpush.bf16.msrb.mxu3 %v4441_v30 }
 0x2a3   : > { %6001 = vst [vmem:[#allocation9_spill] sm:$0xff] %v5405_v36  ;;  %v1703_v14 = vadd.f32 %v1702_v16, %v1614_v28 }
 0x2a5   : > { %v2022_v52 = vpop.f32.mrf.mxu3 }
 0x2a8   : > { %v1791_v23 = vpop.f32.mrf.mxu2  ;;  %v2109_v31 = vpop.f32.mrf.mxu0 }
 0x2a9   : > { %v5409_v54 = vadd.f32 %v1791_v23, %v1703_v14  ;;  %v2198_v32 = vpop.f32.mrf.mxu1  ;;  %v2110_v35 = vadd.f32 %v2109_v31, %v2020_v27 }
 0x2aa   : > { %2064 = vmatmul.bf16.gmra.mxu3 %v4869_v50  ;;  %v5424_v50 = vld [vmem:[%s5768_s2] ss:$0 sm:$0xff] }
 0x2ab   : > { %6002 = vst [vmem:[#allocation10_spill] sm:$0xff] %v5409_v54  ;;  %v2199_v17 = vadd.f32 %v2198_v32, %v2110_v35  ;;  %2148 = vmatmul.bf16.gmra.mxu0 %v4839_v61  ;;  %v6003_v35 = vld [vmem:[#allocation64_spill] sm:$0xff]  ;;  %v6006_v54 = vld [vmem:[#allocation65_spill] sm:$0xff] }
 0x2ac   : > { %2237 = vmatmul.bf16.gmra.mxu1 %v4841_v0  ;;  %v6004_v61 = vmax.f32 %v4854_v19, %v6003_v35  ;;  %v6007_v42 = vmax.f32 %v6005_v55, %v6006_v54  ;;  %v6010_v19 = vld [vmem:[#allocation22_spill] sm:$0xff] }
 0x2ad   : > { %4131 = vmatmul.msk.bf16.gmra.mxu2 %vm816_vm0, %v4814_v29  ;;  %v2025_v10 = vpop.f32.mrf.mxu3 }
 0x2b0   : > { %v2287_v27 = vpop.f32.mrf.mxu2  ;;  %v2111_v16 = vpop.f32.mrf.mxu0 }
 0x2b1   : > { %v2288_v59 = vadd.f32 %v2287_v27, %v2199_v17  ;;  %v2200_v28 = vpop.f32.mrf.mxu1  ;;  %v2112_v14 = vadd.f32 %v2111_v16, %v2022_v52  ;;  %v6009_v16 = vld [vmem:[#allocation21_spill] sm:$0xff] }
 0x2b3   : > { %v2399_v23 = vmax.f32 %v6004_v61, %v2288_v59  ;;  %v2201_v0 = vadd.f32 %v2200_v28, %v2112_v14  ;;  %v6011_v14 = vld [vmem:[#allocation19_spill] sm:$0xff] }
 0x2b5   : > { %v2435_v31 = vadd.f32 %v5424_v50, %v2399_v23  ;;  %v2027_v29 = vpop.f32.mrf.mxu3 }
 0x2b7   : > { %v2467_v30 = vmax.f32 %v2435_v31, 0.0  ;;  %v6012_v31 = vld [vmem:[#allocation24_spill] sm:$0xff] }
 0x2b8   : > { %v2289_v32 = vpop.f32.mrf.mxu2  ;;  %v2114_v17 = vpop.f32.mrf.mxu0 }
 0x2b9   : > { %v2290_v11 = vadd.f32 %v2289_v32, %v2201_v0  ;;  %v2203_v27 = vpop.f32.mrf.mxu1  ;;  %v2115_v5 = vadd.f32 %v2114_v17, %v2025_v10  ;;  %v2515_v59 = vrot.slane %v2467_v30, 1  ;;  %v4436_v10 = vld [vmem:[%s5769_s3 + $0x20] sm:$0xff] }
 0x2ba   : > { %2069 = vmatmul.bf16.gmra.mxu3 %v6008_v1  ;;  %v4451_v1 = vld [vmem:[%s5769_s3 + $0x98] sm:$0xff]  ;;  %3206 = vmatpush.bf16.msrb.mxu2 %v4436_v10  ;;  %v6013_v32 = vld [vmem:[#allocation66_spill] sm:$0xff] }
 0x2bb   : > { %v2400_v36 = vmax.f32 %v6007_v42, %v2290_v11  ;;  %v2204_v52 = vadd.f32 %v2203_v27, %v2115_v5  ;;  %2153 = vmatmul.bf16.gmra.mxu0 %v6009_v16  ;;  %v2547_v5 = vmax.f32 %v2467_v30, %v2515_v59  ;;  %v6014_v17 = vmax.f32 %v6012_v31, %v6013_v32  ;;  %v6015_v32 = vld [vmem:[#allocation32_spill] sm:$0xff] }
 0x2bc   : > { %2242 = vmatmul.bf16.gmra.mxu1 %v6010_v19  ;;  %3043 = vmatpush.bf16.msrb.mxu0 %v4451_v1  ;;  %v2563_v19 = vrot.slane %v2467_v30, 2 }
 0x2bd   : > { %v2436_v28 = vadd.f32 %v5424_v50, %v2400_v36  ;;  %4132 = vmatmul.msk.bf16.gmra.mxu2 %vm816_vm0, %v6011_v14  ;;  %v2030_v35 = vpop.f32.mrf.mxu3 }
 0x2be   : > { %v2595_v1 = vmax.f32 %v2547_v5, %v2563_v19  ;;  %v6020_v19 = vld [vmem:[#allocation28_spill] sm:$0xff] }
 0x2bf   : > { %v2468_v42 = vmax.f32 %v2436_v28, 0.0  ;;  %v4456_v28 = vld [vmem:[%s5769_s3 + $0xc0] sm:$0xff] }
 0x2c0   : > { %v2292_v55 = vpop.f32.mrf.mxu2  ;;  %v2116_v36 = vpop.f32.mrf.mxu0  ;;  %3130 = vmatpush.bf16.msrb.mxu1 %v4456_v28  ;;  %v6021_v28 = vld [vmem:[#allocation20_spill] sm:$0xff] }
 0x2c1   : > { %v2780_v54 = vrot.slane %v2468_v42, 2  ;;  %v2293_v11 = vadd.f32 %v2292_v55, %v2204_v52  ;;  %v2205_v61 = vpop.f32.mrf.mxu1  ;;  %v2117_v23 = vadd.f32 %v2116_v36, %v2027_v29  ;;  %v2855_v10 = vrot.slane %v2468_v42, 1 }
 0x2c3   : > { %v2812_v0 = vmax.f32 %v2547_v5, %v2780_v54  ;;  %v2401_v27 = vmax.f32 %v6014_v17, %v2293_v11  ;;  %v2206_v16 = vadd.f32 %v2205_v61, %v2117_v23  ;;  %v2887_v12 = vmax.f32 %v2468_v42, %v2855_v10  ;;  %v6016_v17 = vld [vmem:[#allocation29_spill] sm:$0xff]  ;;  %v6019_v5 = vld [vmem:[#allocation27_spill] sm:$0xff] }
 0x2c4   : > { %v2611_v61 = vpack.c.bf16 %v2595_v1, %v2595_v1 }
 0x2c5   : > { %v2437_v14 = vadd.f32 %v5424_v50, %v2401_v27  ;;  %v2032_v59 = vpop.f32.mrf.mxu3  ;;  %v6017_v27 = vld [vmem:[#allocation67_spill] sm:$0xff]  ;;  %v2903_v42 = vmax.f32 %v2887_v12, %v2780_v54  ;;  %v6022_v54 = vld [vmem:[#allocation30_spill] sm:$0xff] }
 0x2c6   : > { %v6018_v49 = vmax.f32 %v6016_v17, %v6017_v27  ;;  %v2664_v10 = vunpack.c.l.b16 %v2611_v61 }
 0x2c7   : > { %v2469_v52 = vmax.f32 %v2437_v14, 0.0 }
 0x2c8   : > { %v2294_v55 = vpop.f32.mrf.mxu2  ;;  %v2119_v36 = vpop.f32.mrf.mxu0  ;;  %v2680_v27 = vrot.slane %v2664_v10, 3 }
 0x2c9   : > { %v2516_v29 = vrot.slane %v2469_v52, 1  ;;  %v2208_v56 = vpop.f32.mrf.mxu1  ;;  %v2295_v31 = vadd.f32 %v2294_v55, %v2206_v16  ;;  %v2120_v11 = vadd.f32 %v2119_v36, %v2030_v35  ;;  %v2564_v23 = vrot.slane %v2469_v52, 2 }
 0x2ca   : > { %2074 = vmatmul.bf16.gmra.mxu3 %v6015_v32 }
 0x2cb   : > { %v2548_v30 = vmax.f32 %v2469_v52, %v2516_v29  ;;  %v2402_v15 = vmax.f32 %v6018_v49, %v2295_v31  ;;  %v2209_v22 = vadd.f32 %v2208_v56, %v2120_v11  ;;  %2158 = vmatmul.bf16.gmra.mxu0 %v6019_v5  ;;  %v2828_v29 = vpack.c.bf16 %v2812_v0, %v2812_v0 }
 0x2cc   : > { %2247 = vmatmul.bf16.gmra.mxu1 %v6020_v19  ;;  %v2919_v11 = vpack.c.bf16 %v2903_v42, %v2903_v42 }
 0x2cd   : > { %v2596_v14 = vmax.f32 %v2548_v30, %v2564_v23  ;;  %4133 = vmatmul.msk.bf16.gmra.mxu2 %vm816_vm0, %v6021_v28  ;;  %v2438_v35 = vadd.f32 %v5424_v50, %v2402_v15  ;;  %v2035_v16 = vpop.f32.mrf.mxu3  ;;  %v6023_v15 = vld [vmem:[#allocation68_spill] sm:$0xff]  ;;  %v3233_v0 = vunpack.c.l.b16 %v2828_v29 }
 0x2ce   : > { %v6024_v19 = vmax.f32 %v6022_v54, %v6023_v15  ;;  %v6026_v15 = vld [vmem:[#allocation69_spill] sm:$0xff] }
 0x2cf   : > { %v2612_v1 = vpack.c.bf16 %v2596_v14, %v2596_v14  ;;  %v2470_v52 = vmax.f32 %v2438_v35, 0.0  ;;  %v3249_v54 = vrot.slane %v3233_v0, 6  ;;  %v6030_v0 = vld [vmem:[#allocation34_spill] sm:$0xff] }
 0x2d0   : > { %v2297_v55 = vpop.f32.mrf.mxu2  ;;  %v2121_v56 = vpop.f32.mrf.mxu0 }
 0x2d1   : > { %v2665_v36 = vunpack.c.l.b16 %v2612_v1  ;;  %v2298_v49 = vadd.f32 %v2297_v55, %v2209_v22  ;;  %v2210_v31 = vpop.f32.mrf.mxu1  ;;  %v2781_v32 = vrot.slane %v2470_v52, 2  ;;  %v2856_v23 = vrot.slane %v2470_v52, 1 }
 0x2d2   : > { %v2122_v17 = vadd.f32 %v2121_v56, %v2032_v59  ;;  %v2962_v55 = vunpack.c.l.b16 %v2919_v11  ;;  %v6025_v11 = vld [vmem:[#allocation35_spill] sm:$0xff] }
 0x2d3   : > { %v2681_v5 = vrot.slane %v2665_v36, 2  ;;  %v3141_v12 = vrot.slane %v2665_v36, 7  ;;  %v2403_v61 = vmax.f32 %v6024_v19, %v2298_v49  ;;  %v2813_v14 = vmax.f32 %v2548_v30, %v2781_v32 }
 0x2d4   : > { %v2888_v28 = vmax.f32 %v2470_v52, %v2856_v23  ;;  %v2211_v35 = vadd.f32 %v2210_v31, %v2122_v17  ;;  %v2978_v29 = vrot.slane %v2962_v55, 1 }
 0x2d5   : > { %v2683_v1 = vsel %vm2682_vm1, %v2681_v5, %v2680_v27  ;;  %v3142_v22 = vsel %vm2682_vm1, %v3141_v12, %v2664_v10  ;;  %v2439_v42 = vadd.f32 %v5424_v50, %v2403_v61  ;;  %v2829_v9 = vpack.c.bf16 %v2813_v14, %v2813_v14  ;;  %v2037_v56 = vpop.f32.mrf.mxu3  ;;  %v6028_v61 = vld [vmem:[#allocation38_spill] sm:$0xff] }
 0x2d6   : > { %v2904_v59 = vmax.f32 %v2888_v28, %v2781_v32  ;;  %v3065_v10 = vrot.slane %v2962_v55, 4  ;;  %v6027_v32 = vmax.f32 %v6025_v11, %v6026_v15 }
 0x2d7   : > { %v2471_v7 = vmax.f32 %v2439_v42, 0.0  ;;  %v3234_v39 = vunpack.c.l.b16 %v2829_v9  ;;  %v4440_v42 = vld [vmem:[%s5769_s3 + $0x40] sm:$0xff] }
 0x2d8   : > { %v2920_v36 = vpack.c.bf16 %v2904_v59, %v2904_v59  ;;  %v2299_v24 = vpop.f32.mrf.mxu2  ;;  %v2124_v52 = vpop.f32.mrf.mxu0  ;;  %2754 = vmatpush.bf16.msrb.mxu3 %v4440_v42 }
 0x2d9   : > { %v2517_v49 = vrot.slane %v2471_v7, 1  ;;  %v2300_v30 = vadd.f32 %v2299_v24, %v2211_v35  ;;  %v2213_v31 = vpop.f32.mrf.mxu1  ;;  %v3250_v17 = vrot.slane %v3234_v39, 5  ;;  %v2125_v27 = vadd.f32 %v2124_v52, %v2035_v16  ;;  %v6029_v35 = vld [vmem:[#allocation33_spill] sm:$0xff] }
 0x2da   : > { %v2963_v23 = vunpack.c.l.b16 %v2920_v36  ;;  %v2565_v12 = vrot.slane %v2471_v7, 2  ;;  %2079 = vmatmul.bf16.gmra.mxu3 %v6028_v61 }
 0x2db   : > { %v2549_v5 = vmax.f32 %v2471_v7, %v2517_v49  ;;  %v2404_v19 = vmax.f32 %v6027_v32, %v2300_v30  ;;  %v3251_v24 = vsel %vm2682_vm1, %v3250_v17, %v3249_v54  ;;  %v2214_v28 = vadd.f32 %v2213_v31, %v2125_v27  ;;  %2163 = vmatmul.bf16.gmra.mxu0 %v6029_v35  ;;  %v6031_v7 = vld [vmem:[#allocation25_spill] sm:$0xff] }
 0x2dc   : > { %v2979_v9 = vsel %vm2682_vm1, %v2963_v23, %v2978_v29  ;;  %v3066_v14 = vrot.slane %v2963_v23, 3  ;;  %2252 = vmatmul.bf16.gmra.mxu1 %v6030_v0 }
 0x2dd   : > { %v2597_v39 = vmax.f32 %v2549_v5, %v2565_v12  ;;  %v2440_v16 = vadd.f32 %v5424_v50, %v2404_v19  ;;  %4134 = vmatmul.msk.bf16.gmra.mxu2 %vm816_vm0, %v6031_v7  ;;  %v2040_v59 = vpop.f32.mrf.mxu3 }
 0x2de   : > { %v3067_v55 = vsel %vm2682_vm1, %v3066_v14, %v3065_v10  ;;  %v6032_v10 = vmax.f32 %v5955_v2, %v5240_v46 }
 0x2df   : > { %v2613_v36 = vpack.c.bf16 %v2597_v39, %v2597_v39  ;;  %v2472_v54 = vmax.f32 %v2440_v16, 0.0 }
 0x2e0   : > { %v2302_v49 = vpop.f32.mrf.mxu2  ;;  %v2126_v23 = vpop.f32.mrf.mxu0 }
 0x2e1   : > { %v2666_v30 = vunpack.c.l.b16 %v2613_v36  ;;  %v2782_v52 = vrot.slane %v2472_v54, 2  ;;  %v2857_v31 = vrot.slane %v2472_v54, 1  ;;  %v2303_v29 = vadd.f32 %v2302_v49, %v2214_v28  ;;  %v2215_v17 = vpop.f32.mrf.mxu1 }
 0x2e2   : > { %v2127_v27 = vadd.f32 %v2126_v23, %v2037_v56  ;;  %v6033_v23 = vld [vmem:[#allocation41_spill] sm:$0xff] }
 0x2e3   : > { %v2684_v12 = vrot.slane %v2666_v30, 1  ;;  %v3143_v11 = vrot.slane %v2666_v30, 6  ;;  %v2814_v15 = vmax.f32 %v2549_v5, %v2782_v52  ;;  %v2889_v32 = vmax.f32 %v2472_v54, %v2857_v31 }
 0x2e4   : > { %v2405_v19 = vmax.f32 %v6032_v10, %v2303_v29  ;;  %v2216_v61 = vadd.f32 %v2215_v17, %v2127_v27  ;;  %v6037_v10 = vld [vmem:[#allocation39_spill] sm:$0xff] }
 0x2e5   : > { %v2686_v14 = vsel %vm2685_vm2, %v2684_v12, %v2683_v1  ;;  %v3144_v35 = vsel %vm2685_vm2, %v3143_v11, %v3142_v22  ;;  %v2830_v0 = vpack.c.bf16 %v2814_v15, %v2814_v15  ;;  %v2905_v39 = vmax.f32 %v2889_v32, %v2782_v52  ;;  %v2042_v16 = vpop.f32.mrf.mxu3  ;;  %v6034_v52 = vld [vmem:[#allocation36_spill] sm:$0xff] }
 0x2e6   : > { %v2441_v28 = vadd.f32 %v5424_v50, %v2405_v19  ;;  %v6035_v17 = vmax.f32 %v6033_v23, %v6034_v52  ;;  %v6036_v12 = vld [vmem:[#allocation44_spill] sm:$0xff] }
 0x2e7   : > { %v2921_v7 = vpack.c.bf16 %v2905_v39, %v2905_v39  ;;  %v3235_v56 = vunpack.c.l.b16 %v2830_v0  ;;  %v6038_v19 = vld [vmem:[#allocation40_spill] sm:$0xff] }
 0x2e8   : > { %v2473_v42 = vmax.f32 %v2441_v28, 0.0  ;;  %v2304_v36 = vpop.f32.mrf.mxu2  ;;  %v2129_v30 = vpop.f32.mrf.mxu0 }
 0x2e9   : > { %v2964_v5 = vunpack.c.l.b16 %v2921_v7  ;;  %v3252_v54 = vrot.slane %v3235_v56, 4  ;;  %v2305_v49 = vadd.f32 %v2304_v36, %v2216_v61  ;;  %v2218_v46 = vpop.f32.mrf.mxu1  ;;  %v2130_v31 = vadd.f32 %v2129_v30, %v2040_v59  ;;  %v4435_v7 = vld [vmem:[%s5769_s3 + $0x18] sm:$0xff] }
 0x2ea   : > { %v2518_v2 = vrot.slane %v2473_v42, 1  ;;  %2084 = vmatmul.bf16.gmra.mxu3 %v6036_v12  ;;  %v2566_v15 = vrot.slane %v2473_v42, 2  ;;  %3207 = vmatpush.bf16.msrb.mxu2 %v4435_v7 }
 0x2eb   : > { %v2980_v29 = vrot.slane %v2964_v5, 7  ;;  %v3068_v1 = vrot.slane %v2964_v5, 2  ;;  %v3253_v22 = vsel %vm2685_vm2, %v3252_v54, %v3251_v24  ;;  %v2406_v27 = vmax.f32 %v6035_v17, %v2305_v49  ;;  %2168 = vmatmul.bf16.gmra.mxu0 %v6037_v10  ;;  %v6039_v24 = vld [vmem:[#allocation31_spill] sm:$0xff] }
 0x2ec   : > { %v2550_v11 = vmax.f32 %v2473_v42, %v2518_v2  ;;  %v2219_v32 = vadd.f32 %v2218_v46, %v2130_v31  ;;  %2257 = vmatmul.bf16.gmra.mxu1 %v6038_v19  ;;  %v6040_v31 = vld [vmem:[#allocation70_spill] sm:$0xff] }
 0x2ed   : > { %v2981_v61 = vsel %vm2685_vm2, %v2980_v29, %v2979_v9  ;;  %v3069_v59 = vsel %vm2685_vm2, %v3068_v1, %v3067_v55  ;;  %v2442_v0 = vadd.f32 %v5424_v50, %v2406_v27  ;;  %4135 = vmatmul.msk.bf16.gmra.mxu2 %vm816_vm0, %v6039_v24  ;;  %v2045_v28 = vpop.f32.mrf.mxu3  ;;  %v6041_v29 = vmax.f32 %v5963_v3, %v6040_v31  ;;  %v6043_v31 = vld [vmem:[#allocation47_spill] sm:$0xff] }
 0x2ee   : > { %v2598_v39 = vmax.f32 %v2550_v11, %v2566_v15 }
 0x2ef   : > { %v2474_v56 = vmax.f32 %v2442_v0, 0.0 }
 0x2f0   : > { %v2614_v42 = vpack.c.bf16 %v2598_v39, %v2598_v39  ;;  %v2307_v36 = vpop.f32.mrf.mxu2  ;;  %v2131_v55 = vpop.f32.mrf.mxu0 }
 0x2f1   : > { %v2783_v5 = vrot.slane %v2474_v56, 2  ;;  %v2858_v9 = vrot.slane %v2474_v56, 1  ;;  %v2308_v54 = vadd.f32 %v2307_v36, %v2219_v32  ;;  %v2220_v49 = vpop.f32.mrf.mxu1  ;;  %v2132_v17 = vadd.f32 %v2131_v55, %v2042_v16  ;;  %v4450_v32 = vld [vmem:[%s5769_s3 + $0x90] sm:$0xff] }
 0x2f2   : > { %v2667_v30 = vunpack.c.l.b16 %v2614_v42  ;;  %3044 = vmatpush.bf16.msrb.mxu0 %v4450_v32  ;;  %v6048_v32 = vld [vmem:[#allocation37_spill] sm:$0xff] }
 0x2f3   : > { %v2815_v46 = vmax.f32 %v2550_v11, %v2783_v5  ;;  %v2890_v2 = vmax.f32 %v2474_v56, %v2858_v9  ;;  %v2407_v1 = vmax.f32 %v6041_v29, %v2308_v54  ;;  %v4455_v11 = vld [vmem:[%s5769_s3 + $0xb8] sm:$0xff]  ;;  %v2221_v16 = vadd.f32 %v2220_v49, %v2132_v17  ;;  %v6044_v29 = vld [vmem:[#allocation42_spill] sm:$0xff] }
 0x2f4   : > { %v2688_v23 = vsel %vm2687_vm3, %v2667_v30, %v2686_v14  ;;  %v3145_v52 = vrot.slane %v2667_v30, 5  ;;  %3131 = vmatpush.bf16.msrb.mxu1 %v4455_v11  ;;  %v6046_v17 = vld [vmem:[#allocation45_spill] sm:$0xff] }
 0x2f5   : > { %v2831_v27 = vpack.c.bf16 %v2815_v46, %v2815_v46  ;;  %v2906_v12 = vmax.f32 %v2890_v2, %v2783_v5  ;;  %v2443_v15 = vadd.f32 %v5424_v50, %v2407_v1  ;;  %v2047_v3 = vpop.f32.mrf.mxu3  ;;  %v6042_v2 = vld [vmem:[#allocation50_spill] sm:$0xff]  ;;  %v6045_v1 = vmax.f32 %v6043_v31, %v6044_v29 }
 0x2f6   : > { %v3146_v10 = vsel %vm2687_vm3, %v3145_v52, %v3144_v35 }
 0x2f7   : > { %v2922_v19 = vpack.c.bf16 %v2906_v12, %v2906_v12  ;;  %v3236_v0 = vunpack.c.l.b16 %v2831_v27  ;;  %v2475_v14 = vmax.f32 %v2443_v15, 0.0  ;;  %v6047_v27 = vld [vmem:[#allocation46_spill] sm:$0xff] }
 0x2f8   : > { %v2309_v24 = vpop.f32.mrf.mxu2  ;;  %v2134_v42 = vpop.f32.mrf.mxu0 }
 0x2f9   : > { %v2965_v39 = vunpack.c.l.b16 %v2922_v19  ;;  %v3254_v7 = vrot.slane %v3236_v0, 3  ;;  %v2519_v56 = vrot.slane %v2475_v14, 1  ;;  %v2223_v36 = vpop.f32.mrf.mxu1  ;;  %v2567_v5 = vrot.slane %v2475_v14, 2 }
 0x2fa   : > { %v2310_v9 = vadd.f32 %v2309_v24, %v2221_v16  ;;  %v2135_v54 = vadd.f32 %v2134_v42, %v2045_v28  ;;  %2089 = vmatmul.bf16.gmra.mxu3 %v6042_v2 }
 0x2fb   : > { %v2982_v55 = vrot.slane %v2965_v39, 6  ;;  %v3070_v30 = vrot.slane %v2965_v39, 1  ;;  %v3255_v35 = vsel %vm2687_vm3, %v3254_v7, %v3253_v22  ;;  %v2551_v46 = vmax.f32 %v2475_v14, %v2519_v56  ;;  %2173 = vmatmul.bf16.gmra.mxu0 %v6046_v17 }
 0x2fc   : > { %v2408_v49 = vmax.f32 %v6045_v1, %v2310_v9  ;;  %v2224_v52 = vadd.f32 %v2223_v36, %v2135_v54  ;;  %2262 = vmatmul.bf16.gmra.mxu1 %v6047_v27 }
 0x2fd   : > { %v2983_v12 = vsel %vm2687_vm3, %v2982_v55, %v2981_v61  ;;  %v3071_v28 = vsel %vm2687_vm3, %v3070_v30, %v3069_v59  ;;  %v2599_v15 = vmax.f32 %v2551_v46, %v2567_v5  ;;  %4136 = vmatmul.msk.bf16.gmra.mxu2 %vm816_vm0, %v6048_v32  ;;  %v2050_v11 = vpop.f32.mrf.mxu3  ;;  %v6049_v5 = vld [vmem:[#allocation71_spill] sm:$0xff] }
 0x2fe   : > { %v2444_v22 = vadd.f32 %v5424_v50, %v2408_v49  ;;  %v6050_v9 = vmax.f32 %v5970_v33, %v6049_v5 }
 0x2ff   : > { %v2615_v19 = vpack.c.bf16 %v2599_v15, %v2599_v15 }
 0x300   : > { %v2476_v0 = vmax.f32 %v2444_v22, 0.0  ;;  %v2312_v14 = vpop.f32.mrf.mxu2  ;;  %v2136_v39 = vpop.f32.mrf.mxu0 }
 0x301   : > { %v2668_v16 = vunpack.c.l.b16 %v2615_v19  ;;  %v2313_v24 = vadd.f32 %v2312_v14, %v2224_v52  ;;  %v2225_v7 = vpop.f32.mrf.mxu1  ;;  %v2137_v61 = vadd.f32 %v2136_v39, %v2047_v3  ;;  %v6051_v39 = vld [vmem:[#allocation53_spill] sm:$0xff] }
 0x302   : > { %v2784_v56 = vrot.slane %v2476_v0, 2  ;;  %v2859_v42 = vrot.slane %v2476_v0, 1 }
 0x303   : > { %v2689_v36 = vrot.slane %v2668_v16, 7  ;;  %v3147_v59 = vrot.slane %v2668_v16, 4  ;;  %v2409_v54 = vmax.f32 %v6050_v9, %v2313_v24  ;;  %v2226_v2 = vadd.f32 %v2225_v7, %v2137_v61  ;;  %v6054_v61 = vld [vmem:[#allocation55_spill] sm:$0xff] }
 0x304   : > { %v2816_v55 = vmax.f32 %v2551_v46, %v2784_v56  ;;  %v2891_v30 = vmax.f32 %v2476_v0, %v2859_v42  ;;  %v6055_v9 = vld [vmem:[#allocation51_spill] sm:$0xff] }
 0x305   : > { %v2691_v31 = vsel %vm2690_vm4, %v2689_v36, %v2688_v23  ;;  %v3148_v29 = vsel %vm2690_vm4, %v3147_v59, %v3146_v10  ;;  %v2445_v1 = vadd.f32 %v5424_v50, %v2409_v54  ;;  %v2052_v17 = vpop.f32.mrf.mxu3  ;;  %v6052_v10 = vld [vmem:[#allocation48_spill] sm:$0xff] }
 0x306   : > { %v2832_v49 = vpack.c.bf16 %v2816_v55, %v2816_v55  ;;  %v2907_v52 = vmax.f32 %v2891_v30, %v2784_v56  ;;  %v6053_v7 = vmax.f32 %v6051_v39, %v6052_v10  ;;  %v6056_v54 = vld [vmem:[#allocation52_spill] sm:$0xff]  ;;  %v6057_v30 = vld [vmem:[#allocation43_spill] sm:$0xff] }
 0x307   : > { %v2477_v27 = vmax.f32 %v2445_v1, 0.0 }
 0x308   : > { %v2923_v3 = vpack.c.bf16 %v2907_v52, %v2907_v52  ;;  %v3237_v15 = vunpack.c.l.b16 %v2832_v49  ;;  %v2314_v32 = vpop.f32.mrf.mxu2  ;;  %v2139_v33 = vpop.f32.mrf.mxu0 }
 0x309   : > { %v2520_v22 = vrot.slane %v2477_v27, 1  ;;  %v2315_v19 = vadd.f32 %v2314_v32, %v2226_v2  ;;  %v2228_v14 = vpop.f32.mrf.mxu1  ;;  %v2140_v16 = vadd.f32 %v2139_v33, %v2050_v11  ;;  %v2568_v23 = vrot.slane %v2477_v27, 2  ;;  %v4439_v2 = vld [vmem:[%s5769_s3 + $0x38] sm:$0xff] }
 0x30a   : > { %v2966_v46 = vunpack.c.l.b16 %v2923_v3  ;;  %v3256_v0 = vrot.slane %v3237_v15, 2  ;;  %2094 = vmatmul.bf16.gmra.mxu3 %v6054_v61 }
 0x30b   : > { %v2552_v24 = vmax.f32 %v2477_v27, %v2520_v22  ;;  %v2410_v42 = vmax.f32 %v6053_v7, %v2315_v19  ;;  %v2229_v5 = vadd.f32 %v2228_v14, %v2140_v16  ;;  %2178 = vmatmul.bf16.gmra.mxu0 %v6055_v9  ;;  %2755 = vmatpush.bf16.msrb.mxu3 %v4439_v2 }
 0x30c   : > { %v2984_v56 = vrot.slane %v2966_v46, 5  ;;  %v3072_v36 = vsel %vm2690_vm4, %v2966_v46, %v3071_v28  ;;  %v3257_v59 = vsel %vm2690_vm4, %v3256_v0, %v3255_v35  ;;  %2267 = vmatmul.bf16.gmra.mxu1 %v6056_v54 }
 0x30d   : > { %v2600_v55 = vmax.f32 %v2552_v24, %v2568_v23  ;;  %v2446_v11 = vadd.f32 %v5424_v50, %v2410_v42  ;;  %4137 = vmatmul.msk.bf16.gmra.mxu2 %vm816_vm0, %v6057_v30  ;;  %v2055_v28 = vpop.f32.mrf.mxu3 }
 0x30e   : > { %v2985_v1 = vsel %vm2690_vm4, %v2984_v56, %v2983_v12  ;;  %v6058_v12 = vmax.f32 %v5975_v21, %v5288_v48 }
 0x30f   : > { %v2616_v49 = vpack.c.bf16 %v2600_v55, %v2600_v55  ;;  %v2478_v35 = vmax.f32 %v2446_v11, 0.0 }
 0x310   : > { %v2317_v52 = vpop.f32.mrf.mxu2  ;;  %v2141_v22 = vpop.f32.mrf.mxu0 }
 0x311   : > { %v2669_v27 = vunpack.c.l.b16 %v2616_v49  ;;  %v2785_v3 = vrot.slane %v2478_v35, 2  ;;  %v2860_v15 = vrot.slane %v2478_v35, 1  ;;  %v2318_v32 = vadd.f32 %v2317_v52, %v2229_v5  ;;  %v2230_v19 = vpop.f32.mrf.mxu1 }
 0x312   : > { %v2142_v33 = vadd.f32 %v2141_v22, %v2052_v17  ;;  %v6059_v52 = vmax.f32 %v5054_v20, %v5292_v63  ;;  %v6060_v22 = vld [vmem:[#allocation56_spill] sm:$0xff] }
 0x313   : > { %v2692_v14 = vrot.slane %v2669_v27, 6  ;;  %v3149_v46 = vrot.slane %v2669_v27, 3  ;;  %v2817_v0 = vmax.f32 %v2552_v24, %v2785_v3  ;;  %v2892_v16 = vmax.f32 %v2478_v35, %v2860_v15 }
 0x314   : > { %v2411_v23 = vmax.f32 %v6058_v12, %v2318_v32  ;;  %v2231_v39 = vadd.f32 %v2230_v19, %v2142_v33  ;;  %v6061_v19 = vld [vmem:[#allocation57_spill] sm:$0xff]  ;;  %v4434_v33 = vld [vmem:[%s5769_s3 + $0x10] sm:$0xff] }
 0x315   : > { %v2694_v10 = vsel %vm2693_vm5, %v2692_v14, %v2691_v31  ;;  %v3150_v7 = vsel %vm2693_vm5, %v3149_v46, %v3148_v29  ;;  %v2833_v42 = vpack.c.bf16 %v2817_v0, %v2817_v0  ;;  %v2908_v61 = vmax.f32 %v2892_v16, %v2785_v3  ;;  %v2057_v5 = vpop.f32.mrf.mxu3  ;;  %v6062_v46 = vld [vmem:[#allocation49_spill] sm:$0xff]  ;;  %3208 = vmatpush.bf16.msrb.mxu2 %v4434_v33 }
 0x316   : > { %v2447_v56 = vadd.f32 %v5424_v50, %v2411_v23 }
 0x317   : > { %v2924_v9 = vpack.c.bf16 %v2908_v61, %v2908_v61  ;;  %v3238_v17 = vunpack.c.l.b16 %v2833_v42 }
 0x318   : > { %v2479_v54 = vmax.f32 %v2447_v56, 0.0  ;;  %v2319_v55 = vpop.f32.mrf.mxu2  ;;  %v2144_v2 = vpop.f32.mrf.mxu0 }
 0x319   : > { %v2967_v24 = vunpack.c.l.b16 %v2924_v9  ;;  %v3258_v11 = vrot.slane %v3238_v17, 1  ;;  %v2320_v30 = vadd.f32 %v2319_v55, %v2231_v39  ;;  %v2233_v48 = vpop.f32.mrf.mxu1  ;;  %v2145_v49 = vadd.f32 %v2144_v2, %v2055_v28 }
 0x31a   : > { %v2521_v21 = vrot.slane %v2479_v54, 1  ;;  %v2569_v15 = vrot.slane %v2479_v54, 2 }
 0x31b   : > { %v2986_v35 = vrot.slane %v2967_v24, 4  ;;  %v3073_v31 = vrot.slane %v2967_v24, 7  ;;  %v3259_v29 = vsel %vm2693_vm5, %v3258_v11, %v3257_v59  ;;  %v2412_v27 = vmax.f32 %v6059_v52, %v2320_v30  ;;  %2183 = vmatmul.bf16.gmra.mxu0 %v6060_v22  ;;  %v4449_v24 = vld [vmem:[%s5769_s3 + $0x88] sm:$0xff] }
 0x31c   : > { %v2553_v3 = vmax.f32 %v2479_v54, %v2521_v21  ;;  %v2234_v32 = vadd.f32 %v2233_v48, %v2145_v49  ;;  %2272 = vmatmul.bf16.gmra.mxu1 %v6061_v19  ;;  %v6063_v54 = vmax.f32 %v5060_v26, %v5301_v13  ;;  %3045 = vmatpush.bf16.msrb.mxu0 %v4449_v24 }
 0x31d   : > { %v2987_v28 = vsel %vm2693_vm5, %v2986_v35, %v2985_v1  ;;  %v3074_v14 = vsel %vm2693_vm5, %v3073_v31, %v3072_v36  ;;  %v2448_v59 = vadd.f32 %v5424_v50, %v2412_v27  ;;  %4138 = vmatmul.msk.bf16.gmra.mxu2 %vm816_vm0, %v6062_v46  ;;  %v2060_v63 = vpop.f32.mrf.mxu3 }
 0x31e   : > { %v2601_v20 = vmax.f32 %v2553_v3, %v2569_v15 }
 0x31f   : > { %v2480_v0 = vmax.f32 %v2448_v59, 0.0 }
 0x320   : > { %v2617_v16 = vpack.c.bf16 %v2601_v20, %v2601_v20  ;;  %v2322_v12 = vpop.f32.mrf.mxu2  ;;  %v2146_v61 = vpop.f32.mrf.mxu0 }
 0x321   : > { %v2786_v23 = vrot.slane %v2480_v0, 2  ;;  %v2861_v39 = vrot.slane %v2480_v0, 1  ;;  %v2323_v42 = vadd.f32 %v2322_v12, %v2234_v32  ;;  %v2235_v56 = vpop.f32.mrf.mxu1  ;;  %v2147_v1 = vadd.f32 %v2146_v61, %v2057_v5 }
 0x322   : > { %v2670_v9 = vunpack.c.l.b16 %v2617_v16 }
 0x323   : > { %v2818_v36 = vmax.f32 %v2553_v3, %v2786_v23  ;;  %v2893_v17 = vmax.f32 %v2480_v0, %v2861_v39  ;;  %v2413_v55 = vmax.f32 %v6063_v54, %v2323_v42  ;;  %v2236_v2 = vadd.f32 %v2235_v56, %v2147_v1 }
 0x324   : > { %v2695_v11 = vrot.slane %v2670_v9, 5  ;;  %v3151_v30 = vrot.slane %v2670_v9, 2 }
 0x325   : > { %v2834_v48 = vpack.c.bf16 %v2818_v36, %v2818_v36  ;;  %v2909_v21 = vmax.f32 %v2893_v17, %v2786_v23  ;;  %v2449_v49 = vadd.f32 %v5424_v50, %v2413_v55  ;;  %v2062_v31 = vpop.f32.mrf.mxu3 }
 0x326   : > { %v2697_v5 = vsel %vm2696_vm6, %v2695_v11, %v2694_v10  ;;  %v3152_v35 = vsel %vm2696_vm6, %v3151_v30, %v3150_v7  ;;  %v4454_v10 = vld [vmem:[%s5769_s3 + $0xb0] sm:$0xff]  ;;  %v6064_v7 = vld [vmem:[#allocation54_spill] sm:$0xff] }
 0x327   : > { %v2925_v52 = vpack.c.bf16 %v2909_v21, %v2909_v21  ;;  %v3239_v26 = vunpack.c.l.b16 %v2834_v48  ;;  %v2481_v13 = vmax.f32 %v2449_v49, 0.0  ;;  %v6065_v12 = vmax.f32 %v5062_v43, %v6064_v7  ;;  %3132 = vmatpush.bf16.msrb.mxu1 %v4454_v10 }
 0x328   : > { %v2324_v27 = vpop.f32.mrf.mxu2  ;;  %v2149_v22 = vpop.f32.mrf.mxu0 }
 0x329   : > { %v2968_v3 = vunpack.c.l.b16 %v2925_v52  ;;  %v3260_v15 = vsel %vm2696_vm6, %v3239_v26, %v3259_v29  ;;  %v2522_v32 = vrot.slane %v2481_v13, 1  ;;  %v2238_v19 = vpop.f32.mrf.mxu1  ;;  %v2325_v33 = vadd.f32 %v2324_v27, %v2236_v2 }
 0x32a   : > { %v2150_v59 = vadd.f32 %v2149_v22, %v2060_v63  ;;  %v2570_v16 = vrot.slane %v2481_v13, 2 }
 0x32b   : > { %v2988_v46 = vrot.slane %v2968_v3, 3  ;;  %v3075_v20 = vrot.slane %v2968_v3, 6  ;;  %v2554_v0 = vmax.f32 %v2481_v13, %v2522_v32  ;;  %v2414_v23 = vmax.f32 %v6065_v12, %v2325_v33 }
 0x32c   : > { %v2239_v39 = vadd.f32 %v2238_v19, %v2150_v59 }
 0x32d   : > { %v2989_v29 = vsel %vm2696_vm6, %v2988_v46, %v2987_v28  ;;  %v3076_v42 = vsel %vm2696_vm6, %v3075_v20, %v3074_v14  ;;  %v2602_v61 = vmax.f32 %v2554_v0, %v2570_v16  ;;  %v2450_v63 = vadd.f32 %v5424_v50, %v2414_v23  ;;  %v2065_v56 = vpop.f32.mrf.mxu3 }
 0x32e   : > { %v6066_v14 = vmax.f32 %v5075_v41, %v5314_v51 }
 0x32f   : > { %v2618_v9 = vpack.c.bf16 %v2602_v61, %v2602_v61  ;;  %v2482_v1 = vmax.f32 %v2450_v63, 0.0 }
 0x330   : > { %v2327_v36 = vpop.f32.mrf.mxu2  ;;  %v2151_v55 = vpop.f32.mrf.mxu0 }
 0x331   : > { %v2671_v17 = vunpack.c.l.b16 %v2618_v9  ;;  %v2328_v54 = vadd.f32 %v2327_v36, %v2239_v39  ;;  %v2240_v24 = vpop.f32.mrf.mxu1  ;;  %v2787_v43 = vrot.slane %v2482_v1, 2  ;;  %v2862_v11 = vrot.slane %v2482_v1, 1 }
 0x332   : > { %v2152_v30 = vadd.f32 %v2151_v55, %v2062_v31 }
 0x333   : > { %v2698_v2 = vrot.slane %v2671_v17, 4  ;;  %v3153_v28 = vrot.slane %v2671_v17, 1  ;;  %v2415_v48 = vmax.f32 %v6066_v14, %v2328_v54  ;;  %v2819_v21 = vmax.f32 %v2554_v0, %v2787_v43 }
 0x334   : > { %v2894_v49 = vmax.f32 %v2482_v1, %v2862_v11  ;;  %v2241_v52 = vadd.f32 %v2240_v24, %v2152_v30 }
 0x335   : > { %v2451_v26 = vadd.f32 %v5424_v50, %v2415_v48  ;;  %v5592_v13 = vsel %vm2699_vm7, %v2698_v2, %v2697_v5  ;;  %v5595_v27 = vsel %vm2699_vm7, %v3153_v28, %v3152_v35  ;;  %v2835_v3 = vpack.c.bf16 %v2819_v21, %v2819_v21  ;;  %v2067_v31 = vpop.f32.mrf.mxu3 }
 0x336   : > { %v2910_v32 = vmax.f32 %v2894_v49, %v2787_v43  ;;  %v6067_v5 = vmax.f32 %v5080_v44, %v5318_v53  ;;  %v6068_v43 = vmax.f32 %v5087_v40, %v5327_v25 }
 0x337   : > { %v3240_v19 = vunpack.c.l.b16 %v2835_v3  ;;  %v2483_v59 = vmax.f32 %v2451_v26, 0.0 }
 0x338   : > { %v2926_v22 = vpack.c.bf16 %v2910_v32, %v2910_v32  ;;  %v2329_v33 = vpop.f32.mrf.mxu2  ;;  %v2154_v51 = vpop.f32.mrf.mxu0 }
 0x339   : > { %v2330_v41 = vadd.f32 %v2329_v33, %v2241_v52  ;;  %v2243_v46 = vpop.f32.mrf.mxu1  ;;  %v3261_v0 = vrot.slane %v3240_v19, 7  ;;  %v2155_v16 = vadd.f32 %v2154_v51, %v2065_v56  ;;  %v2523_v39 = vrot.slane %v2483_v59, 1 }
 0x33a   : > { %v2969_v20 = vunpack.c.l.b16 %v2926_v22  ;;  %v2571_v2 = vrot.slane %v2483_v59, 2  ;;  %v6069_v33 = vmax.f32 %v5089_v62, %v5331_v34 }
 0x33b   : > { %v2416_v10 = vmax.f32 %v6067_v5, %v2330_v41  ;;  %v5601_v12 = vsel %vm2699_vm7, %v3261_v0, %v3260_v15  ;;  %v2244_v23 = vadd.f32 %v2243_v46, %v2155_v16  ;;  %v2555_v44 = vmax.f32 %v2483_v59, %v2523_v39 }
 0x33c   : > { %v2990_v7 = vrot.slane %v2969_v20, 2  ;;  %v3077_v35 = vrot.slane %v2969_v20, 5 }
 0x33d   : > { %v2452_v61 = vadd.f32 %v5424_v50, %v2416_v10  ;;  %v2070_v63 = vpop.f32.mrf.mxu3  ;;  %v2603_v48 = vmax.f32 %v2555_v44, %v2571_v2 }
 0x33e   : > { %v5605_v9 = vsel %vm2699_vm7, %v2990_v7, %v2989_v29  ;;  %v5608_v1 = vsel %vm2699_vm7, %v3077_v35, %v3076_v42  ;;  %v4438_v42 = vld [vmem:[%s5769_s3 + $0x30] sm:$0xff] }
 0x33f   : > { %v2484_v56 = vmax.f32 %v2452_v61, 0.0  ;;  %2756 = vmatpush.bf16.msrb.mxu3 %v4438_v42 }
 0x340   : > { %v2332_v36 = vpop.f32.mrf.mxu2  ;;  %v2156_v54 = vpop.f32.mrf.mxu0 }
 0x341   : > { %v2788_v53 = vrot.slane %v2484_v56, 2  ;;  %v2333_v17 = vadd.f32 %v2332_v36, %v2244_v23  ;;  %v2245_v55 = vpop.f32.mrf.mxu1  ;;  %v2157_v15 = vadd.f32 %v2156_v54, %v2067_v31  ;;  %v2863_v28 = vrot.slane %v2484_v56, 1 }
 0x342   : > { %v2619_v31 = vpack.c.bf16 %v2603_v48, %v2603_v48 }
 0x343   : > { %v2820_v24 = vmax.f32 %v2555_v44, %v2788_v53  ;;  %v2417_v11 = vmax.f32 %v6068_v43, %v2333_v17  ;;  %v2246_v30 = vadd.f32 %v2245_v55, %v2157_v15  ;;  %v2895_v32 = vmax.f32 %v2484_v56, %v2863_v28 }
 0x344   : > { %v2672_v16 = vunpack.c.l.b16 %v2619_v31 }
 0x345   : > { %v2453_v29 = vadd.f32 %v5424_v50, %v2417_v11  ;;  %v2072_v14 = vpop.f32.mrf.mxu3  ;;  %v2911_v46 = vmax.f32 %v2895_v32, %v2788_v53  ;;  %v2836_v35 = vpack.c.bf16 %v2820_v24, %v2820_v24  ;;  %v6070_v53 = vmax.f32 %v5102_v4, %v5340_v38 }
 0x346   : > { %v2701_v34 = vrot.slane %v2672_v16, 3 }
 0x347   : > { %v2485_v21 = vmax.f32 %v2453_v29, 0.0  ;;  %v2927_v56 = vpack.c.bf16 %v2911_v46, %v2911_v46 }
 0x348   : > { %v2334_v49 = vpop.f32.mrf.mxu2  ;;  %v2159_v26 = vpop.f32.mrf.mxu0 }
 0x349   : > { %v2524_v52 = vrot.slane %v2485_v21, 1  ;;  %v2248_v3 = vpop.f32.mrf.mxu1  ;;  %v2335_v40 = vadd.f32 %v2334_v49, %v2246_v30  ;;  %v2160_v25 = vadd.f32 %v2159_v26, %v2070_v63  ;;  %v2572_v19 = vrot.slane %v2485_v21, 2 }
 0x34a   : > { %v3241_v30 = vunpack.c.l.b16 %v2836_v35  ;;  %v2970_v42 = vunpack.c.l.b16 %v2927_v56 }
 0x34b   : > { %v2556_v22 = vmax.f32 %v2485_v21, %v2524_v52  ;;  %v2418_v59 = vmax.f32 %v6069_v33, %v2335_v40  ;;  %v2249_v41 = vadd.f32 %v2248_v3, %v2160_v25  ;;  %v4433_v21 = vld [vmem:[%s5769_s3 + $0x8] sm:$0xff] }
 0x34c   : > { %3209 = vmatpush.bf16.msrb.mxu2 %v4433_v21  ;;  %v3263_v26 = vrot.slane %v3241_v30, 6  ;;  %v2992_v31 = vrot.slane %v2970_v42, 1  ;;  %v5651_v21 = vld [vmem:[%s5768_s2] ss:$0 sm:$0xff] }
 0x34d   : > { %v2604_v51 = vmax.f32 %v2556_v22, %v2572_v19  ;;  %v2454_v20 = vadd.f32 %v5424_v50, %v2418_v59  ;;  %v2075_v0 = vpop.f32.mrf.mxu3 }
 0x34f   : > { %v2620_v5 = vpack.c.bf16 %v2604_v51, %v2604_v51  ;;  %v2486_v10 = vmax.f32 %v2454_v20, 0.0  ;;  %v6071_v51 = vmax.f32 %v5107_v8, %v5344_v60  ;;  %v3079_v20 = vrot.slane %v2970_v42, 4 }
 0x350   : > { %v2337_v7 = vpop.f32.mrf.mxu2  ;;  %v2161_v61 = vpop.f32.mrf.mxu0 }
 0x351   : > { %v2673_v23 = vunpack.c.l.b16 %v2620_v5  ;;  %v2338_v39 = vadd.f32 %v2337_v7, %v2249_v41  ;;  %v2250_v63 = vpop.f32.mrf.mxu1  ;;  %v2789_v36 = vrot.slane %v2486_v10, 2  ;;  %v2864_v44 = vrot.slane %v2486_v10, 1 }
 0x352   : > { %v2162_v62 = vadd.f32 %v2161_v61, %v2072_v14 }
 0x353   : > { %v2702_v17 = vrot.slane %v2673_v23, 2  ;;  %v3155_v54 = vrot.slane %v2673_v23, 7  ;;  %v2419_v55 = vmax.f32 %v6070_v53, %v2338_v39  ;;  %v2821_v15 = vmax.f32 %v2556_v22, %v2789_v36  ;;  %v4453_v39 = vld [vmem:[%s5769_s3 + $0xa8] sm:$0xff] }
 0x354   : > { %v2896_v43 = vmax.f32 %v2486_v10, %v2864_v44  ;;  %v2251_v11 = vadd.f32 %v2250_v63, %v2162_v62  ;;  %3133 = vmatpush.bf16.msrb.mxu1 %v4453_v39 }
 0x355   : > { %v2703_v24 = vsel %vm2682_vm1, %v2702_v17, %v2701_v34  ;;  %v3156_v2 = vsel %vm2682_vm1, %v3155_v54, %v2672_v16  ;;  %v2455_v29 = vadd.f32 %v5424_v50, %v2419_v55  ;;  %v2837_v28 = vpack.c.bf16 %v2821_v15, %v2821_v15  ;;  %v2077_v48 = vpop.f32.mrf.mxu3 }
 0x356   : > { %v2912_v14 = vmax.f32 %v2896_v43, %v2789_v36 }
 0x357   : > { %v2487_v4 = vmax.f32 %v2455_v29, 0.0  ;;  %v3242_v49 = vunpack.c.l.b16 %v2837_v28 }
 0x358   : > { %v2928_v38 = vpack.c.bf16 %v2912_v14, %v2912_v14  ;;  %v2339_v52 = vpop.f32.mrf.mxu2  ;;  %v2164_v40 = vpop.f32.mrf.mxu0 }
 0x359   : > { %v2525_v3 = vrot.slane %v2487_v4, 1  ;;  %v2340_v32 = vadd.f32 %v2339_v52, %v2251_v11  ;;  %v2253_v25 = vpop.f32.mrf.mxu1  ;;  %v3264_v19 = vrot.slane %v3242_v49, 5  ;;  %v2165_v33 = vadd.f32 %v2164_v40, %v2075_v0  ;;  %v4448_v0 = vld [vmem:[%s5769_s3 + $0x80] sm:$0xff] }
 0x35a   : > { %v2971_v22 = vunpack.c.l.b16 %v2928_v38  ;;  %v2573_v41 = vrot.slane %v2487_v4, 2  ;;  %3046 = vmatpush.bf16.msrb.mxu0 %v4448_v0  ;;  %v6072_v11 = vmax.f32 %v5114_v47, %v5353_v18 }
 0x35b   : > { %v2557_v59 = vmax.f32 %v2487_v4, %v2525_v3  ;;  %v2420_v46 = vmax.f32 %v6071_v51, %v2340_v32  ;;  %v3265_v10 = vsel %vm2682_vm1, %v3264_v19, %v3263_v26  ;;  %v2254_v23 = vadd.f32 %v2253_v25, %v2165_v33 }
 0x35c   : > { %v2993_v16 = vsel %vm2682_vm1, %v2971_v22, %v2992_v31  ;;  %v3080_v5 = vrot.slane %v2971_v22, 3  ;;  %v6073_v33 = vmax.f32 %v5119_v6, %v5357_v58 }
 0x35d   : > { %v2605_v7 = vmax.f32 %v2557_v59, %v2573_v41  ;;  %v2456_v35 = vadd.f32 %v5424_v50, %v2420_v46  ;;  %v2080_v60 = vpop.f32.mrf.mxu3 }
 0x35e   : > { %v3081_v8 = vsel %vm2682_vm1, %v3080_v5, %v3079_v20 }
 0x35f   : > { %v2621_v61 = vpack.c.bf16 %v2605_v7, %v2605_v7  ;;  %v2488_v63 = vmax.f32 %v2456_v35, 0.0 }
 0x360   : > { %v2342_v56 = vpop.f32.mrf.mxu2  ;;  %v2166_v34 = vpop.f32.mrf.mxu0 }
 0x361   : > { %v2674_v36 = vunpack.c.l.b16 %v2621_v61  ;;  %v2790_v44 = vrot.slane %v2488_v63, 2  ;;  %v2865_v50 = vrot.slane %v2488_v63, 1  ;;  %v2343_v62 = vadd.f32 %v2342_v56, %v2254_v23  ;;  %v2255_v17 = vpop.f32.mrf.mxu1 }
 0x362   : > { %v2167_v54 = vadd.f32 %v2166_v34, %v2077_v48 }
 0x363   : > { %v2704_v53 = vrot.slane %v2674_v36, 1  ;;  %v3157_v55 = vrot.slane %v2674_v36, 6  ;;  %v2822_v15 = vmax.f32 %v2557_v59, %v2790_v44  ;;  %v2897_v43 = vmax.f32 %v2488_v63, %v2865_v50 }
 0x364   : > { %v2421_v30 = vmax.f32 %v6072_v11, %v2343_v62  ;;  %v2256_v52 = vadd.f32 %v2255_v17, %v2167_v54 }
 0x365   : > { %v2705_v29 = vsel %vm2685_vm2, %v2704_v53, %v2703_v24  ;;  %v3158_v42 = vsel %vm2685_vm2, %v3157_v55, %v3156_v2  ;;  %v2838_v28 = vpack.c.bf16 %v2822_v15, %v2822_v15  ;;  %v2913_v14 = vmax.f32 %v2897_v43, %v2790_v44  ;;  %v2082_v4 = vpop.f32.mrf.mxu3  ;;  %v4437_v55 = vld [vmem:[%s5769_s3 + $0x28] sm:$0xff] }
 0x366   : > { %v2457_v48 = vadd.f32 %v5651_v21, %v2421_v30  ;;  %2757 = vmatpush.bf16.msrb.mxu3 %v4437_v55 }
 0x367   : > { %v2929_v38 = vpack.c.bf16 %v2913_v14, %v2913_v14  ;;  %v3243_v49 = vunpack.c.l.b16 %v2838_v28 }
 0x368   : > { %v2489_v26 = vmax.f32 %v2457_v48, 0.0  ;;  %v2344_v47 = vpop.f32.mrf.mxu2  ;;  %v2169_v32 = vpop.f32.mrf.mxu0 }
 0x369   : > { %v2972_v18 = vunpack.c.l.b16 %v2929_v38  ;;  %v3266_v3 = vrot.slane %v3243_v49, 4  ;;  %v2345_v24 = vadd.f32 %v2344_v47, %v2256_v52  ;;  %v2258_v2 = vpop.f32.mrf.mxu1  ;;  %v2170_v25 = vadd.f32 %v2169_v32, %v2080_v60 }
 0x36a   : > { %v2526_v40 = vrot.slane %v2489_v26, 1  ;;  %v2574_v51 = vrot.slane %v2489_v26, 2 }
 0x36b   : > { %v2994_v31 = vrot.slane %v2972_v18, 7  ;;  %v3082_v22 = vrot.slane %v2972_v18, 2  ;;  %v3267_v19 = vsel %vm2685_vm2, %v3266_v3, %v3265_v10  ;;  %v2422_v59 = vmax.f32 %v6073_v33, %v2345_v24  ;;  %v6075_v24 = vld [vmem:[#allocation4_spill] sm:$0xff] }
 0x36c   : > { %v2558_v41 = vmax.f32 %v2489_v26, %v2526_v40  ;;  %v2259_v7 = vadd.f32 %v2258_v2, %v2170_v25  ;;  %v6076_v32 = vmax.f32 %v5137_v37, %v6075_v24  ;;  %v4447_v24 = vld [vmem:[%s5769_s3 + $0x78] sm:$0xff] }
 0x36d   : > { %v2995_v46 = vsel %vm2685_vm2, %v2994_v31, %v2993_v16  ;;  %v3083_v20 = vsel %vm2685_vm2, %v3082_v22, %v3081_v8  ;;  %v2458_v5 = vadd.f32 %v5651_v21, %v2422_v59  ;;  %v2085_v60 = vpop.f32.mrf.mxu3  ;;  %v6074_v16 = vmax.f32 %v5132_v57, %v5366_v45  ;;  %3047 = vmatpush.bf16.msrb.mxu0 %v4447_v24 }
 0x36e   : > { %v2606_v35 = vmax.f32 %v2558_v41, %v2574_v51 }
 0x36f   : > { %v2490_v23 = vmax.f32 %v2458_v5, 0.0 }
 0x370   : > { %v2622_v0 = vpack.c.bf16 %v2606_v35, %v2606_v35  ;;  %v2347_v39 = vpop.f32.mrf.mxu2  ;;  %v2171_v56 = vpop.f32.mrf.mxu0 }
 0x371   : > { %v2791_v61 = vrot.slane %v2490_v23, 2  ;;  %v2866_v10 = vrot.slane %v2490_v23, 1  ;;  %v2348_v63 = vadd.f32 %v2347_v39, %v2259_v7  ;;  %v2260_v6 = vpop.f32.mrf.mxu1  ;;  %v2172_v34 = vadd.f32 %v2171_v56, %v2082_v4 }
 0x372   : > { %v2675_v58 = vunpack.c.l.b16 %v2622_v0 }
 0x373   : > { %v2823_v36 = vmax.f32 %v2558_v41, %v2791_v61  ;;  %v2898_v44 = vmax.f32 %v2490_v23, %v2866_v10  ;;  %v2423_v8 = vmax.f32 %v6074_v16, %v2348_v63  ;;  %v2261_v57 = vadd.f32 %v2260_v6, %v2172_v34 }
 0x374   : > { %v2706_v50 = vsel %vm2687_vm3, %v2675_v58, %v2705_v29  ;;  %v3159_v62 = vrot.slane %v2675_v58, 5 }
 0x375   : > { %v2839_v17 = vpack.c.bf16 %v2823_v36, %v2823_v36  ;;  %v2914_v54 = vmax.f32 %v2898_v44, %v2791_v61  ;;  %v2459_v53 = vadd.f32 %v5651_v21, %v2423_v8  ;;  %v6078_v61 = vld [vmem:[#allocation5_spill] sm:$0xff] }
 0x376   : > { %v3160_v15 = vsel %vm2687_vm3, %v3159_v62, %v3158_v42  ;;  %v2087_v42 = vpop.f32.mrf.mxu3  ;;  %v4432_v62 = vld [vmem:[%s5769_s3] sm:$0xff] }
 0x377   : > { %v2930_v43 = vpack.c.bf16 %v2914_v54, %v2914_v54  ;;  %v3244_v11 = vunpack.c.l.b16 %v2839_v17  ;;  %v2491_v30 = vmax.f32 %v2459_v53, 0.0  ;;  %3210 = vmatpush.bf16.msrb.mxu2 %v4432_v62 }
 0x378   : > { %v2349_v45 = vpop.f32.mrf.mxu2  ;;  %v2174_v48 = vpop.f32.mrf.mxu0 }
 0x379   : > { %v2973_v28 = vunpack.c.l.b16 %v2930_v43  ;;  %v3268_v29 = vrot.slane %v3244_v11, 3  ;;  %v2527_v14 = vrot.slane %v2491_v30, 1  ;;  %v2263_v4 = vpop.f32.mrf.mxu1  ;;  %v2575_v38 = vrot.slane %v2491_v30, 2 }
 0x37a   : > { %v2350_v49 = vadd.f32 %v2349_v45, %v2261_v57  ;;  %v2175_v52 = vadd.f32 %v2174_v48, %v2085_v60  ;;  %v6077_v60 = vld [vmem:[#allocation58_spill] sm:$0xff] }
 0x37b   : > { %v2996_v26 = vrot.slane %v2973_v28, 6  ;;  %v3084_v47 = vrot.slane %v2973_v28, 1  ;;  %v3269_v18 = vsel %vm2687_vm3, %v3268_v29, %v3267_v19  ;;  %v2559_v3 = vmax.f32 %v2491_v30, %v2527_v14  ;;  %v6080_v14 = vld [vmem:[#allocation59_spill] sm:$0xff]  ;;  %v6081_v48 = vld [vmem:[#allocation6_spill] sm:$0xff] }
 0x37c   : > { %v2424_v2 = vmax.f32 %v6076_v32, %v2350_v49  ;;  %v2264_v22 = vadd.f32 %v2263_v4, %v2175_v52  ;;  %v6082_v4 = vmax.f32 %v6080_v14, %v6081_v48  ;;  %v4452_v32 = vld [vmem:[%s5769_s3 + $0xa0] sm:$0xff] }
 0x37d   : > { %v2997_v40 = vsel %vm2687_vm3, %v2996_v26, %v2995_v46  ;;  %v3085_v25 = vsel %vm2687_vm3, %v3084_v47, %v3083_v20  ;;  %v2607_v31 = vmax.f32 %v2559_v3, %v2575_v38  ;;  %v6079_v46 = vmax.f32 %v6077_v60, %v6078_v61  ;;  %3134 = vmatpush.bf16.msrb.mxu1 %v4452_v32  ;;  %v6084_v60 = vld [vmem:[#allocation2_spill] sm:$0xff] }
 0x37e   : > { %v2460_v33 = vadd.f32 %v5651_v21, %v2424_v2  ;;  %v2090_v44 = vpop.f32.mrf.mxu3 }
 0x37f   : > { %v2623_v59 = vpack.c.bf16 %v2607_v31, %v2607_v31 }
 0x380   : > { %v2492_v41 = vmax.f32 %v2460_v33, 0.0  ;;  %v2352_v51 = vpop.f32.mrf.mxu2  ;;  %v2176_v19 = vpop.f32.mrf.mxu0 }
 0x381   : > { %v2676_v5 = vunpack.c.l.b16 %v2623_v59  ;;  %v2353_v7 = vadd.f32 %v2352_v51, %v2264_v22  ;;  %v2265_v35 = vpop.f32.mrf.mxu1  ;;  %v2177_v20 = vadd.f32 %v2176_v19, %v2087_v42 }
 0x382   : > { %v2792_v23 = vrot.slane %v2492_v41, 2  ;;  %v2867_v0 = vrot.slane %v2492_v41, 1 }
 0x383   : > { %v2707_v39 = vrot.slane %v2676_v5, 7  ;;  %v3161_v37 = vrot.slane %v2676_v5, 4  ;;  %v2425_v10 = vmax.f32 %v6079_v46, %v2353_v7  ;;  %v2266_v17 = vadd.f32 %v2265_v35, %v2177_v20  ;;  %v4446_v46 = vld [vmem:[%s5769_s3 + $0x70] sm:$0xff] }
 0x384   : > { %v2824_v63 = vmax.f32 %v2559_v3, %v2792_v23  ;;  %v2899_v56 = vmax.f32 %v2492_v41, %v2867_v0  ;;  %3314 = vmatpush.bf16.msra.mxu3 %v4446_v46 }
 0x385   : > { %v2708_v6 = vsel %vm2690_vm4, %v2707_v39, %v2706_v50  ;;  %v3162_v58 = vsel %vm2690_vm4, %v3161_v37, %v3160_v15  ;;  %v2461_v36 = vadd.f32 %v5651_v21, %v2425_v10  ;;  %v6083_v37 = vld [vmem:[#allocation60_spill] sm:$0xff] }
 0x386   : > { %v2840_v16 = vpack.c.bf16 %v2824_v63, %v2824_v63  ;;  %v2915_v8 = vmax.f32 %v2899_v56, %v2792_v23  ;;  %v2092_v33 = vpop.f32.mrf.mxu3 }
 0x387   : > { %v2493_v34 = vmax.f32 %v2461_v36, 0.0 }
 0x388   : > { %v2931_v54 = vpack.c.bf16 %v2915_v8, %v2915_v8  ;;  %v3245_v53 = vunpack.c.l.b16 %v2840_v16  ;;  %v2354_v55 = vpop.f32.mrf.mxu2  ;;  %v2179_v50 = vpop.f32.mrf.mxu0 }
 0x389   : > { %v2528_v43 = vrot.slane %v2493_v34, 1  ;;  %v2355_v11 = vadd.f32 %v2354_v55, %v2266_v17  ;;  %v2268_v30 = vpop.f32.mrf.mxu1  ;;  %v2180_v45 = vadd.f32 %v2179_v50, %v2090_v44  ;;  %v2576_v29 = vrot.slane %v2493_v34, 2  ;;  %v4445_v17 = vld [vmem:[%s5769_s3 + $0x68] sm:$0xff] }
 0x38a   : > { %v2974_v15 = vunpack.c.l.b16 %v2931_v54  ;;  %v3270_v57 = vrot.slane %v3245_v53, 2  ;;  %3315 = vmatpush.bf16.msra.mxu3 %v4445_v17 }
 0x38b   : > { %v2560_v28 = vmax.f32 %v2493_v34, %v2528_v43  ;;  %v2426_v38 = vmax.f32 %v6082_v4, %v2355_v11  ;;  %v2269_v42 = vadd.f32 %v2268_v30, %v2180_v45  ;;  %v6087_v45 = vld [vmem:[#allocation3_spill] sm:$0xff] }
 0x38c   : > { %v2998_v49 = vrot.slane %v2974_v15, 5  ;;  %v3086_v52 = vsel %vm2690_vm4, %v2974_v15, %v3085_v25  ;;  %v3271_v26 = vsel %vm2690_vm4, %v3270_v57, %v3269_v18  ;;  %v6086_v57 = vld [vmem:[#allocation61_spill] sm:$0xff] }
 0x38d   : > { %v2608_v47 = vmax.f32 %v2560_v28, %v2576_v29  ;;  %v2462_v3 = vadd.f32 %v5651_v21, %v2426_v38  ;;  %v4444_v38 = vld [vmem:[%s5769_s3 + $0x60] sm:$0xff] }
 0x38e   : > { %v2999_v2 = vsel %vm2690_vm4, %v2998_v49, %v2997_v40  ;;  %v6085_v40 = vmax.f32 %v6083_v37, %v6084_v60  ;;  %v2095_v55 = vpop.f32.mrf.mxu3  ;;  %3316 = vmatpush.bf16.msra.mxu3 %v4444_v38 }
 0x38f   : > { %v2624_v31 = vpack.c.bf16 %v2608_v47, %v2608_v47  ;;  %v2494_v22 = vmax.f32 %v2462_v3, 0.0 }
 0x390   : > { %v2357_v18 = vpop.f32.mrf.mxu2  ;;  %v2181_v5 = vpop.f32.mrf.mxu0 }
 0x391   : > { %v2677_v25 = vunpack.c.l.b16 %v2624_v31  ;;  %v2793_v59 = vrot.slane %v2494_v22, 2  ;;  %v2868_v41 = vrot.slane %v2494_v22, 1  ;;  %v2358_v51 = vadd.f32 %v2357_v18, %v2269_v42  ;;  %v2270_v19 = vpop.f32.mrf.mxu1 }
 0x392   : > { %v2182_v7 = vadd.f32 %v2181_v5, %v2092_v33 }
 0x393   : > { %v2709_v35 = vrot.slane %v2677_v25, 6  ;;  %v3163_v23 = vrot.slane %v2677_v25, 3  ;;  %v2825_v0 = vmax.f32 %v2560_v28, %v2793_v59  ;;  %v2900_v39 = vmax.f32 %v2494_v22, %v2868_v41  ;;  %v4443_v22 = vld [vmem:[%s5769_s3 + $0x58] sm:$0xff] }
 0x394   : > { %v2427_v61 = vmax.f32 %v6085_v40, %v2358_v51  ;;  %v2271_v8 = vadd.f32 %v2270_v19, %v2182_v7  ;;  %v6088_v28 = vmax.f32 %v6086_v57, %v6087_v45  ;;  %3317 = vmatpush.bf16.msra.mxu3 %v4443_v22  ;;  %v6089_v7 = vld [vmem:[#allocation62_spill] sm:$0xff]  ;;  %v6090_v19 = vld [vmem:[#allocation9_spill] sm:$0xff] }
 0x395   : > { %v2710_v10 = vsel %vm2693_vm5, %v2709_v35, %v2708_v6  ;;  %v3164_v20 = vsel %vm2693_vm5, %v3163_v23, %v3162_v58  ;;  %v2841_v63 = vpack.c.bf16 %v2825_v0, %v2825_v0  ;;  %v2916_v56 = vmax.f32 %v2900_v39, %v2793_v59 }
 0x396   : > { %v2463_v36 = vadd.f32 %v5651_v21, %v2427_v61  ;;  %v2097_v5 = vpop.f32.mrf.mxu3  ;;  %v6091_v35 = vmax.f32 %v6089_v7, %v6090_v19 }
 0x397   : > { %v2932_v44 = vpack.c.bf16 %v2916_v56, %v2916_v56  ;;  %v3246_v16 = vunpack.c.l.b16 %v2841_v63 }
 0x398   : > { %v2495_v62 = vmax.f32 %v2463_v36, 0.0  ;;  %v2359_v34 = vpop.f32.mrf.mxu2  ;;  %v2184_v43 = vpop.f32.mrf.mxu0 }
 0x399   : > { %v2975_v54 = vunpack.c.l.b16 %v2932_v44  ;;  %v3272_v53 = vrot.slane %v3246_v16, 1  ;;  %v2360_v6 = vadd.f32 %v2359_v34, %v2271_v8  ;;  %v2185_v11 = vadd.f32 %v2184_v43, %v2095_v55  ;;  %v2273_v4 = vpop.f32.mrf.mxu1 }
 0x39a   : > { %v2529_v58 = vrot.slane %v2495_v62, 1  ;;  %v2577_v48 = vrot.slane %v2495_v62, 2 }
 0x39b   : > { %v3000_v50 = vrot.slane %v2975_v54, 4  ;;  %v3087_v30 = vrot.slane %v2975_v54, 7  ;;  %v3273_v15 = vsel %vm2693_vm5, %v3272_v53, %v3271_v26  ;;  %v2428_v29 = vmax.f32 %v6088_v28, %v2360_v6 }
 0x39c   : > { %v2561_v14 = vmax.f32 %v2495_v62, %v2529_v58  ;;  %v2274_v42 = vadd.f32 %v2273_v4, %v2185_v11  ;;  %v6092_v11 = vld [vmem:[#allocation63_spill] sm:$0xff] }
 0x39d   : > { %v3001_v49 = vsel %vm2693_vm5, %v3000_v50, %v2999_v2  ;;  %v3088_v47 = vsel %vm2693_vm5, %v3087_v30, %v3086_v52  ;;  %v2464_v3 = vadd.f32 %v5651_v21, %v2428_v29  ;;  %v4442_v52 = vld [vmem:[%s5769_s3 + $0x50] sm:$0xff] }
 0x39e   : > { %v2609_v24 = vmax.f32 %v2561_v14, %v2577_v48  ;;  %3318 = vmatpush.bf16.msra.mxu3 %v4442_v52 }
 0x39f   : > { %v2496_v26 = vmax.f32 %v2464_v3, 0.0 }
 0x3a0   : > { %v2625_v32 = vpack.c.bf16 %v2609_v24, %v2609_v24  ;;  %v2362_v31 = vpop.f32.mrf.mxu2  ;;  %v2186_v59 = vpop.f32.mrf.mxu0 }
 0x3a1   : > { %v2794_v33 = vrot.slane %v2496_v26, 2  ;;  %v2869_v18 = vrot.slane %v2496_v26, 1  ;;  %v2363_v25 = vadd.f32 %v2362_v31, %v2274_v42  ;;  %v2187_v37 = vadd.f32 %v2186_v59, %v2097_v5  ;;  %v2275_v16 = vpop.f32.mrf.mxu1 }
 0x3a2   : > { %v2678_v41 = vunpack.c.l.b16 %v2625_v32 }
 0x3a3   : > { %v2826_v2 = vmax.f32 %v2561_v14, %v2794_v33  ;;  %v2901_v51 = vmax.f32 %v2496_v26, %v2869_v18  ;;  %v2429_v23 = vmax.f32 %v6091_v35, %v2363_v25  ;;  %v2276_v8 = vadd.f32 %v2275_v16, %v2187_v37  ;;  %v4466_v37 = vld [vmem:[%s5770_s4] ss:$0 sm:$0xff] }
 0x3a4   : > { %v2711_v0 = vrot.slane %v2678_v41, 5  ;;  %v3165_v39 = vrot.slane %v2678_v41, 2 }
 0x3a5   : > { %v2842_v60 = vpack.c.bf16 %v2826_v2, %v2826_v2  ;;  %v2917_v40 = vmax.f32 %v2901_v51, %v2794_v33  ;;  %v2465_v61 = vadd.f32 %v5651_v21, %v2429_v23 }
 0x3a6   : > { %v2712_v46 = vsel %vm2696_vm6, %v2711_v0, %v2710_v10  ;;  %v3166_v63 = vsel %vm2696_vm6, %v3165_v39, %v3164_v20  ;;  %v6093_v10 = vld [vmem:[#allocation10_spill] sm:$0xff] }
 0x3a7   : > { %v2933_v56 = vpack.c.bf16 %v2917_v40, %v2917_v40  ;;  %v3247_v36 = vunpack.c.l.b16 %v2842_v60  ;;  %v2497_v44 = vmax.f32 %v2465_v61, 0.0  ;;  %v6094_v50 = vmax.f32 %v6092_v11, %v6093_v10 }
 0x3a8   : > { %v2364_v62 = vpop.f32.mrf.mxu2 }
 0x3a9   : > { %v2976_v34 = vunpack.c.l.b16 %v2933_v56  ;;  %v3274_v17 = vsel %vm2696_vm6, %v3247_v36, %v3273_v15  ;;  %v2530_v54 = vrot.slane %v2497_v44, 1  ;;  %v2365_v53 = vadd.f32 %v2364_v62, %v2276_v8 }
 0x3aa   : > { %v2578_v58 = vrot.slane %v2497_v44, 2 }
 0x3ab   : > { %v3002_v55 = vrot.slane %v2976_v34, 3  ;;  %v3089_v6 = vrot.slane %v2976_v34, 6  ;;  %v2562_v43 = vmax.f32 %v2497_v44, %v2530_v54  ;;  %v2430_v20 = vmax.f32 %v6094_v50, %v2365_v53 }
 0x3ad   : > { %v3003_v30 = vsel %vm2696_vm6, %v3002_v55, %v3001_v49  ;;  %v3090_v57 = vsel %vm2696_vm6, %v3089_v6, %v3088_v47  ;;  %v2610_v45 = vmax.f32 %v2562_v43, %v2578_v58  ;;  %v2466_v28 = vadd.f32 %v5651_v21, %v2430_v20 }
 0x3af   : > { %v2626_v29 = vpack.c.bf16 %v2610_v45, %v2610_v45  ;;  %v2498_v14 = vmax.f32 %v2466_v28, 0.0 }
 0x3b1   : > { %v2679_v15 = vunpack.c.l.b16 %v2626_v29  ;;  %v2795_v48 = vrot.slane %v2498_v14, 2  ;;  %v2870_v4 = vrot.slane %v2498_v14, 1 }
 0x3b3   : > { %v2713_v38 = vrot.slane %v2679_v15, 4  ;;  %v3167_v3 = vrot.slane %v2679_v15, 1  ;;  %v2827_v42 = vmax.f32 %v2562_v43, %v2795_v48  ;;  %v2902_v24 = vmax.f32 %v2498_v14, %v2870_v4 }
 0x3b5   : > { %v2714_v26 = vsel %vm2699_vm7, %v2713_v38, %v2712_v46  ;;  %v3168_v32 = vsel %vm2699_vm7, %v3167_v3, %v3166_v63  ;;  %v2843_v49 = vpack.c.bf16 %v2827_v42, %v2827_v42  ;;  %v2918_v31 = vmax.f32 %v2902_v24, %v2795_v48 }
 0x3b6   : > { %v2715_v47 = vpack.c.b16 %v2714_v26, %v5592_v13  ;;  %v3169_v21 = vpack.c.b16 %v3168_v32, %v5595_v27 }
 0x3b7   : > { %v2934_v22 = vpack.c.bf16 %v2918_v31, %v2918_v31  ;;  %v3248_v33 = vunpack.c.l.b16 %v2843_v49 }
 0x3b8   : > { %4169 = vmatmul.msk.bf16.vlgmr.msrb.gmra.mxu3 %vm2746_vm8, %v2715_v47  ;;  %4262 = vmatmul.msk.bf16.vlgmr.msrb.gmra.mxu2 %vm2746_vm8, %v3169_v21 }
 0x3b9   : > { %v2977_v18 = vunpack.c.l.b16 %v2934_v22  ;;  %v3275_v25 = vrot.slane %v3248_v33, 7 }
 0x3bb   : > { %v3004_v59 = vrot.slane %v2977_v18, 2  ;;  %v3091_v41 = vrot.slane %v2977_v18, 5  ;;  %v3276_v52 = vsel %vm2699_vm7, %v3275_v25, %v3274_v17 }
 0x3bc   : > { %v3277_v2 = vpack.c.b16 %v3276_v52, %v5601_v12 }
 0x3bd   : > { %v3005_v51 = vsel %vm2699_vm7, %v3004_v59, %v3003_v30  ;;  %v3092_v13 = vsel %vm2699_vm7, %v3091_v41, %v3090_v57 }
 0x3be   : > { %v3006_v27 = vpack.c.b16 %v3005_v51, %v5605_v9  ;;  %v3093_v5 = vpack.c.b16 %v3092_v13, %v5608_v1 }
 0x3c0   : > { %4210 = vmatmul.msk.bf16.vlgmr.msrb.gmra.mxu0 %vm2746_vm8, %v3006_v27  ;;  %4241 = vmatmul.msk.bf16.vlgmr.msrb.gmra.mxu1 %vm2746_vm8, %v3093_v5 }
 0x3c8   : > { %4283 = vmatmul.msk.bf16.vlgmr.msra.gmra.mxu3 %vm2746_vm8, %v3277_v2 }
 0x43b   : > { %v2759_v7 = vpop.f32.mrf.mxu3  ;;  %v3212_v12 = vpop.f32.mrf.mxu2 }
 0x43c   : > { %v3213_v0 = vadd.f32 %v3212_v12, %v2759_v7 }
 0x43d   : > { %v3049_v35 = vpop.f32.mrf.mxu0  ;;  %v3136_v9 = vpop.f32.mrf.mxu1 }
 0x443   : > { %v2761_v19 = vpop.f32.mrf.mxu3  ;;  %v3214_v40 = vpop.f32.mrf.mxu2 }
 0x444   : > { %v3215_v56 = vadd.f32 %v3214_v40, %v2761_v19 }
 0x445   : > { %v3051_v46 = vpop.f32.mrf.mxu0  ;;  %v3138_v16 = vpop.f32.mrf.mxu1 }
 0x44b   : > { %v3320_v23 = vpop.f32.mrf.mxu3 }
 0x44c   : > { %v3321_v39 = vadd.f32 %v3320_v23, %v3049_v35 }
 0x44e   : > { %v3325_v1 = vadd.f32 %v3321_v39, %v3213_v0 }
 0x450   : > { %v3327_v60 = vadd.f32 %v3325_v1, %v3136_v9 }
 0x452   : > { %v3333_v61 = vadd.f32 %v4466_v37, %v3327_v60 }
 0x453   : > { %v3322_v63 = vpop.f32.mrf.mxu3 }
 0x454   : > { %3335 = vst [vmem:[%s229_s19] sm:$0xff] %v3333_v61  ;;  %v3323_v36 = vadd.f32 %v3322_v63, %v3051_v46 }
 0x456   : > { %v3326_v44 = vadd.f32 %v3323_v36, %v3215_v56 }
 0x458   : > { %v3328_v8 = vadd.f32 %v3326_v44, %v3138_v16 }
 0x45a   : > { %v3334_v62 = vadd.f32 %v4466_v37, %v3328_v8 }
 0x45c   : > { %3336 = vst [vmem:[%s229_s19 + $0x8] sm:$0xff] %v3334_v62 }
 0x45d PF: > { %s15_s18 = sadd.s32 1, %s4474_s18  }
 0x45e   : > { %p12_p5 = scmp.ge.s32.totalorder %s15_s18, 6  }
 0x460   :  { %14 = sbr.rel (!%p12_p5) target bundleno = 1 (0x1), region = 76 }

</bundles_post_ra>
